<compile_context>
chip_gen: v7x
topology: tpu7x:2x2x1
jax: 0.10.0
libtpu: 0.0.40
codegen_flags: <defaults>
</compile_context>

<pallas_src>
import functools

import jax
import jax.numpy as jnp
from jax.experimental import pallas as pl
from jax.experimental.pallas import tpu as pltpu

W1 = 512     # module-level `w1` in the PyTorch source
LANE = 128   # TPU lane width: narrow feature dims are padded up to this


def _round_up(x, m):
    return (x + m - 1) // m * m


def _autoencoder_kernel(
    x_ref,
    w1_ref, b1_ref, w2_ref, b2_ref, w3_ref, b3_ref,   # encoder
    w4_ref, b4_ref, w5_ref, b5_ref, w6_ref, b6_ref,   # decoder
    noise_ref,
    yhat_ref, l_ref,
):
    # Weights are bf16 -> every dot is a bf16 x bf16 MXU matmul with f32
    # accumulation.  All element-wise math stays in f32.
    x = x_ref[...]                                     # [TILE_M, IN_PAD] f32

    # ---------- encoder ----------
    h = jnp.dot(x.astype(jnp.bfloat16), w1_ref[...],
                preferred_element_type=jnp.float32) + b1_ref[...]
    h = jnp.maximum(h, 0.0)                            # ReLU
    h = jnp.dot(h.astype(jnp.bfloat16), w2_ref[...],
                preferred_element_type=jnp.float32) + b2_ref[...]
    h = jnp.maximum(h, 0.0)                            # ReLU
    l = jnp.dot(h.astype(jnp.bfloat16), w3_ref[...],
                preferred_element_type=jnp.float32) + b3_ref[...]
    l = jnp.tanh(l)                                    # Tanh (EUP)

    # ---------- additive bottleneck noise (broadcast (1, BOT_PAD) over tile) ----------
    l = l + noise_ref[...]
    l_ref[...] = l                                     # lane-dense store

    # ---------- decoder ----------
    h = jnp.dot(l.astype(jnp.bfloat16), w4_ref[...],
                preferred_element_type=jnp.float32) + b4_ref[...]
    h = jnp.maximum(h, 0.0)                            # ReLU
    h = jnp.dot(h.astype(jnp.bfloat16), w5_ref[...],
                preferred_element_type=jnp.float32) + b5_ref[...]
    h = jnp.maximum(h, 0.0)                            # ReLU
    yhat_ref[...] = (
        jnp.dot(h.astype(jnp.bfloat16), w6_ref[...],
                preferred_element_type=jnp.float32) + b6_ref[...]
    )                                                  # lane-dense store


def init_params(key, input_dim, bottle_dim, dtype=jnp.float32):
    """PyTorch-Linear-style init: U(-1/sqrt(fan_in), 1/sqrt(fan_in)).
    Weights stored as [in_features, out_features], biases as [1, out]."""
    dims = [
        ("w1", "b1", input_dim, W1),
        ("w2", "b2", W1, W1 // 2),
        ("w3", "b3", W1 // 2, bottle_dim),
        ("w4", "b4", bottle_dim, W1 // 2),
        ("w5", "b5", W1 // 2, W1),
        ("w6", "b6", W1, input_dim),
    ]
    params = {}
    for wname, bname, fan_in, fan_out in dims:
        key, kw, kb = jax.random.split(key, 3)
        bound = 1.0 / jnp.sqrt(jnp.asarray(fan_in, dtype))
        params[wname] = jax.random.uniform(
            kw, (fan_in, fan_out), dtype, minval=-bound, maxval=bound)
        params[bname] = jax.random.uniform(
            kb, (1, fan_out), dtype, minval=-bound, maxval=bound)
    return params


def prepare_params(params, input_dim, bottle_dim):
    """Zero-pad the narrow feature dims to LANE and cast weights to bf16.
    Zero padding keeps the forward math exact."""
    in_pad = _round_up(input_dim, LANE)
    bot_pad = _round_up(bottle_dim, LANE)

    def pad_to(a, shape):
        return jnp.pad(a, [(0, t - s) for s, t in zip(a.shape, shape)])

    return {
        "w1": pad_to(params["w1"], (in_pad, W1)).astype(jnp.bfloat16),
        "b1": params["b1"].astype(jnp.float32),
        "w2": params["w2"].astype(jnp.bfloat16),
        "b2": params["b2"].astype(jnp.float32),
        "w3": pad_to(params["w3"], (W1 // 2, bot_pad)).astype(jnp.bfloat16),
        "b3": pad_to(params["b3"], (1, bot_pad)).astype(jnp.float32),
        "w4": pad_to(params["w4"], (bot_pad, W1 // 2)).astype(jnp.bfloat16),
        "b4": params["b4"].astype(jnp.float32),
        "w5": params["w5"].astype(jnp.bfloat16),
        "b5": params["b5"].astype(jnp.float32),
        "w6": pad_to(params["w6"], (W1, in_pad)).astype(jnp.bfloat16),
        "b6": pad_to(params["b6"], (1, in_pad)).astype(jnp.float32),
    }


@functools.partial(jax.jit, static_argnames=("tile_m",))
def neural_network5_forward(x, prepared, noise, *, tile_m=256):
    """x: [B, input_dim] f32.  prepared: padded/bf16 params (prepare_params).
    noise: [1, bottle_dim] f32 (= sqrt(noise_var) * randn).  Returns (y_hat, l)."""
    batch, input_dim = x.shape
    bottle_dim = noise.shape[1]
    in_pad = _round_up(input_dim, LANE)
    bot_pad = _round_up(bottle_dim, LANE)
    pb = _round_up(max(batch, 1), tile_m)          # pad batch to a tile multiple

    x_p = jnp.zeros((pb, in_pad), jnp.float32).at[:batch, :input_dim].set(
        x.astype(jnp.float32))
    noise_p = jnp.zeros((1, bot_pad), jnp.float32).at[:, :bottle_dim].set(
        noise.astype(jnp.float32))

    operands = (
        x_p,
        prepared["w1"], prepared["b1"],
        prepared["w2"], prepared["b2"],
        prepared["w3"], prepared["b3"],
        prepared["w4"], prepared["b4"],
        prepared["w5"], prepared["b5"],
        prepared["w6"], prepared["b6"],
        noise_p,
    )

    # x / y_hat / l stream per batch tile; everything else is VMEM-resident
    # (constant block index -> no re-DMA across grid steps).
    def _resident(op):
        return pl.BlockSpec(tuple(op.shape), lambda i: (0,) * op.ndim)

    in_specs = [pl.BlockSpec((tile_m, in_pad), lambda i: (i, 0))]
    in_specs += [_resident(op) for op in operands[1:]]

    out_specs = (
        pl.BlockSpec((tile_m, in_pad), lambda i: (i, 0)),    # y_hat tile
        pl.BlockSpec((tile_m, bot_pad), lambda i: (i, 0)),   # l tile
    )
    out_shape = (
        jax.ShapeDtypeStruct((pb, in_pad), jnp.float32),
        jax.ShapeDtypeStruct((pb, bot_pad), jnp.float32),
    )

    flops = 2 * pb * (
        in_pad * W1 + W1 * (W1 // 2) + (W1 // 2) * bot_pad
        + bot_pad * (W1 // 2) + (W1 // 2) * W1 + W1 * in_pad)
    bytes_accessed = (
        sum(int(op.size) * op.dtype.itemsize for op in operands)
        + pb * in_pad * 4 + pb * bot_pad * 4)

    y_pad, l_pad = pl.pallas_call(
        _autoencoder_kernel,
        grid=(pb // tile_m,),
        in_specs=in_specs,
        out_specs=out_specs,
        out_shape=out_shape,
        compiler_params=pltpu.CompilerParams(
            dimension_semantics=("parallel",),   # batch rows independent (v7x: 2 TCs)
        ),
        cost_estimate=pl.CostEstimate(
            flops=flops,
            transcendentals=pb * bot_pad,        # tanh
            bytes_accessed=bytes_accessed,
        ),
    )(*operands)

    return y_pad[:batch, :input_dim], l_pad[:batch, :bottle_dim]


# ------------------------- pure-JAX references -------------------------
def _ref_bf16(x, p, noise):
    """Same numerics as the kernel (bf16 weights/activations, f32 accumulation)."""
    def dot(a, w):
        return jnp.dot(a.astype(jnp.bfloat16), w.astype(jnp.bfloat16),
                       preferred_element_type=jnp.float32)
    h = jnp.maximum(dot(x, p["w1"]) + p["b1"], 0.0)
    h = jnp.maximum(dot(h, p["w2"]) + p["b2"], 0.0)
    l = jnp.tanh(dot(h, p["w3"]) + p["b3"]) + noise
    h = jnp.maximum(dot(l, p["w4"]) + p["b4"], 0.0)
    h = jnp.maximum(dot(h, p["w5"]) + p["b5"], 0.0)
    return dot(h, p["w6"]) + p["b6"], l


def _ref_f32(x, p, noise):
    h = jnp.maximum(x @ p["w1"] + p["b1"], 0.0)
    h = jnp.maximum(h @ p["w2"] + p["b2"], 0.0)
    l = jnp.tanh(h @ p["w3"] + p["b3"]) + noise
    h = jnp.maximum(l @ p["w4"] + p["b4"], 0.0)
    h = jnp.maximum(h @ p["w5"] + p["b5"], 0.0)
    return h @ p["w6"] + p["b6"], l


if __name__ == "__main__":
    key = jax.random.PRNGKey(0)
    input_dim = 32
    bottle_dim = 8

    k_params, k_x1, k_x2, k_n2 = jax.random.split(key, 4)
    params = init_params(k_params, input_dim, bottle_dim)
    prepared = prepare_params(params, input_dim, bottle_dim)

    # --- case 1: small batch, noise_var = 0 (PyTorch default) ---
    batch1 = 8
    noise_var1 = 0.0
    x1 = jax.random.normal(k_x1, (batch1, input_dim), jnp.float32)
    noise1 = jnp.zeros((1, bottle_dim), jnp.float32) * jnp.sqrt(jnp.float32(noise_var1))

    y1, l1 = neural_network5_forward(x1, prepared, noise1, tile_m=256)
    jax.block_until_ready((y1, l1))

    y1_bf, l1_bf = _ref_bf16(x1, params, noise1)
    y1_f32, l1_f32 = _ref_f32(x1, params, noise1)
    assert y1.shape == (batch1, input_dim) and l1.shape == (batch1, bottle_dim)
    assert jnp.allclose(y1, y1_bf, atol=2e-3, rtol=2e-3)
    assert jnp.allclose(l1, l1_bf, atol=2e-3, rtol=2e-3)
    assert jnp.allclose(y1, y1_f32, atol=1e-1, rtol=1e-1)   # bf16-weight vs f32 model
    assert jnp.allclose(l1, l1_f32, atol=5e-2, rtol=5e-2)

    # --- case 2: multi-tile grid (non-multiple batch) with nonzero noise ---
    batch2 = 600
    noise_var2 = 0.3
    x2 = jax.random.normal(k_x2, (batch2, input_dim), jnp.float32)
    noise2 = jnp.sqrt(jnp.float32(noise_var2)) * jax.random.normal(
        k_n2, (1, bottle_dim), jnp.float32)

    y2, l2 = neural_network5_forward(x2, prepared, noise2, tile_m=256)
    jax.block_until_ready((y2, l2))

    y2_bf, l2_bf = _ref_bf16(x2, params, noise2)
    assert y2.shape == (batch2, input_dim) and l2.shape == (batch2, bottle_dim)
    assert jnp.allclose(y2, y2_bf, atol=2e-3, rtol=2e-3)
    assert jnp.allclose(l2, l2_bf, atol=2e-3, rtol=2e-3)

    print("KERNEL_OK")
</pallas_src>

<mosaic_0001>
module attributes {stable_mosaic.version = 11 : i64} {
  func.func @_autoencoder_kernel(%arg0: i32, %arg1: memref<256x128xf32, #tpu.memory_space<vmem>>, %arg2: memref<128x512xbf16, #tpu.memory_space<vmem>>, %arg3: memref<1x512xf32, #tpu.memory_space<vmem>>, %arg4: memref<512x256xbf16, #tpu.memory_space<vmem>>, %arg5: memref<1x256xf32, #tpu.memory_space<vmem>>, %arg6: memref<256x128xbf16, #tpu.memory_space<vmem>>, %arg7: memref<1x128xf32, #tpu.memory_space<vmem>>, %arg8: memref<128x256xbf16, #tpu.memory_space<vmem>>, %arg9: memref<1x256xf32, #tpu.memory_space<vmem>>, %arg10: memref<256x512xbf16, #tpu.memory_space<vmem>>, %arg11: memref<1x512xf32, #tpu.memory_space<vmem>>, %arg12: memref<512x128xbf16, #tpu.memory_space<vmem>>, %arg13: memref<1x128xf32, #tpu.memory_space<vmem>>, %arg14: memref<1x128xf32, #tpu.memory_space<vmem>>, %arg15: memref<256x128xf32, #tpu.memory_space<vmem>>, %arg16: memref<256x128xf32, #tpu.memory_space<vmem>>) attributes {dimension_semantics = [#tpu.dimension_semantics<parallel>], iteration_bounds = array<i64: 1>, scalar_prefetch = 0 : i64, scratch_operands = 0 : i64, tpu.core_type = #tpu.core_type<tc>, window_params = [{transform_indices = @transform_0, window_bounds = array<i64: 256, 128>}, {pipeline_mode = #tpu.pipeline_mode<synchronous>, transform_indices = @transform_1, window_bounds = array<i64: 128, 512>}, {pipeline_mode = #tpu.pipeline_mode<synchronous>, transform_indices = @transform_2, window_bounds = array<i64: 1, 512>}, {pipeline_mode = #tpu.pipeline_mode<synchronous>, transform_indices = @transform_3, window_bounds = array<i64: 512, 256>}, {pipeline_mode = #tpu.pipeline_mode<synchronous>, transform_indices = @transform_4, window_bounds = array<i64: 1, 256>}, {pipeline_mode = #tpu.pipeline_mode<synchronous>, transform_indices = @transform_5, window_bounds = array<i64: 256, 128>}, {pipeline_mode = #tpu.pipeline_mode<synchronous>, transform_indices = @transform_6, window_bounds = array<i64: 1, 128>}, {pipeline_mode = #tpu.pipeline_mode<synchronous>, transform_indices = @transform_7, window_bounds = array<i64: 128, 256>}, {pipeline_mode = #tpu.pipeline_mode<synchronous>, transform_indices = @transform_8, window_bounds = array<i64: 1, 256>}, {pipeline_mode = #tpu.pipeline_mode<synchronous>, transform_indices = @transform_9, window_bounds = array<i64: 256, 512>}, {pipeline_mode = #tpu.pipeline_mode<synchronous>, transform_indices = @transform_10, window_bounds = array<i64: 1, 512>}, {pipeline_mode = #tpu.pipeline_mode<synchronous>, transform_indices = @transform_11, window_bounds = array<i64: 512, 128>}, {pipeline_mode = #tpu.pipeline_mode<synchronous>, transform_indices = @transform_12, window_bounds = array<i64: 1, 128>}, {pipeline_mode = #tpu.pipeline_mode<synchronous>, transform_indices = @transform_13, window_bounds = array<i64: 1, 128>}, {transform_indices = @transform_14, window_bounds = array<i64: 256, 128>}, {transform_indices = @transform_15, window_bounds = array<i64: 256, 128>}]} {
    %c0 = arith.constant 0 : index
    %c0_0 = arith.constant 0 : index
    %0 = vector.load %arg1[%c0, %c0_0] : memref<256x128xf32, #tpu.memory_space<vmem>>, vector<256x128xf32>
    %1 = arith.truncf %0 : vector<256x128xf32> to vector<256x128xbf16>
    %c0_1 = arith.constant 0 : index
    %c0_2 = arith.constant 0 : index
    %2 = vector.load %arg2[%c0_1, %c0_2] : memref<128x512xbf16, #tpu.memory_space<vmem>>, vector<128x512xbf16>
    %cst = arith.constant dense<0.000000e+00> : vector<256x512xf32>
    %3 = tpu.matmul %1, %2, %cst {dimension_numbers = #tpu.dot_dimension_numbers<[1], [0], [0], [1], [0, 0, 1, 1], [], []>} : vector<256x128xbf16>, vector<128x512xbf16>, vector<256x512xf32> -> vector<256x512xf32>
    %c0_3 = arith.constant 0 : index
    %c0_4 = arith.constant 0 : index
    %4 = vector.load %arg3[%c0_3, %c0_4] : memref<1x512xf32, #tpu.memory_space<vmem>>, vector<1x512xf32>
    %5 = vector.broadcast %4 : vector<1x512xf32> to vector<256x512xf32>
    %6 = arith.addf %3, %5 : vector<256x512xf32>
    %cst_5 = arith.constant 0.000000e+00 : f32
    %7 = vector.broadcast %cst_5 : f32 to vector<256x512xf32>
    %8 = arith.maximumf %6, %7 : vector<256x512xf32>
    %9 = arith.truncf %8 : vector<256x512xf32> to vector<256x512xbf16>
    %c0_6 = arith.constant 0 : index
    %c0_7 = arith.constant 0 : index
    %10 = vector.load %arg4[%c0_6, %c0_7] : memref<512x256xbf16, #tpu.memory_space<vmem>>, vector<512x256xbf16>
    %cst_8 = arith.constant dense<0.000000e+00> : vector<256x256xf32>
    %11 = tpu.matmul %9, %10, %cst_8 {dimension_numbers = #tpu.dot_dimension_numbers<[1], [0], [0], [1], [0, 0, 1, 1], [], []>} : vector<256x512xbf16>, vector<512x256xbf16>, vector<256x256xf32> -> vector<256x256xf32>
    %c0_9 = arith.constant 0 : index
    %c0_10 = arith.constant 0 : index
    %12 = vector.load %arg5[%c0_9, %c0_10] : memref<1x256xf32, #tpu.memory_space<vmem>>, vector<1x256xf32>
    %13 = vector.broadcast %12 : vector<1x256xf32> to vector<256x256xf32>
    %14 = arith.addf %11, %13 : vector<256x256xf32>
    %cst_11 = arith.constant 0.000000e+00 : f32
    %15 = vector.broadcast %cst_11 : f32 to vector<256x256xf32>
    %16 = arith.maximumf %14, %15 : vector<256x256xf32>
    %17 = arith.truncf %16 : vector<256x256xf32> to vector<256x256xbf16>
    %c0_12 = arith.constant 0 : index
    %c0_13 = arith.constant 0 : index
    %18 = vector.load %arg6[%c0_12, %c0_13] : memref<256x128xbf16, #tpu.memory_space<vmem>>, vector<256x128xbf16>
    %cst_14 = arith.constant dense<0.000000e+00> : vector<256x128xf32>
    %19 = tpu.matmul %17, %18, %cst_14 {dimension_numbers = #tpu.dot_dimension_numbers<[1], [0], [0], [1], [0, 0, 1, 1], [], []>} : vector<256x256xbf16>, vector<256x128xbf16>, vector<256x128xf32> -> vector<256x128xf32>
    %c0_15 = arith.constant 0 : index
    %c0_16 = arith.constant 0 : index
    %20 = vector.load %arg7[%c0_15, %c0_16] : memref<1x128xf32, #tpu.memory_space<vmem>>, vector<1x128xf32>
    %21 = vector.broadcast %20 : vector<1x128xf32> to vector<256x128xf32>
    %22 = arith.addf %19, %21 : vector<256x128xf32>
    %23 = math.tanh %22 : vector<256x128xf32>
    %c0_17 = arith.constant 0 : index
    %c0_18 = arith.constant 0 : index
    %24 = vector.load %arg14[%c0_17, %c0_18] : memref<1x128xf32, #tpu.memory_space<vmem>>, vector<1x128xf32>
    %25 = vector.broadcast %24 : vector<1x128xf32> to vector<256x128xf32>
    %26 = arith.addf %23, %25 : vector<256x128xf32>
    %c0_19 = arith.constant 0 : index
    %c0_20 = arith.constant 0 : index
    %27 = vector.load %arg16[%c0_19, %c0_20] : memref<256x128xf32, #tpu.memory_space<vmem>>, vector<256x128xf32>
    tpu.vector_store %arg16[%c0_19, %c0_20], %26 {strides = array<i32>} : memref<256x128xf32, #tpu.memory_space<vmem>>, vector<256x128xf32>,
    %28 = arith.truncf %26 : vector<256x128xf32> to vector<256x128xbf16>
    %c0_21 = arith.constant 0 : index
    %c0_22 = arith.constant 0 : index
    %29 = vector.load %arg8[%c0_21, %c0_22] : memref<128x256xbf16, #tpu.memory_space<vmem>>, vector<128x256xbf16>
    %cst_23 = arith.constant dense<0.000000e+00> : vector<256x256xf32>
    %30 = tpu.matmul %28, %29, %cst_23 {dimension_numbers = #tpu.dot_dimension_numbers<[1], [0], [0], [1], [0, 0, 1, 1], [], []>} : vector<256x128xbf16>, vector<128x256xbf16>, vector<256x256xf32> -> vector<256x256xf32>
    %c0_24 = arith.constant 0 : index
    %c0_25 = arith.constant 0 : index
    %31 = vector.load %arg9[%c0_24, %c0_25] : memref<1x256xf32, #tpu.memory_space<vmem>>, vector<1x256xf32>
    %32 = vector.broadcast %31 : vector<1x256xf32> to vector<256x256xf32>
    %33 = arith.addf %30, %32 : vector<256x256xf32>
    %cst_26 = arith.constant 0.000000e+00 : f32
    %34 = vector.broadcast %cst_26 : f32 to vector<256x256xf32>
    %35 = arith.maximumf %33, %34 : vector<256x256xf32>
    %36 = arith.truncf %35 : vector<256x256xf32> to vector<256x256xbf16>
    %c0_27 = arith.constant 0 : index
    %c0_28 = arith.constant 0 : index
    %37 = vector.load %arg10[%c0_27, %c0_28] : memref<256x512xbf16, #tpu.memory_space<vmem>>, vector<256x512xbf16>
    %cst_29 = arith.constant dense<0.000000e+00> : vector<256x512xf32>
    %38 = tpu.matmul %36, %37, %cst_29 {dimension_numbers = #tpu.dot_dimension_numbers<[1], [0], [0], [1], [0, 0, 1, 1], [], []>} : vector<256x256xbf16>, vector<256x512xbf16>, vector<256x512xf32> -> vector<256x512xf32>
    %c0_30 = arith.constant 0 : index
    %c0_31 = arith.constant 0 : index
    %39 = vector.load %arg11[%c0_30, %c0_31] : memref<1x512xf32, #tpu.memory_space<vmem>>, vector<1x512xf32>
    %40 = vector.broadcast %39 : vector<1x512xf32> to vector<256x512xf32>
    %41 = arith.addf %38, %40 : vector<256x512xf32>
    %cst_32 = arith.constant 0.000000e+00 : f32
    %42 = vector.broadcast %cst_32 : f32 to vector<256x512xf32>
    %43 = arith.maximumf %41, %42 : vector<256x512xf32>
    %44 = arith.truncf %43 : vector<256x512xf32> to vector<256x512xbf16>
    %c0_33 = arith.constant 0 : index
    %c0_34 = arith.constant 0 : index
    %45 = vector.load %arg12[%c0_33, %c0_34] : memref<512x128xbf16, #tpu.memory_space<vmem>>, vector<512x128xbf16>
    %cst_35 = arith.constant dense<0.000000e+00> : vector<256x128xf32>
    %46 = tpu.matmul %44, %45, %cst_35 {dimension_numbers = #tpu.dot_dimension_numbers<[1], [0], [0], [1], [0, 0, 1, 1], [], []>} : vector<256x512xbf16>, vector<512x128xbf16>, vector<256x128xf32> -> vector<256x128xf32>
    %c0_36 = arith.constant 0 : index
    %c0_37 = arith.constant 0 : index
    %47 = vector.load %arg13[%c0_36, %c0_37] : memref<1x128xf32, #tpu.memory_space<vmem>>, vector<1x128xf32>
    %48 = vector.broadcast %47 : vector<1x128xf32> to vector<256x128xf32>
    %49 = arith.addf %46, %48 : vector<256x128xf32>
    %c0_38 = arith.constant 0 : index
    %c0_39 = arith.constant 0 : index
    %50 = vector.load %arg15[%c0_38, %c0_39] : memref<256x128xf32, #tpu.memory_space<vmem>>, vector<256x128xf32>
    tpu.vector_store %arg15[%c0_38, %c0_39], %49 {strides = array<i32>} : memref<256x128xf32, #tpu.memory_space<vmem>>, vector<256x128xf32>,
    return
  }
  func.func @transform_0(%arg0: i32) -> (i32, i32) {
    %c0_i32 = arith.constant 0 : i32
    %c0_i32_0 = arith.constant 0 : i32
    return %arg0, %c0_i32 : i32, i32
  }
  func.func @transform_1(%arg0: i32) -> (i32, i32) {
    %c0_i32 = arith.constant 0 : i32
    %c0_i32_0 = arith.constant 0 : i32
    %c0_i32_1 = arith.constant 0 : i32
    return %c0_i32, %c0_i32_0 : i32, i32
  }
  func.func @transform_2(%arg0: i32) -> (i32, i32) {
    %c0_i32 = arith.constant 0 : i32
    %c0_i32_0 = arith.constant 0 : i32
    %c0_i32_1 = arith.constant 0 : i32
    return %c0_i32, %c0_i32_0 : i32, i32
  }
  func.func @transform_3(%arg0: i32) -> (i32, i32) {
    %c0_i32 = arith.constant 0 : i32
    %c0_i32_0 = arith.constant 0 : i32
    %c0_i32_1 = arith.constant 0 : i32
    return %c0_i32, %c0_i32_0 : i32, i32
  }
  func.func @transform_4(%arg0: i32) -> (i32, i32) {
    %c0_i32 = arith.constant 0 : i32
    %c0_i32_0 = arith.constant 0 : i32
    %c0_i32_1 = arith.constant 0 : i32
    return %c0_i32, %c0_i32_0 : i32, i32
  }
  func.func @transform_5(%arg0: i32) -> (i32, i32) {
    %c0_i32 = arith.constant 0 : i32
    %c0_i32_0 = arith.constant 0 : i32
    %c0_i32_1 = arith.constant 0 : i32
    return %c0_i32, %c0_i32_0 : i32, i32
  }
  func.func @transform_6(%arg0: i32) -> (i32, i32) {
    %c0_i32 = arith.constant 0 : i32
    %c0_i32_0 = arith.constant 0 : i32
    %c0_i32_1 = arith.constant 0 : i32
    return %c0_i32, %c0_i32_0 : i32, i32
  }
  func.func @transform_7(%arg0: i32) -> (i32, i32) {
    %c0_i32 = arith.constant 0 : i32
    %c0_i32_0 = arith.constant 0 : i32
    %c0_i32_1 = arith.constant 0 : i32
    return %c0_i32, %c0_i32_0 : i32, i32
  }
  func.func @transform_8(%arg0: i32) -> (i32, i32) {
    %c0_i32 = arith.constant 0 : i32
    %c0_i32_0 = arith.constant 0 : i32
    %c0_i32_1 = arith.constant 0 : i32
    return %c0_i32, %c0_i32_0 : i32, i32
  }
  func.func @transform_9(%arg0: i32) -> (i32, i32) {
    %c0_i32 = arith.constant 0 : i32
    %c0_i32_0 = arith.constant 0 : i32
    %c0_i32_1 = arith.constant 0 : i32
    return %c0_i32, %c0_i32_0 : i32, i32
  }
  func.func @transform_10(%arg0: i32) -> (i32, i32) {
    %c0_i32 = arith.constant 0 : i32
    %c0_i32_0 = arith.constant 0 : i32
    %c0_i32_1 = arith.constant 0 : i32
    return %c0_i32, %c0_i32_0 : i32, i32
  }
  func.func @transform_11(%arg0: i32) -> (i32, i32) {
    %c0_i32 = arith.constant 0 : i32
    %c0_i32_0 = arith.constant 0 : i32
    %c0_i32_1 = arith.constant 0 : i32
    return %c0_i32, %c0_i32_0 : i32, i32
  }
  func.func @transform_12(%arg0: i32) -> (i32, i32) {
    %c0_i32 = arith.constant 0 : i32
    %c0_i32_0 = arith.constant 0 : i32
    %c0_i32_1 = arith.constant 0 : i32
    return %c0_i32, %c0_i32_0 : i32, i32
  }
  func.func @transform_13(%arg0: i32) -> (i32, i32) {
    %c0_i32 = arith.constant 0 : i32
    %c0_i32_0 = arith.constant 0 : i32
    %c0_i32_1 = arith.constant 0 : i32
    return %c0_i32, %c0_i32_0 : i32, i32
  }
  func.func @transform_14(%arg0: i32) -> (i32, i32) {
    %c0_i32 = arith.constant 0 : i32
    %c0_i32_0 = arith.constant 0 : i32
    return %arg0, %c0_i32 : i32, i32
  }
  func.func @transform_15(%arg0: i32) -> (i32, i32) {
    %c0_i32 = arith.constant 0 : i32
    %c0_i32_0 = arith.constant 0 : i32
    return %arg0, %c0_i32 : i32, i32
  }
}

</mosaic_0001>

<bundles_post_ra>
// kernel: neural_network5_forward.1
= control target key start
LH: loop header
LB: loop body
LE: loop exit
PB: predicated region body
PF: predicated region fallthrough
CT: control target
= control target key end

     0   :  { %21 = vsyncpa [#allocation3], 0  ;;  %s6686_s0 = inlined_call_operand.vmem [shape: f32[256,128], index: 0, kind: input, shape index: {}]   ;;  %s6687_s1 = inlined_call_operand.vmem [shape: bf16[128,512], index: 1, kind: input, shape index: {}]   ;;  %s6688_s2 = inlined_call_operand.vmem [shape: f32[1,512], index: 2, kind: input, shape index: {}]   ;;  %s6689_s3 = inlined_call_operand.hbm [shape: bf16[512,256], index: 3, kind: input, shape index: {}]   ;;  %s6690_s4 = inlined_call_operand.vmem [shape: f32[1,256], index: 4, kind: input, shape index: {}]   ;;  %s6691_s5 = inlined_call_operand.hbm [shape: bf16[256,128], index: 5, kind: input, shape index: {}]   ;;  %s6692_s6 = inlined_call_operand.vmem [shape: f32[1,128], index: 6, kind: input, shape index: {}]   ;;  %s6693_s7 = inlined_call_operand.hbm [shape: bf16[128,256], index: 7, kind: input, shape index: {}]   ;;  %s6694_s8 = inlined_call_operand.vmem [shape: f32[1,256], index: 8, kind: input, shape index: {}]   ;;  %s6695_s9 = inlined_call_operand.hbm [shape: bf16[256,512], index: 9, kind: input, shape index: {}]   ;;  %s6696_s10 = inlined_call_operand.vmem [shape: f32[1,512], index: 10, kind: input, shape index: {}]   ;;  %s6697_s11 = inlined_call_operand.hbm [shape: bf16[512,128], index: 11, kind: input, shape index: {}]   ;;  %s6698_s12 = inlined_call_operand.vmem [shape: f32[1,128], index: 12, kind: input, shape index: {}]   ;;  %s6699_s13 = inlined_call_operand.vmem [shape: f32[1,128], index: 13, kind: input, shape index: {}]   ;;  %s6700_s14 = inlined_call_operand.vmem [shape: f32[256,128], index: 14, kind: output, shape index: {0}]   ;;  %s6701_s15 = inlined_call_operand.vmem [shape: f32[256,128], index: 15, kind: output, shape index: {1}]  }
   0x1   :  { %22 = vsyncpa [#allocation5], 0 }
   0x2   :  { %23 = vsyncpa [#allocation8], 0  ;;  %s5455_s18 = smov [#allocation4]   ;;  %s5339_s22 = scalar_lea.hbm %s6691_s5, 2048 }
   0x3   :  { %s49_s19 = sshll.u32 %s5455_s18, 4  ;;  %p5340_p0 = scmp.ne.s32.totalorder %s6691_s5, %s5339_s22  ;;  %s50_s19 = int_to_ptr.vmem [resolvable:$true] %s49_s19 }
   0x4   :  { %p5343_p1 = scmp.lt.u32.totalorder %s5339_s22, %s6691_s5 }
   0x6   :  { %p5345_p2 = pnand %p5343_p1, %p5340_p0 }
   0x8   :  { %5348 = shalt.err (!%p5345_p2)
}
   0x9   :  { %s5349_s27 = scalar_lea.vmem %s50_s19, 2048  ;;  %p5354_p4 = scmp.lt.s32.totalorder %s50_s19, %s50_s19 }
   0xa   :  { %p5350_p3 = scmp.ne.s32.totalorder %s50_s19, %s5349_s27  ;;  %p5355_p5 = scmp.lt.s32.totalorder %s5349_s27, %s5349_s27 }
   0xc   :  { %p5356_p6 = por %p5355_p5, %p5354_p4 }
   0xe   :  { %p5357_p7 = pnand %p5356_p6, %p5350_p3 }
  0x10   :  { %5360 = shalt.err (!%p5357_p7)
}
  0x11   :  { %s6702_s28 = smov 64   ;;  %s5457_s29 = smov 4  }
  0x12   :  { %55 = dma.hbm_to_vmem [thread:$0]  %s6691_s5, 2048, %s50_s19, [#allocation5], %s6702_s28, %s6702_s28, %s5457_s29  }
  0x13   :  { %s5458_s17 = smov [#allocation7]   ;;  %s5361_s22 = scalar_lea.hbm %s6695_s9, 8192 }
  0x14   :  { %s77_s18 = sshll.u32 %s5458_s17, 4  ;;  %p5362_p8 = scmp.ne.s32.totalorder %s6695_s9, %s5361_s22  ;;  %s78_s18 = int_to_ptr.vmem [resolvable:$true] %s77_s18 }
  0x15   :  { %p5365_p9 = scmp.lt.u32.totalorder %s5361_s22, %s6695_s9 }
  0x17   :  { %p5367_p10 = pnand %p5365_p9, %p5362_p8 }
  0x19   :  { %5370 = shalt.err (!%p5367_p10)
}
  0x1a   :  { %s5371_s27 = scalar_lea.vmem %s78_s18, 8192  ;;  %p5376_p12 = scmp.lt.s32.totalorder %s78_s18, %s78_s18 }
  0x1b   :  { %p5372_p11 = scmp.ne.s32.totalorder %s78_s18, %s5371_s27  ;;  %p5377_p13 = scmp.lt.s32.totalorder %s5371_s27, %s5371_s27 }
  0x1d   :  { %p5378_p0 = por %p5377_p13, %p5376_p12 }
  0x1f   :  { %p5379_p1 = pnand %p5378_p0, %p5372_p11 }
  0x21   :  { %5382 = shalt.err (!%p5379_p1)
}
  0x22   :  { %s5459_s5 = smov 256   ;;  %s5460_s19 = smov 16  }
  0x23   :  { %83 = dma.hbm_to_vmem [thread:$0]  %s6695_s9, 8192, %s78_s18, [#allocation8], %s5459_s5, %s5459_s5, %s5460_s19  }
  0x24   :  { %s5461_s17 = smov [#allocation2]   ;;  %s5383_s23 = scalar_lea.hbm %s6689_s3, 8192 }
  0x25   :  { %s35_s20 = sshll.u32 %s5461_s17, 4  ;;  %p5384_p2 = scmp.ne.s32.totalorder %s6689_s3, %s5383_s23  ;;  %s36_s20 = int_to_ptr.vmem [resolvable:$true] %s35_s20 }
  0x26   :  { %p5387_p3 = scmp.lt.u32.totalorder %s5383_s23, %s6689_s3 }
  0x28   :  { %p5389_p4 = pnand %p5387_p3, %p5384_p2 }
  0x2a   :  { %5392 = shalt.err (!%p5389_p4)
}
  0x2b   :  { %s5393_s28 = scalar_lea.vmem %s36_s20, 8192  ;;  %p5398_p6 = scmp.lt.s32.totalorder %s36_s20, %s36_s20 }
  0x2c   :  { %p5394_p5 = scmp.ne.s32.totalorder %s36_s20, %s5393_s28  ;;  %p5399_p7 = scmp.lt.s32.totalorder %s5393_s28, %s5393_s28 }
  0x2e   :  { %p5400_p8 = por %p5399_p7, %p5398_p6 }
  0x30   :  { %p5401_p9 = pnand %p5400_p8, %p5394_p5 }
  0x32   :  { %5404 = shalt.err (!%p5401_p9)
}
  0x33   :  { %s5462_s9 = smov 128   ;;  %s5463_s18 = smov 8  }
  0x34   :  { %41 = dma.hbm_to_vmem [thread:$0]  %s6689_s3, 8192, %s36_s20, [#allocation3], %s5462_s9, %s5462_s9, %s5463_s18  }
  0x35   :  { %s5464_s30 = smov [#allocation6]   ;;  %s5465_s17 = smov [#allocation9]  }
  0x36   :  { %s63_s16 = sshll.u32 %s5464_s30, 4  ;;  %s91_s21 = sshll.u32 %s5465_s17, 4  ;;  %s64_s16 = int_to_ptr.vmem [resolvable:$true] %s63_s16  ;;  %s92_s21 = int_to_ptr.vmem [resolvable:$true] %s91_s21 }
  0x37   :  { %s5405_s24 = scalar_lea.hbm %s6693_s7, 2048 }
  0x38   :  { %p5406_p10 = scmp.ne.s32.totalorder %s6693_s7, %s5405_s24  ;;  %p5409_p11 = scmp.lt.u32.totalorder %s5405_s24, %s6693_s7 }
  0x3a   :  { %p5411_p12 = pnand %p5409_p11, %p5406_p10 }
  0x3c   :  { %5414 = shalt.err (!%p5411_p12)
}
  0x3d   :  { %s5415_s3 = scalar_lea.vmem %s64_s16, 2048  ;;  %p5420_p0 = scmp.lt.s32.totalorder %s64_s16, %s64_s16 }
  0x3e   :  { %p5416_p13 = scmp.ne.s32.totalorder %s64_s16, %s5415_s3  ;;  %p5421_p1 = scmp.lt.s32.totalorder %s5415_s3, %s5415_s3 }
  0x40   :  { %p5422_p2 = por %p5421_p1, %p5420_p0 }
  0x42   :  { %p5423_p3 = pnand %p5422_p2, %p5416_p13 }
  0x44   :  { %5426 = shalt.err (!%p5423_p3)
}
  0x45   :  { %69 = dma.hbm_to_vmem [thread:$0]  %s6693_s7, 2048, %s64_s16, [#allocation5], %s5462_s9, %s5462_s9, %s5463_s18  }
  0x46   :  { %s5427_s17 = scalar_lea.hbm %s6697_s11, 4096 }
  0x47   :  { %p5428_p4 = scmp.ne.s32.totalorder %s6697_s11, %s5427_s17  ;;  %p5431_p5 = scmp.lt.u32.totalorder %s5427_s17, %s6697_s11 }
  0x49   :  { %p5433_p6 = pnand %p5431_p5, %p5428_p4 }
  0x4b   :  { %5436 = shalt.err (!%p5433_p6)
}
  0x4c   :  { %s5437_s28 = scalar_lea.vmem %s92_s21, 4096  ;;  %p5442_p8 = scmp.lt.s32.totalorder %s92_s21, %s92_s21 }
  0x4d   :  { %p5438_p7 = scmp.ne.s32.totalorder %s92_s21, %s5437_s28  ;;  %p5443_p9 = scmp.lt.s32.totalorder %s5437_s28, %s5437_s28 }
  0x4f   :  { %p5444_p10 = por %p5443_p9, %p5442_p8 }
  0x51   :  { %p5445_p11 = pnand %p5444_p10, %p5438_p7 }
  0x53   :  { %5448 = shalt.err (!%p5445_p11)
}
  0x54   :  { %s6703_s7 = smov 64  }
  0x55   :  { %97 = dma.hbm_to_vmem [thread:$0]  %s6697_s11, 4096, %s92_s21, [#allocation8], %s6703_s7, %s6703_s7, %s5457_s29  }
  0x56   :  { %5449 = dma.done.wait [#allocation3], 8192  }
  0x57   :  { %5450 = vsyncadd [#allocation3], 4294959104 }
  0x58   :  { %5451 = dma.done.wait [#allocation5], 4096  }
  0x59   :  { %5452 = vsyncadd [#allocation5], 4294963200 }
  0x5a   :  { %5453 = dma.done.wait [#allocation8], 12288  }
  0x5b   :  { %5454 = vsyncadd [#allocation8], 4294955008  ;;  %v5466_v0 = vmov 0   ;;  %v4963_v1 = vld [vmem:[%s6687_s1 + $0x4] ss:$16 sps:$4 sm:$0xff]   ;;  %v119_v23 = vld [vmem:[%s6686_s0 + $0x8] sm:$0xff] }
  0x5c   :  { %412 = vmatprep.mubr.bf16.mxu0 %v5466_v0  ;;  %605 = vmatprep.mubr.bf16.mxu1 %v5466_v0  ;;  %v4965_v2 = vld [vmem:[%s6687_s1] ss:$16 sps:$4 sm:$0xff]   ;;  %v4966_v3 = vld [vmem:[%s6687_s1 + $0x24] ss:$16 sps:$4 sm:$0xff]   ;;  %v4987_v13 = vld [vmem:[%s6687_s1 + $0xc] ss:$16 sps:$4 sm:$0xff]  }
  0x5d   :  { %380 = vmatprep.subr.bf16.mxu0 %v4963_v1  ;;  %v4968_v4 = vld [vmem:[%s6687_s1 + $0x20] ss:$16 sps:$4 sm:$0xff]   ;;  %v4969_v5 = vld [vmem:[%s6687_s1 + $0x44] ss:$16 sps:$4 sm:$0xff]   ;;  %573 = vmatprep.subr.bf16.mxu1 %v4987_v13  ;;  %v4992_v16 = vld [vmem:[%s6687_s1 + $0x8] ss:$16 sps:$4 sm:$0xff]  }
  0x5e   :  { %381 = vmatpush1.bf16.msra.mxu0 %v4965_v2  ;;  %v4971_v6 = vld [vmem:[%s6687_s1 + $0x40] ss:$16 sps:$4 sm:$0xff]   ;;  %v4972_v7 = vld [vmem:[%s6687_s1 + $0x64] ss:$16 sps:$4 sm:$0xff]   ;;  %v4993_v18 = vld [vmem:[%s6687_s1 + $0x2c] ss:$16 sps:$4 sm:$0xff]   ;;  %574 = vmatpush1.bf16.msra.mxu1 %v4992_v16 }
  0x5f   :  { %382 = vmatprep.subr.bf16.mxu0 %v4966_v3  ;;  %v4974_v8 = vld [vmem:[%s6687_s1 + $0x60] ss:$16 sps:$4 sm:$0xff]   ;;  %v4975_v9 = vld [vmem:[%s6687_s1 + $0x84] ss:$16 sps:$4 sm:$0xff]   ;;  %v4995_v19 = vld [vmem:[%s6687_s1 + $0x28] ss:$16 sps:$4 sm:$0xff]   ;;  %575 = vmatprep.subr.bf16.mxu1 %v4993_v18 }
  0x60   :  { %v4977_v10 = vld [vmem:[%s6687_s1 + $0x80] ss:$16 sps:$4 sm:$0xff]   ;;  %v4978_v11 = vld [vmem:[%s6687_s1 + $0xa4] ss:$16 sps:$4 sm:$0xff]   ;;  %v4996_v20 = vld [vmem:[%s6687_s1 + $0x4c] ss:$16 sps:$4 sm:$0xff]  }
  0x61   :  { %v4980_v12 = vld [vmem:[%s6687_s1 + $0xa0] ss:$16 sps:$4 sm:$0xff]   ;;  %v4981_v14 = vld [vmem:[%s6687_s1 + $0xc4] ss:$16 sps:$4 sm:$0xff]   ;;  %v5001_v25 = vld [vmem:[%s6687_s1 + $0x48] ss:$16 sps:$4 sm:$0xff]  }
  0x62   :  { %383 = vmatpush1.bf16.msra.mxu0 %v4968_v4  ;;  %v4983_v15 = vld [vmem:[%s6687_s1 + $0xc0] ss:$16 sps:$4 sm:$0xff]   ;;  %v4984_v17 = vld [vmem:[%s6687_s1 + $0xe4] ss:$16 sps:$4 sm:$0xff]   ;;  %576 = vmatpush1.bf16.msra.mxu1 %v4995_v19  ;;  %v5002_v26 = vld [vmem:[%s6687_s1 + $0x6c] ss:$16 sps:$4 sm:$0xff]  }
  0x63   :  { %384 = vmatprep.subr.bf16.mxu0 %v4969_v5  ;;  %v4986_v21 = vld [vmem:[%s6687_s1 + $0xe0] ss:$16 sps:$4 sm:$0xff]   ;;  %v4991_v24 = vld [vmem:[#allocation2 + $0x4] ss:$8 sps:$4 sm:$0xff]   ;;  %577 = vmatprep.subr.bf16.mxu1 %v4996_v20  ;;  %v5000_v29 = vld [vmem:[#allocation2 + $0x14] ss:$8 sps:$4 sm:$0xff]  }
  0x64   :  { %v118_v22 = vld [vmem:[%s6686_s0] sm:$0xff]  ;;  %v5004_v30 = vld [vmem:[%s6687_s1 + $0x68] ss:$16 sps:$4 sm:$0xff]   ;;  %v5005_v31 = vld [vmem:[%s6687_s1 + $0x8c] ss:$16 sps:$4 sm:$0xff]  }
  0x65   :  { %v150_v27 = vpack.c.bf16 %v119_v23, %v118_v22  ;;  %v4989_v28 = vld [vmem:[#allocation2] ss:$8 sps:$4 sm:$0xff]   ;;  %v120_v32 = vld [vmem:[%s6686_s0 + $0x10] sm:$0xff]  ;;  %v121_v33 = vld [vmem:[%s6686_s0 + $0x18] sm:$0xff] }
  0x66   :  { %385 = vmatpush1.bf16.msra.mxu0 %v4971_v6  ;;  %578 = vmatpush1.bf16.msra.mxu1 %v5001_v25  ;;  %v4998_v34 = vld [vmem:[#allocation2 + $0x10] ss:$8 sps:$4 sm:$0xff]   ;;  %v5009_v35 = vld [vmem:[#allocation2 + $0x24] ss:$8 sps:$4 sm:$0xff]   ;;  %v151_v38 = vpack.c.bf16 %v121_v33, %v120_v32  ;;  %v5007_v39 = vld [vmem:[#allocation2 + $0x20] ss:$8 sps:$4 sm:$0xff]  }
  0x67   :  { %386 = vmatprep.subr.bf16.mxu0 %v4972_v7  ;;  %579 = vmatprep.subr.bf16.mxu1 %v5002_v26  ;;  %v5010_v36 = vld [vmem:[%s6687_s1 + $0x88] ss:$16 sps:$4 sm:$0xff]   ;;  %v5011_v37 = vld [vmem:[%s6687_s1 + $0xac] ss:$16 sps:$4 sm:$0xff]   ;;  %v122_v43 = vld [vmem:[%s6686_s0 + $0x20] sm:$0xff] }
  0x68   :  { %v5013_v40 = vld [vmem:[%s6687_s1 + $0xa8] ss:$16 sps:$4 sm:$0xff]   ;;  %v5018_v41 = vld [vmem:[#allocation2 + $0x34] ss:$8 sps:$4 sm:$0xff]   ;;  %v5025_v47 = vld [vmem:[#allocation2 + $0x44] ss:$8 sps:$4 sm:$0xff]  }
  0x69   :  { %v5014_v42 = vld [vmem:[%s6687_s1 + $0xcc] ss:$16 sps:$4 sm:$0xff]   ;;  %v5016_v45 = vld [vmem:[#allocation2 + $0x30] ss:$8 sps:$4 sm:$0xff]   ;;  %v5023_v51 = vld [vmem:[#allocation2 + $0x40] ss:$8 sps:$4 sm:$0xff]  }
  0x6a   :  { %387 = vmatpush1.bf16.msra.mxu0 %v4974_v8  ;;  %580 = vmatpush1.bf16.msra.mxu1 %v5004_v30  ;;  %v123_v44 = vld [vmem:[%s6686_s0 + $0x28] sm:$0xff]  ;;  %v5028_v52 = vld [vmem:[#allocation2 + $0x54] ss:$8 sps:$4 sm:$0xff]   ;;  %v5026_v55 = vld [vmem:[#allocation2 + $0x50] ss:$8 sps:$4 sm:$0xff]  }
  0x6b   :  { %388 = vmatprep.subr.bf16.mxu0 %v4975_v9  ;;  %581 = vmatprep.subr.bf16.mxu1 %v5005_v31  ;;  %v5019_v46 = vld [vmem:[%s6687_s1 + $0xc8] ss:$16 sps:$4 sm:$0xff]   ;;  %v5020_v48 = vld [vmem:[%s6687_s1 + $0xec] ss:$16 sps:$4 sm:$0xff]   ;;  %v152_v49 = vpack.c.bf16 %v123_v44, %v122_v43  ;;  %v124_v53 = vld [vmem:[%s6686_s0 + $0x30] sm:$0xff] }
  0x6c   :  { %v5022_v50 = vld [vmem:[%s6687_s1 + $0xe8] ss:$16 sps:$4 sm:$0xff]   ;;  %v5031_v56 = vld [vmem:[#allocation2 + $0x64] ss:$8 sps:$4 sm:$0xff]   ;;  %v5034_v59 = vld [vmem:[#allocation2 + $0x74] ss:$8 sps:$4 sm:$0xff]  }
  0x6d   :  { %v125_v54 = vld [vmem:[%s6686_s0 + $0x38] sm:$0xff]  ;;  %v5029_v57 = vld [vmem:[#allocation2 + $0x60] ss:$8 sps:$4 sm:$0xff]   ;;  %v5037_v63 = vld [vmem:[#allocation2 + $0x84] ss:$8 sps:$4 sm:$0xff]  }
  0x6e   :  { %389 = vmatpush1.bf16.msra.mxu0 %v4977_v10  ;;  %582 = vmatpush1.bf16.msra.mxu1 %v5010_v36  ;;  %v153_v58 = vpack.c.bf16 %v125_v54, %v124_v53  ;;  %v126_v60 = vld [vmem:[%s6686_s0 + $0x40] sm:$0xff]  ;;  %v127_v61 = vld [vmem:[%s6686_s0 + $0x48] sm:$0xff]  ;;  %v5032_v62 = vld [vmem:[#allocation2 + $0x70] ss:$8 sps:$4 sm:$0xff]  }
  0x6f   :  { %390 = vmatprep.subr.bf16.mxu0 %v4978_v11  ;;  %583 = vmatprep.subr.bf16.mxu1 %v5011_v37  ;;  %v5035_v1 = vld [vmem:[#allocation2 + $0x80] ss:$8 sps:$4 sm:$0xff]   ;;  %v154_v2 = vpack.c.bf16 %v127_v61, %v126_v60  ;;  %v5040_v3 = vld [vmem:[#allocation2 + $0x94] ss:$8 sps:$4 sm:$0xff]   ;;  %v5038_v6 = vld [vmem:[#allocation2 + $0x90] ss:$8 sps:$4 sm:$0xff]  }
  0x70   :  { %v128_v4 = vld [vmem:[%s6686_s0 + $0x50] sm:$0xff]  ;;  %v129_v5 = vld [vmem:[%s6686_s0 + $0x58] sm:$0xff]  ;;  %v5043_v7 = vld [vmem:[#allocation2 + $0xa4] ss:$8 sps:$4 sm:$0xff]  }
  0x71   :  { %v5041_v8 = vld [vmem:[#allocation2 + $0xa0] ss:$8 sps:$4 sm:$0xff]   ;;  %v155_v9 = vpack.c.bf16 %v129_v5, %v128_v4  ;;  %v5046_v10 = vld [vmem:[#allocation2 + $0xb4] ss:$8 sps:$4 sm:$0xff]   ;;  %v5044_v13 = vld [vmem:[#allocation2 + $0xb0] ss:$8 sps:$4 sm:$0xff]  }
  0x72   :  { %391 = vmatpush1.bf16.msra.mxu0 %v4980_v12  ;;  %584 = vmatpush1.bf16.msra.mxu1 %v5013_v40  ;;  %v130_v11 = vld [vmem:[%s6686_s0 + $0x60] sm:$0xff]  ;;  %v131_v12 = vld [vmem:[%s6686_s0 + $0x68] sm:$0xff]  ;;  %v132_v18 = vld [vmem:[%s6686_s0 + $0x70] sm:$0xff] }
  0x73   :  { %392 = vmatprep.subr.bf16.mxu0 %v4981_v14  ;;  %585 = vmatprep.subr.bf16.mxu1 %v5014_v42  ;;  %v5049_v14 = vld [vmem:[#allocation2 + $0xc4] ss:$8 sps:$4 sm:$0xff]   ;;  %v156_v16 = vpack.c.bf16 %v131_v12, %v130_v11  ;;  %v133_v19 = vld [vmem:[%s6686_s0 + $0x78] sm:$0xff]  ;;  %v5053_v22 = vld [vmem:[#allocation2 + $0xe0] ss:$8 sps:$4 sm:$0xff]  }
  0x74   :  { %v5050_v20 = vld [vmem:[#allocation2 + $0xd0] ss:$8 sps:$4 sm:$0xff]   ;;  %v157_v23 = vpack.c.bf16 %v133_v19, %v132_v18  ;;  %v135_v25 = vld [vmem:[%s6686_s0 + $0x88] sm:$0xff]  ;;  %v138_v30 = vld [vmem:[%s6686_s0 + $0xa0] sm:$0xff] }
  0x75   :  { %v139_v31 = vld [vmem:[%s6686_s0 + $0xa8] sm:$0xff]  ;;  %v140_v33 = vld [vmem:[%s6686_s0 + $0xb0] sm:$0xff]  ;;  %v142_v37 = vld [vmem:[%s6686_s0 + $0xc0] sm:$0xff] }
  0x76   :  { %393 = vmatpush1.bf16.msra.mxu0 %v4983_v15  ;;  %586 = vmatpush1.bf16.msra.mxu1 %v5019_v46  ;;  %v5047_v15 = vld [vmem:[#allocation2 + $0xc0] ss:$8 sps:$4 sm:$0xff]   ;;  %v160_v32 = vpack.c.bf16 %v139_v31, %v138_v30  ;;  %v5058_v36 = vld [vmem:[#allocation2 + $0xf4] ss:$8 sps:$4 sm:$0xff]   ;;  %v5061_v43 = vld [vmem:[#allocation2 + $0x104] ss:$8 sps:$4 sm:$0xff]  }
  0x77   :  { %394 = vmatprep.subr.bf16.mxu0 %v4984_v17  ;;  %587 = vmatprep.subr.bf16.mxu1 %v5020_v48  ;;  %v5052_v17 = vld [vmem:[#allocation2 + $0xd4] ss:$8 sps:$4 sm:$0xff]   ;;  %v147_v46 = vld [vmem:[%s6686_s0 + $0xe8] sm:$0xff]  ;;  %v198_v54 = vld [vmem:[%s6688_s2] sm:$0xf] }
  0x78   :  { %v145_v42 = vld [vmem:[%s6686_s0 + $0xd8] sm:$0xff]  ;;  %v148_v48 = vld [vmem:[%s6686_s0 + $0xf0] sm:$0xff]  ;;  %v5065_v30 = vld [vmem:[#allocation2 + $0x120] ss:$8 sps:$4 sm:$0xff]  }
  0x79   :  { %v5062_v19 = vld [vmem:[#allocation2 + $0x110] ss:$8 sps:$4 sm:$0xff]  }
  0x7a   :  { %395 = vmatpush1.bf16.msra.mxu0 %v4986_v21  ;;  %588 = vmatpush1.bf16.msra.mxu1 %v5022_v50  ;;  %v5055_v21 = vld [vmem:[#allocation2 + $0xe4] ss:$8 sps:$4 sm:$0xff]  }
  0x7b   :  { %1354 = vmatprep.subr.bf16.mxu0 %v4991_v24  ;;  %v134_v24 = vld [vmem:[%s6686_s0 + $0x80] sm:$0xff] }
  0x7c   :  { %v158_v26 = vpack.c.bf16 %v135_v25, %v134_v24 }
  0x7d   :  { %413 = vmatmul.mubr.bf16.vlgmr.msra.gmra.mrb[0].mxu0 %v150_v27  ;;  %606 = vmatmul.mubr.bf16.vlgmr.msra.gmra.mrb[0].mxu1 %v150_v27  ;;  %v136_v27 = vld [vmem:[%s6686_s0 + $0x90] sm:$0xff] }
  0x7e   :  { %422 = vmatprep.mubr.bf16.mxu0 %v5466_v0  ;;  %1355 = vmatpush1.bf16.msra.mxu0 %v4989_v28  ;;  %v137_v28 = vld [vmem:[%s6686_s0 + $0x98] sm:$0xff] }
  0x7f   :  { %1356 = vmatprep.subr.bf16.mxu0 %v5000_v29  ;;  %615 = vmatprep.mubr.bf16.mxu1 %v5466_v0  ;;  %v159_v29 = vpack.c.bf16 %v137_v28, %v136_v27 }
  0x82   :  { %1357 = vmatpush1.bf16.msra.mxu0 %v4998_v34  ;;  %v141_v34 = vld [vmem:[%s6686_s0 + $0xb8] sm:$0xff] }
  0x83   :  { %1358 = vmatprep.subr.bf16.mxu0 %v5009_v35  ;;  %v161_v35 = vpack.c.bf16 %v141_v34, %v140_v33  ;;  %v5070_v33 = vld [vmem:[#allocation2 + $0x134] ss:$8 sps:$4 sm:$0xff]  }
  0x85   :  { %423 = vmatmul.mubr.bf16.gmra.mrb[4].mxu0 %v151_v38  ;;  %616 = vmatmul.mubr.bf16.gmra.mrb[4].mxu1 %v151_v38  ;;  %v143_v38 = vld [vmem:[%s6686_s0 + $0xc8] sm:$0xff] }
  0x86   :  { %432 = vmatprep.mubr.bf16.mxu0 %v5466_v0  ;;  %1359 = vmatpush1.bf16.msra.mxu0 %v5007_v39  ;;  %v5056_v39 = vld [vmem:[#allocation2 + $0xf0] ss:$8 sps:$4 sm:$0xff]   ;;  %v162_v40 = vpack.c.bf16 %v143_v38, %v142_v37 }
  0x87   :  { %1360 = vmatprep.subr.bf16.mxu0 %v5018_v41  ;;  %625 = vmatprep.mubr.bf16.mxu1 %v5466_v0  ;;  %v144_v41 = vld [vmem:[%s6686_s0 + $0xd0] sm:$0xff] }
  0x88   :  { %v163_v44 = vpack.c.bf16 %v145_v42, %v144_v41  ;;  %v5068_v41 = vld [vmem:[#allocation2 + $0x130] ss:$8 sps:$4 sm:$0xff]  }
  0x8a   :  { %1361 = vmatpush1.bf16.msra.mxu0 %v5016_v45  ;;  %v146_v45 = vld [vmem:[%s6686_s0 + $0xe0] sm:$0xff] }
  0x8b   :  { %1362 = vmatprep.subr.bf16.mxu0 %v5025_v47  ;;  %v164_v47 = vpack.c.bf16 %v147_v46, %v146_v45 }
  0x8d   :  { %433 = vmatmul.mubr.bf16.gmra.mrb[8].mxu0 %v152_v49  ;;  %626 = vmatmul.mubr.bf16.gmra.mrb[8].mxu1 %v152_v49  ;;  %v149_v49 = vld [vmem:[%s6686_s0 + $0xf8] sm:$0xff] }
  0x8e   :  { %442 = vmatprep.mubr.bf16.mxu0 %v5466_v0  ;;  %1363 = vmatpush1.bf16.msra.mxu0 %v5023_v51  ;;  %v165_v50 = vpack.c.bf16 %v149_v49, %v148_v48  ;;  %v200_v51 = vlaneseq }
  0x8f   :  { %1364 = vmatprep.subr.bf16.mxu0 %v5028_v52  ;;  %635 = vmatprep.mubr.bf16.mxu1 %v5466_v0 }
  0x90   :  { %v5837_v52 = vshrl.u32 %v200_v51, 7 }
  0x92   :  { %1365 = vmatpush1.bf16.msra.mxu0 %v5026_v55  ;;  %v5840_v53 = vsub.s32 0, %v5837_v52  ;;  %v5846_v55 = vsub.s32 1, %v5837_v52  ;;  %v210_v25 = vsub.s32 2, %v5837_v52  ;;  %v214_v27 = vsub.s32 3, %v5837_v52 }
  0x93   :  { %1366 = vmatprep.subr.bf16.mxu0 %v5031_v56 }
  0x94   :  { %v5849_v56 = vrot.slane %v198_v54, %v5840_v53 }
  0x95   :  { %443 = vmatmul.mubr.bf16.gmra.mrb[12].mxu0 %v153_v58  ;;  %636 = vmatmul.mubr.bf16.gmra.mrb[12].mxu1 %v153_v58 }
  0x96   :  { %452 = vmatprep.mubr.bf16.mxu0 %v5466_v0  ;;  %1367 = vmatpush1.bf16.msra.mxu0 %v5029_v57  ;;  %v5852_v57 = vrot.slane %v198_v54, %v5846_v55 }
  0x97   :  { %1368 = vmatprep.subr.bf16.mxu0 %v5034_v59  ;;  %645 = vmatprep.mubr.bf16.mxu1 %v5466_v0 }
  0x9a   :  { %1369 = vmatpush1.bf16.msra.mxu0 %v5032_v62 }
  0x9b   :  { %1370 = vmatprep.subr.bf16.mxu0 %v5037_v63 }
  0x9d   :  { %453 = vmatmul.mubr.bf16.gmra.mrb[16].mxu0 %v154_v2  ;;  %646 = vmatmul.mubr.bf16.gmra.mrb[16].mxu1 %v154_v2 }
  0x9e   :  { %462 = vmatprep.mubr.bf16.mxu0 %v5466_v0  ;;  %1371 = vmatpush1.bf16.msra.mxu0 %v5035_v1 }
  0x9f   :  { %1372 = vmatprep.subr.bf16.mxu0 %v5040_v3  ;;  %655 = vmatprep.mubr.bf16.mxu1 %v5466_v0 }
  0xa2   :  { %1373 = vmatpush1.bf16.msra.mxu0 %v5038_v6 }
  0xa3   :  { %1374 = vmatprep.subr.bf16.mxu0 %v5043_v7 }
  0xa5   :  { %463 = vmatmul.mubr.bf16.gmra.mrb[20].mxu0 %v155_v9  ;;  %656 = vmatmul.mubr.bf16.gmra.mrb[20].mxu1 %v155_v9 }
  0xa6   :  { %472 = vmatprep.mubr.bf16.mxu0 %v5466_v0  ;;  %1375 = vmatpush1.bf16.msra.mxu0 %v5041_v8 }
  0xa7   :  { %1376 = vmatprep.subr.bf16.mxu0 %v5046_v10  ;;  %665 = vmatprep.mubr.bf16.mxu1 %v5466_v0  ;;  %v5059_v10 = vld [vmem:[#allocation2 + $0x100] ss:$8 sps:$4 sm:$0xff]  }
  0xaa   :  { %1377 = vmatpush1.bf16.msra.mxu0 %v5044_v13  ;;  %v5064_v13 = vld [vmem:[#allocation2 + $0x114] ss:$8 sps:$4 sm:$0xff]  }
  0xab   :  { %1378 = vmatprep.subr.bf16.mxu0 %v5049_v14 }
  0xad   :  { %473 = vmatmul.mubr.bf16.gmra.mrb[24].mxu0 %v156_v16  ;;  %666 = vmatmul.mubr.bf16.gmra.mrb[24].mxu1 %v156_v16 }
  0xae   :  { %482 = vmatprep.mubr.bf16.mxu0 %v5466_v0  ;;  %1379 = vmatpush1.bf16.msra.mxu0 %v5047_v15 }
  0xaf   :  { %1380 = vmatprep.subr.bf16.mxu0 %v5052_v17  ;;  %675 = vmatprep.mubr.bf16.mxu1 %v5466_v0 }
  0xb2   :  { %1381 = vmatpush1.bf16.msra.mxu0 %v5050_v20 }
  0xb3   :  { %1382 = vmatprep.subr.bf16.mxu0 %v5055_v21 }
  0xb5   :  { %483 = vmatmul.mubr.bf16.gmra.mrb[28].mxu0 %v157_v23  ;;  %676 = vmatmul.mubr.bf16.gmra.mrb[28].mxu1 %v157_v23 }
  0xb6   :  { %492 = vmatprep.mubr.bf16.mxu0 %v5466_v0  ;;  %1383 = vmatpush1.bf16.msra.mxu0 %v5053_v22  ;;  %v5067_v22 = vld [vmem:[#allocation2 + $0x124] ss:$8 sps:$4 sm:$0xff]  }
  0xb7   :  { %685 = vmatprep.mubr.bf16.mxu1 %v5466_v0  ;;  %1384 = vmatprep.subr.bf16.mxu0 %v5058_v36  ;;  %v5868_v36 = vrot.slane %v198_v54, %v210_v25 }
  0xba   :  { %1385 = vmatpush1.bf16.msra.mxu0 %v5056_v39  ;;  %v5873_v39 = vrot.slane %v198_v54, %v214_v27 }
  0xbb   :  { %1547 = vmatprep.subr.bf16.mxu0 %v5061_v43 }
  0xbd   :  { %493 = vmatmul.mubr.bf16.gmra.mrb[32].mxu0 %v158_v26  ;;  %686 = vmatmul.mubr.bf16.gmra.mrb[32].mxu1 %v158_v26 }
  0xbe   :  { %502 = vmatprep.mubr.bf16.mxu0 %v5466_v0  ;;  %695 = vmatprep.mubr.bf16.mxu1 %v5466_v0 }
  0xc5   :  { %503 = vmatmul.mubr.bf16.gmra.mrb[36].mxu0 %v159_v29  ;;  %696 = vmatmul.mubr.bf16.gmra.mrb[36].mxu1 %v159_v29 }
  0xc6   :  { %512 = vmatprep.mubr.bf16.mxu0 %v5466_v0  ;;  %705 = vmatprep.mubr.bf16.mxu1 %v5466_v0 }
  0xcd   :  { %513 = vmatmul.mubr.bf16.gmra.mrb[40].mxu0 %v160_v32  ;;  %706 = vmatmul.mubr.bf16.gmra.mrb[40].mxu1 %v160_v32 }
  0xce   :  { %522 = vmatprep.mubr.bf16.mxu0 %v5466_v0  ;;  %715 = vmatprep.mubr.bf16.mxu1 %v5466_v0 }
  0xd5   :  { %523 = vmatmul.mubr.bf16.gmra.mrb[44].mxu0 %v161_v35  ;;  %716 = vmatmul.mubr.bf16.gmra.mrb[44].mxu1 %v161_v35 }
  0xd6   :  { %532 = vmatprep.mubr.bf16.mxu0 %v5466_v0  ;;  %725 = vmatprep.mubr.bf16.mxu1 %v5466_v0 }
  0xdd   :  { %533 = vmatmul.mubr.bf16.gmra.mrb[48].mxu0 %v162_v40  ;;  %726 = vmatmul.mubr.bf16.gmra.mrb[48].mxu1 %v162_v40 }
  0xde   :  { %542 = vmatprep.mubr.bf16.mxu0 %v5466_v0  ;;  %735 = vmatprep.mubr.bf16.mxu1 %v5466_v0 }
  0xe5   :  { %543 = vmatmul.mubr.bf16.gmra.mrb[52].mxu0 %v163_v44  ;;  %736 = vmatmul.mubr.bf16.gmra.mrb[52].mxu1 %v163_v44  ;;  %v5073_v44 = vld [vmem:[#allocation2 + $0x144] ss:$8 sps:$4 sm:$0xff]  }
  0xe6   :  { %552 = vmatprep.mubr.bf16.mxu0 %v5466_v0  ;;  %745 = vmatprep.mubr.bf16.mxu1 %v5466_v0 }
  0xed   :  { %553 = vmatmul.mubr.bf16.gmra.mrb[56].mxu0 %v164_v47  ;;  %746 = vmatmul.mubr.bf16.gmra.mrb[56].mxu1 %v164_v47 }
  0xee   :  { %562 = vmatprep.mubr.bf16.mxu0 %v5466_v0  ;;  %755 = vmatprep.mubr.bf16.mxu1 %v5466_v0 }
  0xf5   :  { %563 = vmatmul.mubr.bf16.gmra.mrb[60].mxu0 %v165_v50  ;;  %756 = vmatmul.mubr.bf16.gmra.mrb[60].mxu1 %v165_v50 }
 0x150   :  { %v414_v58 = vpop.f32.mrb[0].mxu0  ;;  %v607_v45 = vpop.f32.mrb[0].mxu1 }
 0x151   :  { %v415_v59 = vadd.f32 %v414_v58, %v5849_v56  ;;  %v416_v60 = vpop.f32.mrb[1].mxu0  ;;  %v608_v48 = vadd.f32 %v607_v45, %v5868_v36  ;;  %v609_v49 = vpop.f32.mrb[1].mxu1 }
 0x152   :  { %v417_v61 = vadd.f32 %v416_v60, %v5852_v57  ;;  %v418_v62 = vpop.f32.mrb[2].mxu0  ;;  %v610_v51 = vadd.f32 %v609_v49, %v5873_v39  ;;  %v611_v58 = vpop.f32.mrb[2].mxu1  ;;  %v5071_v60 = vld [vmem:[#allocation2 + $0x140] ss:$8 sps:$4 sm:$0xff]   ;;  %v5080_v49 = vld [vmem:[#allocation2 + $0x170] ss:$8 sps:$4 sm:$0xff]  }
 0x153   :  { %v419_v63 = vadd.f32 %v418_v62, %v5849_v56  ;;  %v420_v1 = vpop.f32.mrb[3].mxu0  ;;  %v766_v3 = vmax.f32 %v415_v59, 0.0  ;;  %v612_v62 = vadd.f32 %v611_v58, %v5868_v36 }
 0x154   :  { %v421_v2 = vadd.f32 %v420_v1, %v5852_v57  ;;  %v767_v5 = vmax.f32 %v417_v61, 0.0  ;;  %v768_v61 = vmax.f32 %v608_v48, 0.0 }
 0x155   :  { %v770_v4 = vmax.f32 %v419_v63, 0.0  ;;  %v613_v63 = vpop.f32.mrb[3].mxu1 }
 0x156   :  { %v771_v6 = vmax.f32 %v421_v2, 0.0 }
 0x157   :  { %v894_v7 = vpack.c.bf16 %v770_v4, %v766_v3  ;;  %v5076_v3 = vld [vmem:[#allocation2 + $0x154] ss:$8 sps:$4 sm:$0xff]   ;;  %v769_v4 = vmax.f32 %v610_v51, 0.0 }
 0x158   :  { %v895_v8 = vpack.c.bf16 %v771_v6, %v767_v5  ;;  %v424_v9 = vpop.f32.mrb[4].mxu0  ;;  %v614_v5 = vadd.f32 %v613_v63, %v5873_v39 }
 0x159   :  { %v425_v11 = vadd.f32 %v424_v9, %v5849_v56  ;;  %v426_v12 = vpop.f32.mrb[5].mxu0 }
 0x15a   :  { %v427_v14 = vadd.f32 %v426_v12, %v5852_v57  ;;  %v428_v15 = vpop.f32.mrb[6].mxu0  ;;  %1386 = vmatprep.mubr.bf16.mxu0 %v895_v8  ;;  %v772_v8 = vmax.f32 %v612_v62, 0.0 }
 0x15b   :  { %v429_v16 = vadd.f32 %v428_v15, %v5849_v56  ;;  %v430_v17 = vpop.f32.mrb[7].mxu0  ;;  %1387 = vmatmul.mubr.bf16.vlgmr.msra.gmra.mrb[64].mxu0 %v894_v7  ;;  %v774_v20 = vmax.f32 %v425_v11, 0.0  ;;  %v773_v11 = vmax.f32 %v614_v5, 0.0 }
 0x15c   :  { %v431_v18 = vadd.f32 %v430_v17, %v5852_v57  ;;  %1548 = vmatpush1.bf16.msra.mxu0 %v5059_v10  ;;  %v775_v23 = vmax.f32 %v427_v14, 0.0  ;;  %v5884_v14 = vpack.c.bf16 %v772_v8, %v768_v61  ;;  %v5079_v17 = vld [vmem:[#allocation2 + $0x164] ss:$8 sps:$4 sm:$0xff]  }
 0x15d   :  { %v778_v21 = vmax.f32 %v429_v16, 0.0  ;;  %1549 = vmatprep.subr.bf16.mxu0 %v5064_v13  ;;  %v5074_v13 = vld [vmem:[#allocation2 + $0x150] ss:$8 sps:$4 sm:$0xff]  }
 0x15e   :  { %v779_v24 = vmax.f32 %v431_v18, 0.0  ;;  %v617_v18 = vpop.f32.mrb[4].mxu1 }
 0x15f   :  { %v898_v26 = vpack.c.bf16 %v778_v21, %v774_v20 }
 0x160   :  { %v899_v28 = vpack.c.bf16 %v779_v24, %v775_v23  ;;  %v434_v29 = vpop.f32.mrb[8].mxu0  ;;  %1550 = vmatpush1.bf16.msra.mxu0 %v5062_v19  ;;  %v5886_v19 = vpack.c.bf16 %v773_v11, %v769_v4  ;;  %v619_v23 = vpop.f32.mrb[5].mxu1 }
 0x161   :  { %v435_v31 = vadd.f32 %v434_v29, %v5849_v56  ;;  %v436_v32 = vpop.f32.mrb[9].mxu0  ;;  %1551 = vmatprep.subr.bf16.mxu0 %v5067_v22  ;;  %v618_v22 = vadd.f32 %v617_v18, %v5868_v36 }
 0x162   :  { %v437_v34 = vadd.f32 %v436_v32, %v5852_v57  ;;  %v438_v35 = vpop.f32.mrb[10].mxu0  ;;  %1396 = vmatprep.mubr.bf16.mxu0 %v899_v28  ;;  %v621_v28 = vpop.f32.mrb[6].mxu1 }
 0x163   :  { %v439_v37 = vadd.f32 %v438_v35, %v5849_v56  ;;  %v440_v38 = vpop.f32.mrb[11].mxu0  ;;  %1397 = vmatmul.mubr.bf16.gmra.mrb[68].mxu0 %v898_v26  ;;  %v782_v42 = vmax.f32 %v435_v31, 0.0  ;;  %v620_v26 = vadd.f32 %v619_v23, %v5873_v39  ;;  %v5077_v31 = vld [vmem:[#allocation2 + $0x160] ss:$8 sps:$4 sm:$0xff]   ;;  %v776_v32 = vmax.f32 %v618_v22, 0.0 }
 0x164   :  { %v441_v40 = vadd.f32 %v440_v38, %v5852_v57  ;;  %1552 = vmatpush1.bf16.msra.mxu0 %v5065_v30  ;;  %v783_v46 = vmax.f32 %v437_v34, 0.0  ;;  %v623_v34 = vpop.f32.mrb[7].mxu1  ;;  %v5082_v38 = vld [vmem:[#allocation2 + $0x174] ss:$8 sps:$4 sm:$0xff]  }
 0x165   :  { %v786_v43 = vmax.f32 %v439_v37, 0.0  ;;  %1553 = vmatprep.subr.bf16.mxu0 %v5070_v33  ;;  %v622_v33 = vadd.f32 %v621_v28, %v5868_v36 }
 0x166   :  { %v787_v47 = vmax.f32 %v441_v40, 0.0  ;;  %v777_v40 = vmax.f32 %v620_v26, 0.0  ;;  %v5086_v26 = vld [vmem:[#allocation2 + $0x190] ss:$8 sps:$4 sm:$0xff]  }
 0x167   :  { %v902_v50 = vpack.c.bf16 %v786_v43, %v782_v42 }
 0x168   :  { %v903_v54 = vpack.c.bf16 %v787_v47, %v783_v46  ;;  %v444_v59 = vpop.f32.mrb[12].mxu0  ;;  %1554 = vmatpush1.bf16.msra.mxu0 %v5068_v41  ;;  %v624_v41 = vadd.f32 %v623_v34, %v5873_v39 }
 0x169   :  { %v445_v1 = vadd.f32 %v444_v59, %v5849_v56  ;;  %v446_v2 = vpop.f32.mrb[13].mxu0  ;;  %1555 = vmatprep.subr.bf16.mxu0 %v5073_v44  ;;  %v780_v44 = vmax.f32 %v622_v33, 0.0  ;;  %v627_v59 = vpop.f32.mrb[8].mxu1 }
 0x16a   :  { %v447_v6 = vadd.f32 %v446_v2, %v5852_v57  ;;  %v448_v7 = vpop.f32.mrb[14].mxu0  ;;  %1406 = vmatprep.mubr.bf16.mxu0 %v903_v54  ;;  %v781_v47 = vmax.f32 %v624_v41, 0.0  ;;  %v5085_v54 = vld [vmem:[#allocation2 + $0x184] ss:$8 sps:$4 sm:$0xff]   ;;  %v628_v63 = vadd.f32 %v627_v59, %v5868_v36 }
 0x16b   :  { %v449_v9 = vadd.f32 %v448_v7, %v5849_v56  ;;  %v450_v10 = vpop.f32.mrb[15].mxu0  ;;  %1407 = vmatmul.mubr.bf16.gmra.mrb[72].mxu0 %v902_v50  ;;  %v790_v15 = vmax.f32 %v445_v1, 0.0  ;;  %v5896_v50 = vpack.c.bf16 %v780_v44, %v776_v32  ;;  %v629_v1 = vpop.f32.mrb[9].mxu1  ;;  %v5083_v7 = vld [vmem:[#allocation2 + $0x180] ss:$8 sps:$4 sm:$0xff]  }
 0x16c   :  { %v451_v12 = vadd.f32 %v450_v10, %v5852_v57  ;;  %1556 = vmatpush1.bf16.msra.mxu0 %v5071_v60  ;;  %v791_v20 = vmax.f32 %v447_v6, 0.0  ;;  %v5898_v60 = vpack.c.bf16 %v781_v47, %v777_v40  ;;  %v631_v4 = vpop.f32.mrb[10].mxu1  ;;  %v784_v8 = vmax.f32 %v628_v63, 0.0 }
 0x16d   :  { %v794_v16 = vmax.f32 %v449_v9, 0.0  ;;  %1557 = vmatprep.subr.bf16.mxu0 %v5076_v3  ;;  %v630_v3 = vadd.f32 %v629_v1, %v5873_v39  ;;  %v632_v9 = vadd.f32 %v631_v4, %v5868_v36  ;;  %v633_v10 = vpop.f32.mrb[11].mxu1 }
 0x16e   :  { %v795_v21 = vmax.f32 %v451_v12, 0.0  ;;  %v637_v32 = vpop.f32.mrb[12].mxu1 }
 0x16f   :  { %v906_v24 = vpack.c.bf16 %v794_v16, %v790_v15  ;;  %v785_v15 = vmax.f32 %v630_v3, 0.0  ;;  %v634_v16 = vadd.f32 %v633_v10, %v5873_v39 }
 0x170   :  { %v907_v29 = vpack.c.bf16 %v795_v21, %v791_v20  ;;  %v454_v30 = vpop.f32.mrb[16].mxu0  ;;  %1558 = vmatpush1.bf16.msra.mxu0 %v5074_v13  ;;  %v5088_v13 = vld [vmem:[#allocation2 + $0x194] ss:$8 sps:$4 sm:$0xff]   ;;  %v788_v20 = vmax.f32 %v632_v9, 0.0  ;;  %v5097_v9 = vld [vmem:[#allocation2 + $0x1c4] ss:$8 sps:$4 sm:$0xff]  }
 0x171   :  { %v455_v35 = vadd.f32 %v454_v30, %v5849_v56  ;;  %v456_v37 = vpop.f32.mrb[17].mxu0  ;;  %1559 = vmatprep.subr.bf16.mxu0 %v5079_v17  ;;  %v789_v23 = vmax.f32 %v634_v16, 0.0 }
 0x172   :  { %v457_v42 = vadd.f32 %v456_v37, %v5852_v57  ;;  %v458_v43 = vpop.f32.mrb[18].mxu0  ;;  %1416 = vmatprep.mubr.bf16.mxu0 %v907_v29  ;;  %v5908_v28 = vpack.c.bf16 %v788_v20, %v784_v8  ;;  %v638_v37 = vadd.f32 %v637_v32, %v5868_v36  ;;  %v5100_v32 = vld [vmem:[#allocation2 + $0x1d4] ss:$8 sps:$4 sm:$0xff]  }
 0x173   :  { %v459_v45 = vadd.f32 %v458_v43, %v5849_v56  ;;  %v460_v46 = vpop.f32.mrb[19].mxu0  ;;  %1417 = vmatmul.mubr.bf16.gmra.mrb[76].mxu0 %v906_v24  ;;  %v798_v51 = vmax.f32 %v455_v35, 0.0  ;;  %v5910_v33 = vpack.c.bf16 %v789_v23, %v785_v15  ;;  %v5095_v23 = vld [vmem:[#allocation2 + $0x1c0] ss:$8 sps:$4 sm:$0xff]  }
 0x174   :  { %v461_v48 = vadd.f32 %v460_v46, %v5852_v57  ;;  %1560 = vmatpush1.bf16.msra.mxu0 %v5077_v31  ;;  %v799_v61 = vmax.f32 %v457_v42, 0.0  ;;  %v5091_v31 = vld [vmem:[#allocation2 + $0x1a4] ss:$8 sps:$4 sm:$0xff]   ;;  %v792_v46 = vmax.f32 %v638_v37, 0.0 }
 0x175   :  { %v802_v58 = vmax.f32 %v459_v45, 0.0  ;;  %1561 = vmatprep.subr.bf16.mxu0 %v5082_v38  ;;  %v639_v38 = vpop.f32.mrb[13].mxu1  ;;  %v5089_v45 = vld [vmem:[#allocation2 + $0x1a0] ss:$8 sps:$4 sm:$0xff]  }
 0x176   :  { %v803_v62 = vmax.f32 %v461_v48, 0.0  ;;  %v640_v41 = vadd.f32 %v639_v38, %v5873_v39  ;;  %v641_v42 = vpop.f32.mrb[14].mxu1 }
 0x177   :  { %v910_v2 = vpack.c.bf16 %v802_v58, %v798_v51  ;;  %v642_v47 = vadd.f32 %v641_v42, %v5868_v36  ;;  %v643_v48 = vpop.f32.mrb[15].mxu1  ;;  %v5094_v58 = vld [vmem:[#allocation2 + $0x1b4] ss:$8 sps:$4 sm:$0xff]  }
 0x178   :  { %v911_v5 = vpack.c.bf16 %v803_v62, %v799_v61  ;;  %v464_v6 = vpop.f32.mrb[20].mxu0  ;;  %1562 = vmatpush1.bf16.msra.mxu0 %v5080_v49  ;;  %v644_v59 = vadd.f32 %v643_v48, %v5873_v39  ;;  %v647_v10 = vpop.f32.mrb[16].mxu1 }
 0x179   :  { %v465_v11 = vadd.f32 %v464_v6, %v5849_v56  ;;  %v466_v12 = vpop.f32.mrb[21].mxu0  ;;  %1563 = vmatprep.subr.bf16.mxu0 %v5085_v54  ;;  %v793_v54 = vmax.f32 %v640_v41, 0.0  ;;  %v796_v63 = vmax.f32 %v642_v47, 0.0  ;;  %v648_v15 = vadd.f32 %v647_v10, %v5868_v36  ;;  %v649_v16 = vpop.f32.mrb[17].mxu1 }
 0x17a   :  { %v467_v17 = vadd.f32 %v466_v12, %v5852_v57  ;;  %v468_v18 = vpop.f32.mrb[22].mxu0  ;;  %1426 = vmatprep.mubr.bf16.mxu0 %v911_v5  ;;  %v797_v3 = vmax.f32 %v644_v59, 0.0  ;;  %v5092_v5 = vld [vmem:[#allocation2 + $0x1b0] ss:$8 sps:$4 sm:$0xff]   ;;  %v651_v20 = vpop.f32.mrb[18].mxu1 }
 0x17b   :  { %v469_v21 = vadd.f32 %v468_v18, %v5849_v56  ;;  %v470_v22 = vpop.f32.mrb[23].mxu0  ;;  %1427 = vmatmul.mubr.bf16.gmra.mrb[80].mxu0 %v910_v2  ;;  %v806_v29 = vmax.f32 %v465_v11, 0.0  ;;  %v5920_v6 = vpack.c.bf16 %v796_v63, %v792_v46  ;;  %v650_v18 = vadd.f32 %v649_v16, %v5873_v39 }
 0x17c   :  { %v471_v24 = vadd.f32 %v470_v22, %v5852_v57  ;;  %1564 = vmatpush1.bf16.msra.mxu0 %v5083_v7  ;;  %v807_v34 = vmax.f32 %v467_v17, 0.0  ;;  %v5922_v11 = vpack.c.bf16 %v797_v3, %v793_v54 }
 0x17d   :  { %v810_v30 = vmax.f32 %v469_v21, 0.0  ;;  %1565 = vmatprep.subr.bf16.mxu0 %v5088_v13 }
 0x17e   :  { %v811_v35 = vmax.f32 %v471_v24, 0.0  ;;  %v800_v24 = vmax.f32 %v648_v15, 0.0 }
 0x17f   :  { %v914_v40 = vpack.c.bf16 %v810_v30, %v806_v29  ;;  %v653_v29 = vpop.f32.mrb[19].mxu1 }
 0x180   :  { %v915_v43 = vpack.c.bf16 %v811_v35, %v807_v34  ;;  %v474_v44 = vpop.f32.mrb[24].mxu0  ;;  %1566 = vmatpush1.bf16.msra.mxu0 %v5086_v26  ;;  %v652_v26 = vadd.f32 %v651_v20, %v5868_v36  ;;  %v801_v34 = vmax.f32 %v650_v18, 0.0  ;;  %v654_v35 = vadd.f32 %v653_v29, %v5873_v39 }
 0x181   :  { %v475_v49 = vadd.f32 %v474_v44, %v5849_v56  ;;  %v476_v51 = vpop.f32.mrb[25].mxu0  ;;  %1567 = vmatprep.subr.bf16.mxu0 %v5091_v31 }
 0x182   :  { %v477_v61 = vadd.f32 %v476_v51, %v5852_v57  ;;  %v478_v62 = vpop.f32.mrb[26].mxu0  ;;  %1436 = vmatprep.mubr.bf16.mxu0 %v915_v43  ;;  %v805_v43 = vmax.f32 %v654_v35, 0.0  ;;  %v657_v51 = vpop.f32.mrb[20].mxu1 }
 0x183   :  { %v479_v1 = vadd.f32 %v478_v62, %v5849_v56  ;;  %v480_v2 = vpop.f32.mrb[27].mxu0  ;;  %1437 = vmatmul.mubr.bf16.gmra.mrb[84].mxu0 %v914_v40  ;;  %v814_v7 = vmax.f32 %v475_v49, 0.0  ;;  %v804_v40 = vmax.f32 %v652_v26, 0.0  ;;  %v5103_v49 = vld [vmem:[#allocation2 + $0x1e4] ss:$8 sps:$4 sm:$0xff]   ;;  %v659_v62 = vpop.f32.mrb[21].mxu1 }
 0x184   :  { %v481_v4 = vadd.f32 %v480_v2, %v5852_v57  ;;  %1568 = vmatpush1.bf16.msra.mxu0 %v5089_v45  ;;  %v815_v12 = vmax.f32 %v477_v61, 0.0  ;;  %v5098_v45 = vld [vmem:[#allocation2 + $0x1d0] ss:$8 sps:$4 sm:$0xff]   ;;  %v658_v61 = vadd.f32 %v657_v51, %v5868_v36  ;;  %v661_v2 = vpop.f32.mrb[22].mxu1 }
 0x185   :  { %v818_v8 = vmax.f32 %v479_v1, 0.0  ;;  %1569 = vmatprep.subr.bf16.mxu0 %v5094_v58  ;;  %v5932_v46 = vpack.c.bf16 %v804_v40, %v800_v24  ;;  %v5934_v58 = vpack.c.bf16 %v805_v43, %v801_v34  ;;  %v660_v1 = vadd.f32 %v659_v62, %v5873_v39  ;;  %v5104_v26 = vld [vmem:[#allocation2 + $0x1f0] ss:$8 sps:$4 sm:$0xff]  }
 0x186   :  { %v819_v13 = vmax.f32 %v481_v4, 0.0 }
 0x187   :  { %v918_v17 = vpack.c.bf16 %v818_v8, %v814_v7  ;;  %v808_v7 = vmax.f32 %v658_v61, 0.0  ;;  %v662_v8 = vadd.f32 %v661_v2, %v5868_v36  ;;  %v809_v15 = vmax.f32 %v660_v1, 0.0 }
 0x188   :  { %v919_v21 = vpack.c.bf16 %v819_v13, %v815_v12  ;;  %v484_v22 = vpop.f32.mrb[28].mxu0  ;;  %1570 = vmatpush1.bf16.msra.mxu0 %v5092_v5  ;;  %v5101_v5 = vld [vmem:[#allocation2 + $0x1e0] ss:$8 sps:$4 sm:$0xff]   ;;  %v5106_v13 = vld [vmem:[#allocation2 + $0x1f4] ss:$8 sps:$4 sm:$0xff]  }
 0x189   :  { %v485_v30 = vadd.f32 %v484_v22, %v5849_v56  ;;  %v486_v31 = vpop.f32.mrb[29].mxu0  ;;  %1571 = vmatprep.subr.bf16.mxu0 %v5097_v9  ;;  %v663_v9 = vpop.f32.mrb[23].mxu1  ;;  %v812_v20 = vmax.f32 %v662_v8, 0.0 }
 0x18a   :  { %v487_v37 = vadd.f32 %v486_v31, %v5852_v57  ;;  %v488_v38 = vpop.f32.mrb[30].mxu0  ;;  %1446 = vmatprep.mubr.bf16.mxu0 %v919_v21  ;;  %v664_v16 = vadd.f32 %v663_v9, %v5873_v39 }
 0x18b   :  { %v489_v41 = vadd.f32 %v488_v38, %v5849_v56  ;;  %v490_v42 = vpop.f32.mrb[31].mxu0  ;;  %1447 = vmatmul.mubr.bf16.gmra.mrb[88].mxu0 %v918_v17  ;;  %v822_v47 = vmax.f32 %v485_v30, 0.0  ;;  %v5944_v29 = vpack.c.bf16 %v812_v20, %v808_v7 }
 0x18c   :  { %v491_v44 = vadd.f32 %v490_v42, %v5852_v57  ;;  %1572 = vmatpush1.bf16.msra.mxu0 %v5095_v23  ;;  %v823_v54 = vmax.f32 %v487_v37, 0.0  ;;  %v813_v23 = vmax.f32 %v664_v16, 0.0 }
 0x18d   :  { %v826_v48 = vmax.f32 %v489_v41, 0.0  ;;  %1573 = vmatprep.subr.bf16.mxu0 %v5100_v32  ;;  %v667_v32 = vpop.f32.mrb[24].mxu1 }
 0x18e   :  { %v827_v59 = vmax.f32 %v491_v44, 0.0  ;;  %v5946_v34 = vpack.c.bf16 %v813_v23, %v809_v15  ;;  %v668_v38 = vadd.f32 %v667_v32, %v5868_v36  ;;  %v669_v40 = vpop.f32.mrb[25].mxu1 }
 0x18f   :  { %v922_v63 = vpack.c.bf16 %v826_v48, %v822_v47  ;;  %v670_v42 = vadd.f32 %v669_v40, %v5873_v39  ;;  %v671_v43 = vpop.f32.mrb[26].mxu1 }
 0x190   :  { %v923_v3 = vpack.c.bf16 %v827_v59, %v823_v54  ;;  %v494_v4 = vpop.f32.mrb[32].mxu0  ;;  %1574 = vmatpush1.bf16.msra.mxu0 %v5098_v45  ;;  %v816_v47 = vmax.f32 %v668_v38, 0.0  ;;  %v672_v48 = vadd.f32 %v671_v43, %v5868_v36 }
 0x191   :  { %v495_v10 = vadd.f32 %v494_v4, %v5849_v56  ;;  %v496_v12 = vpop.f32.mrb[33].mxu0  ;;  %1575 = vmatprep.subr.bf16.mxu0 %v5103_v49  ;;  %v673_v49 = vpop.f32.mrb[27].mxu1  ;;  %v817_v59 = vmax.f32 %v670_v42, 0.0 }
 0x192   :  { %v497_v17 = vadd.f32 %v496_v12, %v5852_v57  ;;  %v498_v18 = vpop.f32.mrb[34].mxu0  ;;  %1456 = vmatprep.mubr.bf16.mxu0 %v923_v3  ;;  %v674_v61 = vadd.f32 %v673_v49, %v5873_v39  ;;  %v820_v1 = vmax.f32 %v672_v48, 0.0 }
 0x193   :  { %v499_v21 = vadd.f32 %v498_v18, %v5849_v56  ;;  %v500_v22 = vpop.f32.mrb[35].mxu0  ;;  %1457 = vmatmul.mubr.bf16.gmra.mrb[92].mxu0 %v922_v63  ;;  %v830_v30 = vmax.f32 %v495_v10, 0.0  ;;  %v677_v10 = vpop.f32.mrb[28].mxu1 }
 0x194   :  { %v501_v24 = vadd.f32 %v500_v22, %v5852_v57  ;;  %1576 = vmatpush1.bf16.msra.mxu0 %v5101_v5  ;;  %v831_v35 = vmax.f32 %v497_v17, 0.0  ;;  %v821_v4 = vmax.f32 %v674_v61, 0.0  ;;  %v5956_v7 = vpack.c.bf16 %v820_v1, %v816_v47  ;;  %v679_v17 = vpop.f32.mrb[29].mxu1 }
 0x195   :  { %v834_v31 = vmax.f32 %v499_v21, 0.0  ;;  %1577 = vmatprep.subr.bf16.mxu0 %v5106_v13  ;;  %v678_v16 = vadd.f32 %v677_v10, %v5868_v36  ;;  %v680_v20 = vadd.f32 %v679_v17, %v5873_v39  ;;  %v681_v21 = vpop.f32.mrb[30].mxu1 }
 0x196   :  { %v835_v37 = vmax.f32 %v501_v24, 0.0  ;;  %v5958_v12 = vpack.c.bf16 %v821_v4, %v817_v59 }
 0x197   :  { %v926_v41 = vpack.c.bf16 %v834_v31, %v830_v30  ;;  %v824_v24 = vmax.f32 %v678_v16, 0.0  ;;  %v683_v30 = vpop.f32.mrb[31].mxu1 }
 0x198   :  { %v927_v44 = vpack.c.bf16 %v835_v37, %v831_v35  ;;  %v504_v45 = vpop.f32.mrb[36].mxu0  ;;  %1578 = vmatpush1.bf16.msra.mxu0 %v5104_v26  ;;  %v682_v26 = vadd.f32 %v681_v21, %v5868_v36  ;;  %v825_v35 = vmax.f32 %v680_v20, 0.0  ;;  %v684_v37 = vadd.f32 %v683_v30, %v5873_v39 }
 0x199   :  { %v505_v51 = vadd.f32 %v504_v45, %v5849_v56  ;;  %v506_v54 = vpop.f32.mrb[37].mxu0 }
 0x19a   :  { %v507_v62 = vadd.f32 %v506_v54, %v5852_v57  ;;  %v508_v63 = vpop.f32.mrb[38].mxu0  ;;  %1466 = vmatprep.mubr.bf16.mxu0 %v927_v44  ;;  %v829_v44 = vmax.f32 %v684_v37, 0.0 }
 0x19b   :  { %v509_v2 = vadd.f32 %v508_v63, %v5849_v56  ;;  %v510_v3 = vpop.f32.mrb[39].mxu0  ;;  %1467 = vmatmul.mubr.bf16.gmra.mrb[96].mxu0 %v926_v41  ;;  %v838_v8 = vmax.f32 %v505_v51, 0.0  ;;  %v828_v41 = vmax.f32 %v682_v26, 0.0  ;;  %v687_v51 = vpop.f32.mrb[32].mxu1 }
 0x19c   :  { %v511_v5 = vadd.f32 %v510_v3, %v5852_v57  ;;  %v839_v13 = vmax.f32 %v507_v62, 0.0  ;;  %v5970_v54 = vpack.c.bf16 %v829_v44, %v825_v35  ;;  %v688_v62 = vadd.f32 %v687_v51, %v5868_v36  ;;  %v689_v63 = vpop.f32.mrb[33].mxu1 }
 0x19d   :  { %v842_v9 = vmax.f32 %v509_v2, 0.0  ;;  %v5968_v47 = vpack.c.bf16 %v828_v41, %v824_v24  ;;  %v690_v2 = vadd.f32 %v689_v63, %v5873_v39  ;;  %v691_v3 = vpop.f32.mrb[34].mxu1 }
 0x19e   :  { %v843_v15 = vmax.f32 %v511_v5, 0.0  ;;  %v693_v10 = vpop.f32.mrb[35].mxu1 }
 0x19f   :  { %v930_v18 = vpack.c.bf16 %v842_v9, %v838_v8  ;;  %v832_v8 = vmax.f32 %v688_v62, 0.0  ;;  %v692_v9 = vadd.f32 %v691_v3, %v5868_v36  ;;  %v833_v16 = vmax.f32 %v690_v2, 0.0  ;;  %v697_v35 = vpop.f32.mrb[36].mxu1 }
 0x1a0   :  { %v931_v22 = vpack.c.bf16 %v843_v15, %v839_v13  ;;  %v514_v23 = vpop.f32.mrb[40].mxu0  ;;  %v694_v17 = vadd.f32 %v693_v10, %v5873_v39  ;;  %v698_v41 = vadd.f32 %v697_v35, %v5868_v36 }
 0x1a1   :  { %v515_v31 = vadd.f32 %v514_v23, %v5849_v56  ;;  %v516_v32 = vpop.f32.mrb[41].mxu0  ;;  %v836_v21 = vmax.f32 %v692_v9, 0.0 }
 0x1a2   :  { %v517_v38 = vadd.f32 %v516_v32, %v5852_v57  ;;  %v518_v40 = vpop.f32.mrb[42].mxu0  ;;  %1476 = vmatprep.mubr.bf16.mxu0 %v931_v22  ;;  %v837_v24 = vmax.f32 %v694_v17, 0.0  ;;  %v840_v51 = vmax.f32 %v698_v41, 0.0  ;;  %v5108_v17 = vld [vmem:[#allocation4] sm:$0xff]  }
 0x1a3   :  { %v519_v42 = vadd.f32 %v518_v40, %v5849_v56  ;;  %v520_v43 = vpop.f32.mrb[43].mxu0  ;;  %1477 = vmatmul.mubr.bf16.gmra.mrb[100].mxu0 %v930_v18  ;;  %v846_v48 = vmax.f32 %v515_v31, 0.0  ;;  %v5980_v30 = vpack.c.bf16 %v836_v21, %v832_v8 }
 0x1a4   :  { %v521_v45 = vadd.f32 %v520_v43, %v5852_v57  ;;  %v847_v59 = vmax.f32 %v517_v38, 0.0  ;;  %v5982_v37 = vpack.c.bf16 %v837_v24, %v833_v16  ;;  %v5107_v16 = vld [vmem:[#allocation4 + $0x40] sm:$0xff]  }
 0x1a5   :  { %v850_v49 = vmax.f32 %v519_v42, 0.0  ;;  %v699_v42 = vpop.f32.mrb[37].mxu1  ;;  %4487 = vmatprep.subr.bf16.mxu1 %v5107_v16 }
 0x1a6   :  { %v851_v61 = vmax.f32 %v521_v45, 0.0  ;;  %v700_v44 = vadd.f32 %v699_v42, %v5873_v39  ;;  %v701_v45 = vpop.f32.mrb[38].mxu1  ;;  %4488 = vmatpush3.bf16.msra.mxu1 %v5108_v17 }
 0x1a7   :  { %v934_v1 = vpack.c.bf16 %v850_v49, %v846_v48 }
 0x1a8   :  { %v935_v4 = vpack.c.bf16 %v851_v61, %v847_v59  ;;  %v524_v5 = vpop.f32.mrb[44].mxu0  ;;  %v702_v59 = vadd.f32 %v701_v45, %v5868_v36  ;;  %v703_v61 = vpop.f32.mrb[39].mxu1 }
 0x1a9   :  { %v525_v13 = vadd.f32 %v524_v5, %v5849_v56  ;;  %v526_v15 = vpop.f32.mrb[45].mxu0  ;;  %v704_v2 = vadd.f32 %v703_v61, %v5873_v39  ;;  %v707_v21 = vpop.f32.mrb[40].mxu1 }
 0x1aa   :  { %v527_v18 = vadd.f32 %v526_v15, %v5852_v57  ;;  %v528_v20 = vpop.f32.mrb[46].mxu0  ;;  %1486 = vmatprep.mubr.bf16.mxu0 %v935_v4  ;;  %v844_v5 = vmax.f32 %v702_v59, 0.0 }
 0x1ab   :  { %v529_v22 = vadd.f32 %v528_v20, %v5849_v56  ;;  %v530_v23 = vpop.f32.mrb[47].mxu0  ;;  %1487 = vmatmul.mubr.bf16.gmra.mrb[104].mxu0 %v934_v1  ;;  %v854_v31 = vmax.f32 %v525_v13, 0.0  ;;  %v841_v1 = vmax.f32 %v700_v44, 0.0  ;;  %v845_v10 = vmax.f32 %v704_v2, 0.0 }
 0x1ac   :  { %v531_v26 = vadd.f32 %v530_v23, %v5852_v57  ;;  %v855_v38 = vmax.f32 %v527_v18, 0.0  ;;  %v5992_v15 = vpack.c.bf16 %v844_v5, %v840_v51 }
 0x1ad   :  { %v858_v32 = vmax.f32 %v529_v22, 0.0  ;;  %v5994_v22 = vpack.c.bf16 %v845_v10, %v841_v1 }
 0x1ae   :  { %v859_v40 = vmax.f32 %v531_v26, 0.0  ;;  %v708_v26 = vadd.f32 %v707_v21, %v5868_v36 }
 0x1af   :  { %v938_v43 = vpack.c.bf16 %v858_v32, %v854_v31  ;;  %v709_v31 = vpop.f32.mrb[41].mxu1 }
 0x1b0   :  { %v939_v48 = vpack.c.bf16 %v859_v40, %v855_v38  ;;  %v534_v49 = vpop.f32.mrb[48].mxu0  ;;  %v710_v35 = vadd.f32 %v709_v31, %v5873_v39  ;;  %v711_v38 = vpop.f32.mrb[42].mxu1  ;;  %v848_v42 = vmax.f32 %v708_v26, 0.0 }
 0x1b1   :  { %v535_v62 = vadd.f32 %v534_v49, %v5849_v56  ;;  %v536_v63 = vpop.f32.mrb[49].mxu0  ;;  %v713_v44 = vpop.f32.mrb[43].mxu1 }
 0x1b2   :  { %v537_v3 = vadd.f32 %v536_v63, %v5852_v57  ;;  %v538_v4 = vpop.f32.mrb[50].mxu0  ;;  %1496 = vmatprep.mubr.bf16.mxu0 %v939_v48  ;;  %v849_v49 = vmax.f32 %v710_v35, 0.0  ;;  %v714_v51 = vadd.f32 %v713_v44, %v5873_v39 }
 0x1b3   :  { %v539_v8 = vadd.f32 %v538_v4, %v5849_v56  ;;  %v540_v9 = vpop.f32.mrb[51].mxu0  ;;  %1497 = vmatmul.mubr.bf16.gmra.mrb[108].mxu0 %v938_v43  ;;  %v862_v18 = vmax.f32 %v535_v62, 0.0  ;;  %v712_v43 = vadd.f32 %v711_v38, %v5868_v36 }
 0x1b4   :  { %v541_v13 = vadd.f32 %v540_v9, %v5852_v57  ;;  %v863_v23 = vmax.f32 %v537_v3, 0.0  ;;  %v853_v2 = vmax.f32 %v714_v51, 0.0  ;;  %v717_v9 = vpop.f32.mrb[44].mxu1 }
 0x1b5   :  { %v866_v20 = vmax.f32 %v539_v8, 0.0  ;;  %v852_v62 = vmax.f32 %v712_v43, 0.0  ;;  %v718_v17 = vadd.f32 %v717_v9, %v5868_v36 }
 0x1b6   :  { %v867_v24 = vmax.f32 %v541_v13, 0.0  ;;  %v6006_v10 = vpack.c.bf16 %v853_v2, %v849_v49 }
 0x1b7   :  { %v942_v32 = vpack.c.bf16 %v866_v20, %v862_v18  ;;  %v6004_v4 = vpack.c.bf16 %v852_v62, %v848_v42  ;;  %v719_v18 = vpop.f32.mrb[45].mxu1  ;;  %v856_v31 = vmax.f32 %v718_v17, 0.0  ;;  %v5109_v62 = vld [vmem:[#allocation4 + $0x48] sm:$0xff]  }
 0x1b8   :  { %v943_v40 = vpack.c.bf16 %v867_v24, %v863_v23  ;;  %v544_v41 = vpop.f32.mrb[52].mxu0  ;;  %v720_v21 = vadd.f32 %v719_v18, %v5873_v39  ;;  %v721_v23 = vpop.f32.mrb[46].mxu1  ;;  %4489 = vmatprep.subr.bf16.mxu1 %v5109_v62 }
 0x1b9   :  { %v545_v45 = vadd.f32 %v544_v41, %v5849_v56  ;;  %v546_v48 = vpop.f32.mrb[53].mxu0  ;;  %v723_v35 = vpop.f32.mrb[47].mxu1 }
 0x1ba   :  { %v547_v59 = vadd.f32 %v546_v48, %v5852_v57  ;;  %v548_v61 = vpop.f32.mrb[54].mxu0  ;;  %1506 = vmatprep.mubr.bf16.mxu0 %v943_v40  ;;  %v857_v41 = vmax.f32 %v720_v21, 0.0  ;;  %v724_v42 = vadd.f32 %v723_v35, %v5873_v39 }
 0x1bb   :  { %v549_v63 = vadd.f32 %v548_v61, %v5849_v56  ;;  %v550_v1 = vpop.f32.mrb[55].mxu0  ;;  %1507 = vmatmul.mubr.bf16.gmra.mrb[112].mxu0 %v942_v32  ;;  %v870_v5 = vmax.f32 %v545_v45, 0.0  ;;  %v722_v32 = vadd.f32 %v721_v23, %v5868_v36 }
 0x1bc   :  { %v551_v3 = vadd.f32 %v550_v1, %v5852_v57  ;;  %v871_v13 = vmax.f32 %v547_v59, 0.0  ;;  %v861_v51 = vmax.f32 %v724_v42, 0.0 }
 0x1bd   :  { %v874_v8 = vmax.f32 %v549_v63, 0.0  ;;  %v860_v45 = vmax.f32 %v722_v32, 0.0  ;;  %v5110_v63 = vld [vmem:[#allocation4 + $0x8] sm:$0xff]  }
 0x1be   :  { %v875_v16 = vmax.f32 %v551_v3, 0.0  ;;  %v727_v3 = vpop.f32.mrb[48].mxu1  ;;  %4490 = vmatpush3.bf16.msra.mxu1 %v5110_v63 }
 0x1bf   :  { %v946_v20 = vpack.c.bf16 %v874_v8, %v870_v5  ;;  %v6016_v61 = vpack.c.bf16 %v860_v45, %v856_v31  ;;  %v6018_v5 = vpack.c.bf16 %v861_v51, %v857_v41 }
 0x1c0   :  { %v947_v24 = vpack.c.bf16 %v875_v16, %v871_v13  ;;  %v554_v26 = vpop.f32.mrb[56].mxu0  ;;  %v728_v13 = vadd.f32 %v727_v3, %v5868_v36  ;;  %v729_v16 = vpop.f32.mrb[49].mxu1 }
 0x1c1   :  { %v555_v38 = vadd.f32 %v554_v26, %v5849_v56  ;;  %v556_v40 = vpop.f32.mrb[57].mxu0  ;;  %v730_v18 = vadd.f32 %v729_v16, %v5873_v39 }
 0x1c2   :  { %v557_v43 = vadd.f32 %v556_v40, %v5852_v57  ;;  %v558_v44 = vpop.f32.mrb[58].mxu0  ;;  %1516 = vmatprep.mubr.bf16.mxu0 %v947_v24  ;;  %v864_v24 = vmax.f32 %v728_v13, 0.0 }
 0x1c3   :  { %v559_v48 = vadd.f32 %v558_v44, %v5849_v56  ;;  %v560_v49 = vpop.f32.mrb[59].mxu0  ;;  %1517 = vmatmul.mubr.bf16.gmra.mrb[116].mxu0 %v946_v20  ;;  %v878_v1 = vmax.f32 %v555_v38, 0.0  ;;  %v731_v20 = vpop.f32.mrb[50].mxu1  ;;  %v865_v38 = vmax.f32 %v730_v18, 0.0 }
 0x1c4   :  { %v561_v59 = vadd.f32 %v560_v49, %v5852_v57  ;;  %v879_v8 = vmax.f32 %v557_v43, 0.0  ;;  %v732_v26 = vadd.f32 %v731_v20, %v5868_v36  ;;  %v733_v31 = vpop.f32.mrb[51].mxu1 }
 0x1c5   :  { %v882_v2 = vmax.f32 %v559_v48, 0.0  ;;  %v734_v40 = vadd.f32 %v733_v31, %v5873_v39  ;;  %v737_v63 = vpop.f32.mrb[52].mxu1  ;;  %v5111_v31 = vld [vmem:[#allocation4 + $0x50] sm:$0xff]  }
 0x1c6   :  { %v883_v9 = vmax.f32 %v561_v59, 0.0  ;;  %v868_v43 = vmax.f32 %v732_v26, 0.0  ;;  %4491 = vmatprep.subr.bf16.mxu1 %v5111_v31 }
 0x1c7   :  { %v950_v17 = vpack.c.bf16 %v882_v2, %v878_v1  ;;  %v869_v48 = vmax.f32 %v734_v40, 0.0 }
 0x1c8   :  { %v951_v21 = vpack.c.bf16 %v883_v9, %v879_v8  ;;  %v564_v23 = vpop.f32.mrb[60].mxu0  ;;  %v6028_v51 = vpack.c.bf16 %v868_v43, %v864_v24  ;;  %v738_v8 = vadd.f32 %v737_v63, %v5868_v36  ;;  %v739_v9 = vpop.f32.mrb[53].mxu1 }
 0x1c9   :  { %v565_v32 = vadd.f32 %v564_v23, %v5849_v56  ;;  %v566_v35 = vpop.f32.mrb[61].mxu0  ;;  %v6030_v1 = vpack.c.bf16 %v869_v48, %v865_v38  ;;  %v741_v16 = vpop.f32.mrb[54].mxu1 }
 0x1ca   :  { %v567_v41 = vadd.f32 %v566_v35, %v5852_v57  ;;  %v568_v42 = vpop.f32.mrb[62].mxu0  ;;  %1526 = vmatprep.mubr.bf16.mxu0 %v951_v21  ;;  %v872_v18 = vmax.f32 %v738_v8, 0.0  ;;  %v743_v20 = vpop.f32.mrb[55].mxu1  ;;  %v5113_v35 = vld [vmem:[#allocation4 + $0x58] sm:$0xff]   ;;  %v5116_v8 = vld [vmem:[#allocation4 + $0x20] sm:$0xff]  }
 0x1cb   :  { %v569_v44 = vadd.f32 %v568_v42, %v5849_v56  ;;  %v570_v45 = vpop.f32.mrb[63].mxu0  ;;  %1527 = vmatmul.mubr.bf16.gmra.mrb[120].mxu0 %v950_v17  ;;  %v886_v59 = vmax.f32 %v565_v32, 0.0  ;;  %v740_v56 = vadd.f32 %v739_v9, %v5873_v39  ;;  %v744_v23 = vadd.f32 %v743_v20, %v5873_v39  ;;  %v5112_v32 = vld [vmem:[#allocation4 + $0x10] sm:$0xff]   ;;  %v747_v40 = vpop.f32.mrb[56].mxu1  ;;  %v5118_v20 = vld [vmem:[#allocation4 + $0x28] sm:$0xff]  }
 0x1cc   :  { %v571_v49 = vadd.f32 %v570_v45, %v5852_v57  ;;  %v887_v2 = vmax.f32 %v567_v41, 0.0  ;;  %v742_v57 = vadd.f32 %v741_v16, %v5868_v36  ;;  %v748_v42 = vadd.f32 %v747_v40, %v5868_v36  ;;  %v749_v43 = vpop.f32.mrb[57].mxu1  ;;  %4492 = vmatpush3.bf16.msra.mxu1 %v5112_v32  ;;  %v5120_v40 = vld [vmem:[#allocation4 + $0x30] sm:$0xff]  }
 0x1cd   :  { %v890_v62 = vmax.f32 %v569_v44, 0.0  ;;  %v873_v21 = vmax.f32 %v740_v56, 0.0  ;;  %v877_v26 = vmax.f32 %v744_v23, 0.0  ;;  %v5114_v44 = vld [vmem:[#allocation4 + $0x18] sm:$0xff]   ;;  %v750_v45 = vadd.f32 %v749_v43, %v5873_v39  ;;  %v751_v48 = vpop.f32.mrb[58].mxu1  ;;  %4493 = vmatprep.subr.bf16.mxu1 %v5113_v35 }
 0x1ce   :  { %v891_v3 = vmax.f32 %v571_v49, 0.0  ;;  %v876_v24 = vmax.f32 %v742_v57, 0.0  ;;  %v5115_v49 = vld [vmem:[#allocation4 + $0x60] sm:$0xff]   ;;  %v5121_v43 = vld [vmem:[#allocation4 + $0x78] sm:$0xff]  }
 0x1cf   :  { %v954_v13 = vpack.c.bf16 %v890_v62, %v886_v59  ;;  %v6039_v41 = vpack.c.bf16 %v877_v26, %v873_v21  ;;  %v880_v59 = vmax.f32 %v748_v42, 0.0  ;;  %v752_v62 = vadd.f32 %v751_v48, %v5868_v36  ;;  %v5122_v48 = vld [vmem:[#allocation4 + $0x38] sm:$0xff]  }
 0x1d0   :  { %v955_v17 = vpack.c.bf16 %v891_v3, %v887_v2  ;;  %v6037_v38 = vpack.c.bf16 %v876_v24, %v872_v18  ;;  %v881_v63 = vmax.f32 %v750_v45, 0.0  ;;  %4494 = vmatpush3.bf16.msra.mxu1 %v5114_v44  ;;  %v5119_v24 = vld [vmem:[#allocation4 + $0x70] sm:$0xff]  }
 0x1d1   :  { %v884_v3 = vmax.f32 %v752_v62, 0.0  ;;  %4495 = vmatprep.subr.bf16.mxu1 %v5115_v49 }
 0x1d2   :  { %1536 = vmatprep.mubr.bf16.mxu0 %v955_v17 }
 0x1d3   :  { %1537 = vmatmul.mubr.bf16.gmra.mrb[124].mxu0 %v954_v13  ;;  %v5117_v13 = vld [vmem:[#allocation4 + $0x68] sm:$0xff]   ;;  %v952_v56 = vpack.c.bf16 %v884_v3, %v880_v59  ;;  %v5126_v59 = vld [vmem:[#allocation6 + $0x10] ss:$8 sps:$4 sm:$0xff]  }
 0x1d4   :  { %1579 = vmatprep.mubr.bf16.mxu0 %v5886_v19  ;;  %v753_v19 = vpop.f32.mrb[59].mxu1  ;;  %4496 = vmatpush3.bf16.msra.mxu1 %v5116_v8 }
 0x1d5   :  { %v754_v2 = vadd.f32 %v753_v19, %v5873_v39  ;;  %v757_v16 = vpop.f32.mrb[60].mxu1  ;;  %4497 = vmatprep.subr.bf16.mxu1 %v5117_v13 }
 0x1d6   :  { %v758_v18 = vadd.f32 %v757_v16, %v5868_v36  ;;  %v759_v57 = vpop.f32.mrb[61].mxu1 }
 0x1d7   :  { %v885_v9 = vmax.f32 %v754_v2, 0.0  ;;  %v760_v21 = vadd.f32 %v759_v57, %v5873_v39  ;;  %v761_v23 = vpop.f32.mrb[62].mxu1 }
 0x1d8   :  { %v888_v26 = vmax.f32 %v758_v18, 0.0  ;;  %v763_v31 = vpop.f32.mrb[63].mxu1  ;;  %4498 = vmatpush3.bf16.msra.mxu1 %v5118_v20  ;;  %v5134_v18 = vld [vmem:[#allocation6 + $0x34] ss:$8 sps:$4 sm:$0xff]  }
 0x1d9   :  { %v953_v17 = vpack.c.bf16 %v885_v9, %v881_v63  ;;  %v889_v32 = vmax.f32 %v760_v21, 0.0  ;;  %4499 = vmatprep.subr.bf16.mxu1 %v5119_v24  ;;  %v5131_v63 = vld [vmem:[#allocation6 + $0x24] ss:$8 sps:$4 sm:$0xff]  }
 0x1db   :  { %1580 = vmatmul.mubr.bf16.vlgmr.msra.gmra.mrb[64].mxu0 %v5884_v14  ;;  %v762_v14 = vadd.f32 %v761_v23, %v5868_v36  ;;  %v5125_v36 = vld [vmem:[#allocation6 + $0x4] ss:$8 sps:$4 sm:$0xff]  }
 0x1dc   :  { %1589 = vmatprep.mubr.bf16.mxu0 %v5898_v60  ;;  %v764_v60 = vadd.f32 %v763_v31, %v5873_v39  ;;  %4500 = vmatpush3.bf16.msra.mxu1 %v5120_v40  ;;  %v1022_v39 = vld [vmem:[%s6690_s4] sm:$0x3] }
 0x1dd   :  { %v892_v35 = vmax.f32 %v762_v14, 0.0  ;;  %4501 = vmatprep.subr.bf16.mxu1 %v5121_v43 }
 0x1de   :  { %v893_v42 = vmax.f32 %v764_v60, 0.0 }
 0x1df   :  { %v956_v44 = vpack.c.bf16 %v892_v35, %v888_v26  ;;  %v5132_v26 = vld [vmem:[#allocation6 + $0x30] ss:$8 sps:$4 sm:$0xff]  }
 0x1e0   :  { %v957_v45 = vpack.c.bf16 %v893_v42, %v889_v32  ;;  %4502 = vmatpush3.bf16.msra.mxu1 %v5122_v48  ;;  %v5137_v32 = vld [vmem:[#allocation6 + $0x44] ss:$8 sps:$4 sm:$0xff]  }
 0x1e1   :  { %2359 = vmatprep.subr.bf16.mxu1 %v5125_v36  ;;  %v5140_v36 = vld [vmem:[#allocation6 + $0x54] ss:$8 sps:$4 sm:$0xff]  }
 0x1e3   :  { %1590 = vmatmul.mubr.bf16.gmra.mrb[68].mxu0 %v5896_v50  ;;  %v6080_v50 = vrot.slane %v1022_v39, %v5840_v53 }
 0x1e4   :  { %1599 = vmatprep.mubr.bf16.mxu0 %v5910_v33 }
 0x1eb   :  { %1600 = vmatmul.mubr.bf16.gmra.mrb[72].mxu0 %v5908_v28  ;;  %v6083_v28 = vrot.slane %v1022_v39, %v5846_v55 }
 0x1ec   :  { %1609 = vmatprep.mubr.bf16.mxu0 %v5922_v11 }
 0x1f3   :  { %1610 = vmatmul.mubr.bf16.gmra.mrb[76].mxu0 %v5920_v6 }
 0x1f4   :  { %1619 = vmatprep.mubr.bf16.mxu0 %v5934_v58 }
 0x1fb   :  { %1620 = vmatmul.mubr.bf16.gmra.mrb[80].mxu0 %v5932_v46 }
 0x1fc   :  { %1629 = vmatprep.mubr.bf16.mxu0 %v5946_v34 }
 0x203   :  { %1630 = vmatmul.mubr.bf16.gmra.mrb[84].mxu0 %v5944_v29 }
 0x204   :  { %1639 = vmatprep.mubr.bf16.mxu0 %v5958_v12 }
 0x20b   :  { %1640 = vmatmul.mubr.bf16.gmra.mrb[88].mxu0 %v5956_v7 }
 0x20c   :  { %1649 = vmatprep.mubr.bf16.mxu0 %v5970_v54 }
 0x213   :  { %1650 = vmatmul.mubr.bf16.gmra.mrb[92].mxu0 %v5968_v47 }
 0x214   :  { %1659 = vmatprep.mubr.bf16.mxu0 %v5982_v37 }
 0x21b   :  { %1660 = vmatmul.mubr.bf16.gmra.mrb[96].mxu0 %v5980_v30 }
 0x21c   :  { %1669 = vmatprep.mubr.bf16.mxu0 %v5994_v22 }
 0x223   :  { %1670 = vmatmul.mubr.bf16.gmra.mrb[100].mxu0 %v5992_v15 }
 0x224   :  { %1679 = vmatprep.mubr.bf16.mxu0 %v6006_v10 }
 0x22b   :  { %1680 = vmatmul.mubr.bf16.gmra.mrb[104].mxu0 %v6004_v4  ;;  %v5123_v4 = vld [vmem:[#allocation6] ss:$8 sps:$4 sm:$0xff]  }
 0x22c   :  { %1689 = vmatprep.mubr.bf16.mxu0 %v6018_v5  ;;  %v5128_v5 = vld [vmem:[#allocation6 + $0x14] ss:$8 sps:$4 sm:$0xff]  }
 0x233   :  { %1690 = vmatmul.mubr.bf16.gmra.mrb[108].mxu0 %v6016_v61 }
 0x234   :  { %1699 = vmatprep.mubr.bf16.mxu0 %v6030_v1 }
 0x23b   :  { %1700 = vmatmul.mubr.bf16.gmra.mrb[112].mxu0 %v6028_v51 }
 0x23c   :  { %1709 = vmatprep.mubr.bf16.mxu0 %v6039_v41 }
 0x243   :  { %1710 = vmatmul.mubr.bf16.gmra.mrb[116].mxu0 %v6037_v38 }
 0x244   :  { %1719 = vmatprep.mubr.bf16.mxu0 %v953_v17 }
 0x24b   :  { %1720 = vmatmul.mubr.bf16.gmra.mrb[120].mxu0 %v952_v56  ;;  %v5129_v56 = vld [vmem:[#allocation6 + $0x20] ss:$8 sps:$4 sm:$0xff]  }
 0x24c   :  { %1729 = vmatprep.mubr.bf16.mxu0 %v957_v45 }
 0x253   :  { %1730 = vmatmul.mubr.bf16.gmra.mrb[124].mxu0 %v956_v44  ;;  %v5135_v44 = vld [vmem:[#allocation6 + $0x40] ss:$8 sps:$4 sm:$0xff]  }
 0x2ae   :  { %v1581_v33 = vpop.f32.mrb[64].mxu0 }
 0x2af   :  { %v4823_v6 = vadd.f32 %v1581_v33, %v6080_v50  ;;  %v1583_v11 = vpop.f32.mrb[65].mxu0 }
 0x2b0   :  { %v4824_v46 = vadd.f32 %v1583_v11, %v6083_v28  ;;  %v1585_v58 = vpop.f32.mrb[66].mxu0 }
 0x2b1   :  { %v4825_v29 = vadd.f32 %v1585_v58, %v6080_v50  ;;  %v1587_v34 = vpop.f32.mrb[67].mxu0  ;;  %v1740_v12 = vmax.f32 %v4823_v6, 0.0  ;;  %v5138_v58 = vld [vmem:[#allocation6 + $0x50] ss:$8 sps:$4 sm:$0xff]  }
 0x2b2   :  { %v4826_v7 = vadd.f32 %v1587_v34, %v6083_v28  ;;  %v1741_v54 = vmax.f32 %v4824_v46, 0.0 }
 0x2b3   :  { %v1742_v47 = vmax.f32 %v4825_v29, 0.0 }
 0x2b4   :  { %v1743_v30 = vmax.f32 %v4826_v7, 0.0  ;;  %v5143_v7 = vld [vmem:[#allocation6 + $0x64] ss:$8 sps:$4 sm:$0xff]  }
 0x2b5   :  { %v1804_v37 = vpack.c.bf16 %v1742_v47, %v1740_v12 }
 0x2b6   :  { %v1805_v15 = vpack.c.bf16 %v1743_v30, %v1741_v54  ;;  %v1591_v22 = vpop.f32.mrb[68].mxu0 }
 0x2b7   :  { %v4827_v10 = vadd.f32 %v1591_v22, %v6080_v50  ;;  %v1593_v61 = vpop.f32.mrb[69].mxu0 }
 0x2b8   :  { %v4828_v51 = vadd.f32 %v1593_v61, %v6083_v28  ;;  %v1595_v1 = vpop.f32.mrb[70].mxu0  ;;  %2003 = vmatprep.mubr.bf16.mxu1 %v1805_v15  ;;  %v5141_v15 = vld [vmem:[#allocation6 + $0x60] ss:$8 sps:$4 sm:$0xff]  }
 0x2b9   :  { %v4829_v38 = vadd.f32 %v1595_v1, %v6080_v50  ;;  %v1597_v41 = vpop.f32.mrb[71].mxu0  ;;  %2004 = vmatmul.mubr.bf16.vlgmr.msra.gmra.mrb[64].mxu1 %v1804_v37  ;;  %v1744_v62 = vmax.f32 %v4827_v10, 0.0 }
 0x2ba   :  { %v4830_v49 = vadd.f32 %v1597_v41, %v6083_v28  ;;  %2360 = vmatpush1.bf16.msra.mxu1 %v5123_v4  ;;  %v1745_v2 = vmax.f32 %v4828_v51, 0.0 }
 0x2bb   :  { %v1746_v19 = vmax.f32 %v4829_v38, 0.0  ;;  %2361 = vmatprep.subr.bf16.mxu1 %v5128_v5 }
 0x2bc   :  { %v1747_v3 = vmax.f32 %v4830_v49, 0.0 }
 0x2bd   :  { %v1806_v8 = vpack.c.bf16 %v1746_v19, %v1744_v62 }
 0x2be   :  { %v1807_v9 = vpack.c.bf16 %v1747_v3, %v1745_v2  ;;  %v1601_v13 = vpop.f32.mrb[72].mxu0  ;;  %2362 = vmatpush1.bf16.msra.mxu1 %v5126_v59 }
 0x2bf   :  { %v4831_v16 = vadd.f32 %v1601_v13, %v6080_v50  ;;  %v1603_v17 = vpop.f32.mrb[73].mxu0  ;;  %2363 = vmatprep.subr.bf16.mxu1 %v5131_v63 }
 0x2c0   :  { %v4832_v57 = vadd.f32 %v1603_v17, %v6083_v28  ;;  %v1605_v20 = vpop.f32.mrb[74].mxu0  ;;  %2011 = vmatprep.mubr.bf16.mxu1 %v1807_v9 }
 0x2c1   :  { %v4833_v21 = vadd.f32 %v1605_v20, %v6080_v50  ;;  %v1607_v23 = vpop.f32.mrb[75].mxu0  ;;  %2012 = vmatmul.mubr.bf16.gmra.mrb[68].mxu1 %v1806_v8  ;;  %v1748_v14 = vmax.f32 %v4831_v16, 0.0 }
 0x2c2   :  { %v4834_v24 = vadd.f32 %v1607_v23, %v6083_v28  ;;  %2364 = vmatpush1.bf16.msra.mxu1 %v5129_v56  ;;  %v1749_v60 = vmax.f32 %v4832_v57, 0.0 }
 0x2c3   :  { %v1750_v31 = vmax.f32 %v4833_v21, 0.0  ;;  %2365 = vmatprep.subr.bf16.mxu1 %v5134_v18 }
 0x2c4   :  { %v1751_v35 = vmax.f32 %v4834_v24, 0.0 }
 0x2c5   :  { %v1808_v40 = vpack.c.bf16 %v1750_v31, %v1748_v14 }
 0x2c6   :  { %v1809_v42 = vpack.c.bf16 %v1751_v35, %v1749_v60  ;;  %v1611_v43 = vpop.f32.mrb[76].mxu0  ;;  %2366 = vmatpush1.bf16.msra.mxu1 %v5132_v26 }
 0x2c7   :  { %v4835_v45 = vadd.f32 %v1611_v43, %v6080_v50  ;;  %v1613_v48 = vpop.f32.mrb[77].mxu0  ;;  %2367 = vmatprep.subr.bf16.mxu1 %v5137_v32 }
 0x2c8   :  { %v4836_v39 = vadd.f32 %v1613_v48, %v6083_v28  ;;  %v1615_v33 = vpop.f32.mrb[78].mxu0  ;;  %2019 = vmatprep.mubr.bf16.mxu1 %v1809_v42 }
 0x2c9   :  { %v4837_v6 = vadd.f32 %v1615_v33, %v6080_v50  ;;  %v1617_v11 = vpop.f32.mrb[79].mxu0  ;;  %2020 = vmatmul.mubr.bf16.gmra.mrb[72].mxu1 %v1808_v40  ;;  %v1752_v29 = vmax.f32 %v4835_v45, 0.0 }
 0x2ca   :  { %v4838_v46 = vadd.f32 %v1617_v11, %v6083_v28  ;;  %2368 = vmatpush1.bf16.msra.mxu1 %v5135_v44  ;;  %v1753_v12 = vmax.f32 %v4836_v39, 0.0 }
 0x2cb   :  { %v1754_v34 = vmax.f32 %v4837_v6, 0.0  ;;  %2369 = vmatprep.subr.bf16.mxu1 %v5140_v36 }
 0x2cc   :  { %v1755_v47 = vmax.f32 %v4838_v46, 0.0 }
 0x2cd   :  { %v1810_v54 = vpack.c.bf16 %v1754_v34, %v1752_v29 }
 0x2ce   :  { %v1811_v30 = vpack.c.bf16 %v1755_v47, %v1753_v12  ;;  %v1621_v37 = vpop.f32.mrb[80].mxu0  ;;  %2370 = vmatpush1.bf16.msra.mxu1 %v5138_v58 }
 0x2cf   :  { %v4839_v22 = vadd.f32 %v1621_v37, %v6080_v50  ;;  %v1623_v4 = vpop.f32.mrb[81].mxu0  ;;  %2371 = vmatprep.subr.bf16.mxu1 %v5143_v7 }
 0x2d0   :  { %v4840_v10 = vadd.f32 %v1623_v4, %v6083_v28  ;;  %v1625_v61 = vpop.f32.mrb[82].mxu0  ;;  %2027 = vmatprep.mubr.bf16.mxu1 %v1811_v30 }
 0x2d1   :  { %v4841_v5 = vadd.f32 %v1625_v61, %v6080_v50  ;;  %v1627_v51 = vpop.f32.mrb[83].mxu0  ;;  %2028 = vmatmul.mubr.bf16.gmra.mrb[76].mxu1 %v1810_v54  ;;  %v1756_v38 = vmax.f32 %v4839_v22, 0.0 }
 0x2d2   :  { %v4842_v1 = vadd.f32 %v1627_v51, %v6083_v28  ;;  %2372 = vmatpush1.bf16.msra.mxu1 %v5141_v15  ;;  %v1757_v49 = vmax.f32 %v4840_v10, 0.0 }
 0x2d3   :  { %v1758_v41 = vmax.f32 %v4841_v5, 0.0 }
 0x2d4   :  { %v1759_v59 = vmax.f32 %v4842_v1, 0.0 }
 0x2d5   :  { %v1812_v62 = vpack.c.bf16 %v1758_v41, %v1756_v38 }
 0x2d6   :  { %v1813_v19 = vpack.c.bf16 %v1759_v59, %v1757_v49  ;;  %v1631_v63 = vpop.f32.mrb[84].mxu0 }
 0x2d7   :  { %v4843_v2 = vadd.f32 %v1631_v63, %v6080_v50  ;;  %v1633_v3 = vpop.f32.mrb[85].mxu0 }
 0x2d8   :  { %v4844_v8 = vadd.f32 %v1633_v3, %v6083_v28  ;;  %v1635_v9 = vpop.f32.mrb[86].mxu0  ;;  %2035 = vmatprep.mubr.bf16.mxu1 %v1813_v19 }
 0x2d9   :  { %v4845_v13 = vadd.f32 %v1635_v9, %v6080_v50  ;;  %v1637_v56 = vpop.f32.mrb[87].mxu0  ;;  %2036 = vmatmul.mubr.bf16.gmra.mrb[80].mxu1 %v1812_v62  ;;  %v1760_v17 = vmax.f32 %v4843_v2, 0.0 }
 0x2da   :  { %v4846_v16 = vadd.f32 %v1637_v56, %v6083_v28  ;;  %v1761_v57 = vmax.f32 %v4844_v8, 0.0 }
 0x2db   :  { %v1762_v18 = vmax.f32 %v4845_v13, 0.0 }
 0x2dc   :  { %v1763_v20 = vmax.f32 %v4846_v16, 0.0 }
 0x2dd   :  { %v1814_v21 = vpack.c.bf16 %v1762_v18, %v1760_v17 }
 0x2de   :  { %v1815_v23 = vpack.c.bf16 %v1763_v20, %v1761_v57  ;;  %v1641_v24 = vpop.f32.mrb[88].mxu0 }
 0x2df   :  { %v4847_v26 = vadd.f32 %v1641_v24, %v6080_v50  ;;  %v1643_v14 = vpop.f32.mrb[89].mxu0 }
 0x2e0   :  { %v4848_v31 = vadd.f32 %v1643_v14, %v6083_v28  ;;  %v1645_v32 = vpop.f32.mrb[90].mxu0  ;;  %2043 = vmatprep.mubr.bf16.mxu1 %v1815_v23 }
 0x2e1   :  { %v4849_v60 = vadd.f32 %v1645_v32, %v6080_v50  ;;  %v1647_v35 = vpop.f32.mrb[91].mxu0  ;;  %2044 = vmatmul.mubr.bf16.gmra.mrb[84].mxu1 %v1814_v21  ;;  %v1764_v42 = vmax.f32 %v4847_v26, 0.0 }
 0x2e2   :  { %v4850_v40 = vadd.f32 %v1647_v35, %v6083_v28  ;;  %v1765_v44 = vmax.f32 %v4848_v31, 0.0 }
 0x2e3   :  { %v1766_v43 = vmax.f32 %v4849_v60, 0.0 }
 0x2e4   :  { %v1767_v45 = vmax.f32 %v4850_v40, 0.0 }
 0x2e5   :  { %v1816_v48 = vpack.c.bf16 %v1766_v43, %v1764_v42 }
 0x2e6   :  { %v1817_v36 = vpack.c.bf16 %v1767_v45, %v1765_v44  ;;  %v1651_v39 = vpop.f32.mrb[92].mxu0 }
 0x2e7   :  { %v4851_v33 = vadd.f32 %v1651_v39, %v6080_v50  ;;  %v1653_v6 = vpop.f32.mrb[93].mxu0 }
 0x2e8   :  { %v4852_v11 = vadd.f32 %v1653_v6, %v6083_v28  ;;  %v1655_v46 = vpop.f32.mrb[94].mxu0  ;;  %2051 = vmatprep.mubr.bf16.mxu1 %v1817_v36 }
 0x2e9   :  { %v4853_v58 = vadd.f32 %v1655_v46, %v6080_v50  ;;  %v1657_v29 = vpop.f32.mrb[95].mxu0  ;;  %2052 = vmatmul.mubr.bf16.gmra.mrb[88].mxu1 %v1816_v48  ;;  %v1768_v7 = vmax.f32 %v4851_v33, 0.0 }
 0x2ea   :  { %v4854_v34 = vadd.f32 %v1657_v29, %v6083_v28  ;;  %v1769_v47 = vmax.f32 %v4852_v11, 0.0 }
 0x2eb   :  { %v1770_v12 = vmax.f32 %v4853_v58, 0.0 }
 0x2ec   :  { %v1771_v54 = vmax.f32 %v4854_v34, 0.0 }
 0x2ed   :  { %v1818_v30 = vpack.c.bf16 %v1770_v12, %v1768_v7 }
 0x2ee   :  { %v1819_v37 = vpack.c.bf16 %v1771_v54, %v1769_v47  ;;  %v1661_v15 = vpop.f32.mrb[96].mxu0 }
 0x2ef   :  { %v4855_v22 = vadd.f32 %v1661_v15, %v6080_v50  ;;  %v1663_v4 = vpop.f32.mrb[97].mxu0 }
 0x2f0   :  { %v4856_v10 = vadd.f32 %v1663_v4, %v6083_v28  ;;  %v1665_v61 = vpop.f32.mrb[98].mxu0  ;;  %2059 = vmatprep.mubr.bf16.mxu1 %v1819_v37 }
 0x2f1   :  { %v4857_v5 = vadd.f32 %v1665_v61, %v6080_v50  ;;  %v1667_v51 = vpop.f32.mrb[99].mxu0  ;;  %2060 = vmatmul.mubr.bf16.gmra.mrb[92].mxu1 %v1818_v30  ;;  %v1772_v38 = vmax.f32 %v4855_v22, 0.0 }
 0x2f2   :  { %v4858_v1 = vadd.f32 %v1667_v51, %v6083_v28  ;;  %v1773_v49 = vmax.f32 %v4856_v10, 0.0 }
 0x2f3   :  { %v1774_v41 = vmax.f32 %v4857_v5, 0.0 }
 0x2f4   :  { %v1775_v59 = vmax.f32 %v4858_v1, 0.0 }
 0x2f5   :  { %v1820_v62 = vpack.c.bf16 %v1774_v41, %v1772_v38 }
 0x2f6   :  { %v1821_v19 = vpack.c.bf16 %v1775_v59, %v1773_v49  ;;  %v1671_v63 = vpop.f32.mrb[100].mxu0 }
 0x2f7   :  { %v4859_v2 = vadd.f32 %v1671_v63, %v6080_v50  ;;  %v1673_v3 = vpop.f32.mrb[101].mxu0 }
 0x2f8   :  { %v4860_v8 = vadd.f32 %v1673_v3, %v6083_v28  ;;  %v1675_v9 = vpop.f32.mrb[102].mxu0  ;;  %2067 = vmatprep.mubr.bf16.mxu1 %v1821_v19  ;;  %v5146_v19 = vld [vmem:[#allocation6 + $0x74] ss:$8 sps:$4 sm:$0xff]  }
 0x2f9   :  { %v4861_v13 = vadd.f32 %v1675_v9, %v6080_v50  ;;  %v1677_v56 = vpop.f32.mrb[103].mxu0  ;;  %2068 = vmatmul.mubr.bf16.gmra.mrb[96].mxu1 %v1820_v62  ;;  %v1776_v17 = vmax.f32 %v4859_v2, 0.0  ;;  %v5144_v62 = vld [vmem:[#allocation6 + $0x70] ss:$8 sps:$4 sm:$0xff]   ;;  %2373 = vmatprep.subr.bf16.mxu1 %v5146_v19 }
 0x2fa   :  { %v4862_v16 = vadd.f32 %v1677_v56, %v6083_v28  ;;  %v1777_v57 = vmax.f32 %v4860_v8, 0.0  ;;  %2374 = vmatpush1.bf16.msra.mxu1 %v5144_v62  ;;  %v5159_v62 = vld [vmem:[#allocation7 + $0x40] ss:$16 sps:$4 sm:$0xff]  }
 0x2fb   :  { %v1778_v18 = vmax.f32 %v4861_v13, 0.0 }
 0x2fc   :  { %v1779_v20 = vmax.f32 %v4862_v16, 0.0 }
 0x2fd   :  { %v1822_v21 = vpack.c.bf16 %v1778_v18, %v1776_v17 }
 0x2fe   :  { %v1823_v23 = vpack.c.bf16 %v1779_v20, %v1777_v57  ;;  %v1681_v24 = vpop.f32.mrb[104].mxu0 }
 0x2ff   :  { %v4863_v26 = vadd.f32 %v1681_v24, %v6080_v50  ;;  %v1683_v14 = vpop.f32.mrb[105].mxu0 }
 0x300   :  { %v4864_v31 = vadd.f32 %v1683_v14, %v6083_v28  ;;  %v1685_v32 = vpop.f32.mrb[106].mxu0  ;;  %2075 = vmatprep.mubr.bf16.mxu1 %v1823_v23 }
 0x301   :  { %v4865_v60 = vadd.f32 %v1685_v32, %v6080_v50  ;;  %v1687_v35 = vpop.f32.mrb[107].mxu0  ;;  %2076 = vmatmul.mubr.bf16.gmra.mrb[100].mxu1 %v1822_v21  ;;  %v1780_v42 = vmax.f32 %v4863_v26, 0.0 }
 0x302   :  { %v4866_v40 = vadd.f32 %v1687_v35, %v6083_v28  ;;  %v1781_v44 = vmax.f32 %v4864_v31, 0.0 }
 0x303   :  { %v1782_v43 = vmax.f32 %v4865_v60, 0.0 }
 0x304   :  { %v1783_v45 = vmax.f32 %v4866_v40, 0.0 }
 0x305   :  { %v1824_v48 = vpack.c.bf16 %v1782_v43, %v1780_v42 }
 0x306   :  { %v1825_v36 = vpack.c.bf16 %v1783_v45, %v1781_v44  ;;  %v1691_v39 = vpop.f32.mrb[108].mxu0 }
 0x307   :  { %v4867_v33 = vadd.f32 %v1691_v39, %v6080_v50  ;;  %v1693_v6 = vpop.f32.mrb[109].mxu0 }
 0x308   :  { %v4868_v11 = vadd.f32 %v1693_v6, %v6083_v28  ;;  %v1695_v46 = vpop.f32.mrb[110].mxu0  ;;  %2083 = vmatprep.mubr.bf16.mxu1 %v1825_v36 }
 0x309   :  { %v4869_v58 = vadd.f32 %v1695_v46, %v6080_v50  ;;  %v1697_v29 = vpop.f32.mrb[111].mxu0  ;;  %2084 = vmatmul.mubr.bf16.gmra.mrb[104].mxu1 %v1824_v48  ;;  %v1784_v7 = vmax.f32 %v4867_v33, 0.0 }
 0x30a   :  { %v4870_v34 = vadd.f32 %v1697_v29, %v6083_v28  ;;  %v1785_v47 = vmax.f32 %v4868_v11, 0.0 }
 0x30b   :  { %v1786_v12 = vmax.f32 %v4869_v58, 0.0 }
 0x30c   :  { %v1787_v54 = vmax.f32 %v4870_v34, 0.0 }
 0x30d   :  { %v1826_v30 = vpack.c.bf16 %v1786_v12, %v1784_v7 }
 0x30e   :  { %v1827_v37 = vpack.c.bf16 %v1787_v54, %v1785_v47  ;;  %v1701_v15 = vpop.f32.mrb[112].mxu0 }
 0x30f   :  { %v4871_v22 = vadd.f32 %v1701_v15, %v6080_v50  ;;  %v1703_v4 = vpop.f32.mrb[113].mxu0 }
 0x310   :  { %v4872_v10 = vadd.f32 %v1703_v4, %v6083_v28  ;;  %v1705_v61 = vpop.f32.mrb[114].mxu0  ;;  %2091 = vmatprep.mubr.bf16.mxu1 %v1827_v37  ;;  %v5147_v4 = vld [vmem:[#allocation7] ss:$16 sps:$4 sm:$0xff]  }
 0x311   :  { %v4873_v5 = vadd.f32 %v1705_v61, %v6080_v50  ;;  %v1707_v51 = vpop.f32.mrb[115].mxu0  ;;  %2092 = vmatmul.mubr.bf16.gmra.mrb[108].mxu1 %v1826_v30  ;;  %v1788_v38 = vmax.f32 %v4871_v22, 0.0  ;;  %v5152_v61 = vld [vmem:[#allocation7 + $0xc] ss:$16 sps:$4 sm:$0xff]  }
 0x312   :  { %v4874_v1 = vadd.f32 %v1707_v51, %v6083_v28  ;;  %v1789_v49 = vmax.f32 %v4872_v10, 0.0  ;;  %v5149_v10 = vld [vmem:[#allocation7 + $0x4] ss:$16 sps:$4 sm:$0xff]   ;;  %3247 = vmatprep.subr.bf16.mxu1 %v5152_v61 }
 0x313   :  { %v1790_v41 = vmax.f32 %v4873_v5, 0.0  ;;  %3054 = vmatprep.subr.bf16.mxu0 %v5149_v10  ;;  %v5153_v5 = vld [vmem:[#allocation7 + $0x20] ss:$16 sps:$4 sm:$0xff]   ;;  %v5155_v51 = vld [vmem:[#allocation7 + $0x24] ss:$16 sps:$4 sm:$0xff]  }
 0x314   :  { %v1791_v59 = vmax.f32 %v4874_v1, 0.0  ;;  %3055 = vmatpush1.bf16.msra.mxu0 %v5147_v4  ;;  %v5189_v4 = vld [vmem:[#allocation7 + $0xe0] ss:$16 sps:$4 sm:$0xff]  }
 0x315   :  { %v1828_v63 = vpack.c.bf16 %v1790_v41, %v1788_v38  ;;  %3056 = vmatprep.subr.bf16.mxu0 %v5155_v51 }
 0x316   :  { %v1829_v2 = vpack.c.bf16 %v1791_v59, %v1789_v49  ;;  %v1711_v3 = vpop.f32.mrb[116].mxu0  ;;  %v5161_v49 = vld [vmem:[#allocation7 + $0x44] ss:$16 sps:$4 sm:$0xff]  }
 0x317   :  { %v4875_v8 = vadd.f32 %v1711_v3, %v6080_v50  ;;  %v1713_v9 = vpop.f32.mrb[117].mxu0  ;;  %v5165_v3 = vld [vmem:[#allocation7 + $0x60] ss:$16 sps:$4 sm:$0xff]  }
 0x318   :  { %v4876_v13 = vadd.f32 %v1713_v9, %v6083_v28  ;;  %v1715_v56 = vpop.f32.mrb[118].mxu0  ;;  %2099 = vmatprep.mubr.bf16.mxu1 %v1829_v2  ;;  %3057 = vmatpush1.bf16.msra.mxu0 %v5153_v5 }
 0x319   :  { %v4877_v16 = vadd.f32 %v1715_v56, %v6080_v50  ;;  %v1717_v17 = vpop.f32.mrb[119].mxu0  ;;  %2100 = vmatmul.mubr.bf16.gmra.mrb[112].mxu1 %v1828_v63  ;;  %v1792_v57 = vmax.f32 %v4875_v8, 0.0  ;;  %3058 = vmatprep.subr.bf16.mxu0 %v5161_v49  ;;  %v5167_v8 = vld [vmem:[#allocation7 + $0x64] ss:$16 sps:$4 sm:$0xff]  }
 0x31a   :  { %v4878_v18 = vadd.f32 %v1717_v17, %v6083_v28  ;;  %v1793_v21 = vmax.f32 %v4876_v13, 0.0 }
 0x31b   :  { %v1794_v20 = vmax.f32 %v4877_v16, 0.0 }
 0x31c   :  { %v1795_v23 = vmax.f32 %v4878_v18, 0.0  ;;  %3059 = vmatpush1.bf16.msra.mxu0 %v5159_v62  ;;  %v5203_v62 = vld [vmem:[#allocation7 + $0x124] ss:$16 sps:$4 sm:$0xff]  }
 0x31d   :  { %v1830_v24 = vpack.c.bf16 %v1794_v20, %v1792_v57  ;;  %3060 = vmatprep.subr.bf16.mxu0 %v5167_v8 }
 0x31e   :  { %v1831_v26 = vpack.c.bf16 %v1795_v23, %v1793_v21  ;;  %v1721_v14 = vpop.f32.mrb[120].mxu0  ;;  %v6162_v21 = vld [vmem:[%s6699_s13] ss:$0 sm:$0xff] }
 0x31f   :  { %v4879_v31 = vadd.f32 %v1721_v14, %v6080_v50  ;;  %v1723_v32 = vpop.f32.mrb[121].mxu0  ;;  %v5171_v23 = vld [vmem:[#allocation7 + $0x80] ss:$16 sps:$4 sm:$0xff]  }
 0x320   :  { %v4880_v60 = vadd.f32 %v1723_v32, %v6083_v28  ;;  %v1725_v35 = vpop.f32.mrb[122].mxu0  ;;  %2107 = vmatprep.mubr.bf16.mxu1 %v1831_v26  ;;  %3061 = vmatpush1.bf16.msra.mxu0 %v5165_v3 }
 0x321   :  { %v4881_v40 = vadd.f32 %v1725_v35, %v6080_v50  ;;  %v1727_v42 = vpop.f32.mrb[123].mxu0  ;;  %2108 = vmatmul.mubr.bf16.gmra.mrb[116].mxu1 %v1830_v24  ;;  %v1796_v44 = vmax.f32 %v4879_v31, 0.0  ;;  %v5173_v24 = vld [vmem:[#allocation7 + $0x84] ss:$16 sps:$4 sm:$0xff]  }
 0x322   :  { %v4882_v43 = vadd.f32 %v1727_v42, %v6083_v28  ;;  %v1797_v48 = vmax.f32 %v4880_v60, 0.0  ;;  %3062 = vmatprep.subr.bf16.mxu0 %v5173_v24  ;;  %v5179_v60 = vld [vmem:[#allocation7 + $0xa4] ss:$16 sps:$4 sm:$0xff]  }
 0x323   :  { %v1798_v45 = vmax.f32 %v4881_v40, 0.0 }
 0x324   :  { %v1799_v36 = vmax.f32 %v4882_v43, 0.0  ;;  %3063 = vmatpush1.bf16.msra.mxu0 %v5171_v23  ;;  %v5177_v43 = vld [vmem:[#allocation7 + $0xa0] ss:$16 sps:$4 sm:$0xff]  }
 0x325   :  { %v1832_v39 = vpack.c.bf16 %v1798_v45, %v1796_v44  ;;  %3064 = vmatprep.subr.bf16.mxu0 %v5179_v60  ;;  %v5207_v60 = vld [vmem:[#allocation7 + $0x140] ss:$16 sps:$4 sm:$0xff]  }
 0x326   :  { %v1833_v33 = vpack.c.bf16 %v1799_v36, %v1797_v48  ;;  %v1731_v6 = vpop.f32.mrb[124].mxu0  ;;  %v5185_v48 = vld [vmem:[#allocation7 + $0xc4] ss:$16 sps:$4 sm:$0xff]  }
 0x327   :  { %v4883_v11 = vadd.f32 %v1731_v6, %v6080_v50  ;;  %v1733_v46 = vpop.f32.mrb[125].mxu0 }
 0x328   :  { %v4884_v58 = vadd.f32 %v1733_v46, %v6083_v28  ;;  %v1735_v29 = vpop.f32.mrb[126].mxu0  ;;  %2115 = vmatprep.mubr.bf16.mxu1 %v1833_v33  ;;  %v5150_v33 = vld [vmem:[#allocation7 + $0x8] ss:$16 sps:$4 sm:$0xff]   ;;  %3065 = vmatpush1.bf16.msra.mxu0 %v5177_v43 }
 0x329   :  { %v4885_v34 = vadd.f32 %v1735_v29, %v6080_v50  ;;  %v1737_v7 = vpop.f32.mrb[127].mxu0  ;;  %2116 = vmatmul.mubr.bf16.gmra.mrb[120].mxu1 %v1832_v39  ;;  %v1800_v47 = vmax.f32 %v4883_v11, 0.0  ;;  %v5158_v11 = vld [vmem:[#allocation7 + $0x2c] ss:$16 sps:$4 sm:$0xff]   ;;  %3066 = vmatprep.subr.bf16.mxu0 %v5185_v48  ;;  %v5191_v29 = vld [vmem:[#allocation7 + $0xe4] ss:$16 sps:$4 sm:$0xff]  }
 0x32a   :  { %v4886_v12 = vadd.f32 %v1737_v7, %v6083_v28  ;;  %v1801_v30 = vmax.f32 %v4884_v58, 0.0  ;;  %v6153_v28 = vld [vmem:[%s6692_s6] ss:$0 sm:$0xff]  ;;  %v5180_v43 = vld [vmem:[#allocation7 + $0xa8] ss:$16 sps:$4 sm:$0xff]  }
 0x32b   :  { %v1802_v54 = vmax.f32 %v4885_v34, 0.0  ;;  %v5183_v58 = vld [vmem:[#allocation7 + $0xc0] ss:$16 sps:$4 sm:$0xff]   ;;  %v5188_v48 = vld [vmem:[#allocation7 + $0xcc] ss:$16 sps:$4 sm:$0xff]  }
 0x32c   :  { %v1803_v37 = vmax.f32 %v4886_v12, 0.0  ;;  %v5156_v12 = vld [vmem:[#allocation7 + $0x28] ss:$16 sps:$4 sm:$0xff]   ;;  %3067 = vmatpush1.bf16.msra.mxu0 %v5183_v58  ;;  %v5221_v58 = vld [vmem:[#allocation7 + $0x184] ss:$16 sps:$4 sm:$0xff]  }
 0x32d   :  { %v1834_v15 = vpack.c.bf16 %v1802_v54, %v1800_v47  ;;  %3068 = vmatprep.subr.bf16.mxu0 %v5191_v29 }
 0x32e   :  { %v1835_v22 = vpack.c.bf16 %v1803_v37, %v1801_v30  ;;  %v5164_v30 = vld [vmem:[#allocation7 + $0x4c] ss:$16 sps:$4 sm:$0xff]  }
 0x330   :  { %2123 = vmatprep.mubr.bf16.mxu1 %v1835_v22  ;;  %3069 = vmatpush1.bf16.msra.mxu0 %v5189_v4  ;;  %v5192_v4 = vld [vmem:[#allocation7 + $0xe8] ss:$16 sps:$4 sm:$0xff]  }
 0x331   :  { %2124 = vmatmul.mubr.bf16.gmra.mrb[124].mxu1 %v1834_v15 }
 0x332   :  { %2391 = vmatprep.mubr.bf16.mxu1 %v5466_v0 }
 0x38c   :  { %v4503_v50 = vpop.f32.mrb[64].mxu1 }
 0x38d   :  { %v4504_v1 = vpop.f32.mrb[65].mxu1 }
 0x38e   :  { %v4505_v38 = vadd.f32 %v4504_v1, %v4503_v50  ;;  %v4506_v41 = vpop.f32.mrb[66].mxu1  ;;  %v5197_v50 = vld [vmem:[#allocation7 + $0x104] ss:$16 sps:$4 sm:$0xff]   ;;  %v5162_v1 = vld [vmem:[#allocation7 + $0x48] ss:$16 sps:$4 sm:$0xff]  }
 0x38f   :  { %v4507_v59 = vpop.f32.mrb[67].mxu1  ;;  %3070 = vmatprep.subr.bf16.mxu0 %v5197_v50  ;;  %v5200_v50 = vld [vmem:[#allocation7 + $0x10c] ss:$16 sps:$4 sm:$0xff]  }
 0x390   :  { %v2006_v19 = vadd.f32 %v4505_v38, %v6153_v28  ;;  %v4508_v63 = vadd.f32 %v4507_v59, %v4506_v41  ;;  %v5170_v41 = vld [vmem:[#allocation7 + $0x6c] ss:$16 sps:$4 sm:$0xff]   ;;  %v5195_v59 = vld [vmem:[#allocation7 + $0x100] ss:$16 sps:$4 sm:$0xff]  }
 0x391   :  { %3071 = vmatpush1.bf16.msra.mxu0 %v5195_v59  ;;  %v5233_v59 = vld [vmem:[#allocation7 + $0x1c4] ss:$16 sps:$4 sm:$0xff]  }
 0x392   :  { %5275 = vtanh.f32 %v2006_v19  ;;  %v2009_v2 = vadd.f32 %v4508_v63, %v6153_v28  ;;  %3072 = vmatprep.subr.bf16.mxu0 %v5203_v62 }
 0x394   :  { %5277 = vtanh.f32 %v2009_v2  ;;  %v4509_v9 = vpop.f32.mrb[68].mxu1  ;;  %v5168_v2 = vld [vmem:[#allocation7 + $0x68] ss:$16 sps:$4 sm:$0xff]  }
 0x395   :  { %v4510_v13 = vpop.f32.mrb[69].mxu1 }
 0x396   :  { %v4511_v56 = vadd.f32 %v4510_v13, %v4509_v9  ;;  %v4512_v16 = vpop.f32.mrb[70].mxu1  ;;  %v5176_v9 = vld [vmem:[#allocation7 + $0x8c] ss:$16 sps:$4 sm:$0xff]  }
 0x397   :  { %v4513_v17 = vpop.f32.mrb[71].mxu1 }
 0x398   :  { %v2014_v18 = vadd.f32 %v4511_v56, %v6153_v28  ;;  %v4514_v57 = vadd.f32 %v4513_v17, %v4512_v16  ;;  %v5201_v17 = vld [vmem:[#allocation7 + $0x120] ss:$16 sps:$4 sm:$0xff]  }
 0x399   :  { %3073 = vmatpush1.bf16.msra.mxu0 %v5201_v17 }
 0x39a   :  { %5279 = vtanh.f32 %v2014_v18  ;;  %v2017_v20 = vadd.f32 %v4514_v57, %v6153_v28 }
 0x39c   :  { %v5276_v26 = vpop.eup %5275  ;;  %5281 = vtanh.f32 %v2017_v20  ;;  %v4515_v14 = vpop.f32.mrb[72].mxu1  ;;  %v5209_v20 = vld [vmem:[#allocation7 + $0x144] ss:$16 sps:$4 sm:$0xff]  }
 0x39d   :  { %v4516_v31 = vpop.f32.mrb[73].mxu1  ;;  %v2171_v32 = vadd.f32 %v5276_v26, %v6162_v21  ;;  %v5174_v26 = vld [vmem:[#allocation7 + $0x88] ss:$16 sps:$4 sm:$0xff]   ;;  %3074 = vmatprep.subr.bf16.mxu0 %v5209_v20 }
 0x39e   :  { %v5278_v35 = vpop.eup %5277  ;;  %v4517_v40 = vadd.f32 %v4516_v31, %v4515_v14  ;;  %v4518_v42 = vpop.f32.mrb[74].mxu1  ;;  %v5182_v31 = vld [vmem:[#allocation7 + $0xac] ss:$16 sps:$4 sm:$0xff]   ;;  %3075 = vmatpush1.bf16.msra.mxu0 %v5207_v60  ;;  %v5210_v60 = vld [vmem:[#allocation7 + $0x148] ss:$16 sps:$4 sm:$0xff]  }
 0x39f   :  { %v4519_v44 = vpop.f32.mrb[75].mxu1  ;;  %v2172_v45 = vadd.f32 %v5278_v35, %v6162_v21  ;;  %2203 = vst [vmem:[%s6701_s15] sm:$0xff] %v2171_v32  ;;  %v5215_v35 = vld [vmem:[#allocation7 + $0x164] ss:$16 sps:$4 sm:$0xff]  }
 0x3a0   :  { %v2022_v36 = vadd.f32 %v4517_v40, %v6153_v28  ;;  %v4520_v39 = vadd.f32 %v4519_v44, %v4518_v42  ;;  %3076 = vmatprep.subr.bf16.mxu0 %v5215_v35 }
 0x3a1   :  { %2204 = vst [vmem:[%s6701_s15 + $0x8] sm:$0xff] %v2172_v45  ;;  %v2235_v6 = vpack.c.bf16 %v2172_v45, %v2171_v32 }
 0x3a2   :  { %5283 = vtanh.f32 %v2022_v36  ;;  %v2025_v46 = vadd.f32 %v4520_v39, %v6153_v28 }
 0x3a3   :  { %2392 = vmatmul.mubr.bf16.vlgmr.msra.gmra.mrb[128].mxu1 %v2235_v6  ;;  %v5213_v6 = vld [vmem:[#allocation7 + $0x160] ss:$16 sps:$4 sm:$0xff]  }
 0x3a4   :  { %v5280_v34 = vpop.eup %5279  ;;  %5285 = vtanh.f32 %v2025_v46  ;;  %v4521_v7 = vpop.f32.mrb[76].mxu1  ;;  %2401 = vmatprep.mubr.bf16.mxu1 %v5466_v0  ;;  %3248 = vmatpush1.bf16.msra.mxu1 %v5150_v33 }
 0x3a5   :  { %v4522_v47 = vpop.f32.mrb[77].mxu1  ;;  %v2173_v54 = vadd.f32 %v5280_v34, %v6162_v21  ;;  %3249 = vmatprep.subr.bf16.mxu1 %v5158_v11  ;;  %3077 = vmatpush1.bf16.msra.mxu0 %v5213_v6 }
 0x3a6   :  { %v5282_v37 = vpop.eup %5281  ;;  %v4523_v15 = vadd.f32 %v4522_v47, %v4521_v7  ;;  %v4524_v22 = vpop.f32.mrb[78].mxu1  ;;  %v5186_v7 = vld [vmem:[#allocation7 + $0xc8] ss:$16 sps:$4 sm:$0xff]   ;;  %v5194_v47 = vld [vmem:[#allocation7 + $0xec] ss:$16 sps:$4 sm:$0xff]   ;;  %3078 = vmatprep.subr.bf16.mxu0 %v5221_v58 }
 0x3a7   :  { %v4525_v10 = vpop.f32.mrb[79].mxu1  ;;  %v2174_v61 = vadd.f32 %v5282_v37, %v6162_v21  ;;  %2205 = vst [vmem:[%s6701_s15 + $0x10] sm:$0xff] %v2173_v54  ;;  %v5227_v37 = vld [vmem:[#allocation7 + $0x1a4] ss:$16 sps:$4 sm:$0xff]  }
 0x3a8   :  { %v2030_v5 = vadd.f32 %v4523_v15, %v6153_v28  ;;  %v4526_v51 = vadd.f32 %v4525_v10, %v4524_v22  ;;  %3250 = vmatpush1.bf16.msra.mxu1 %v5156_v12 }
 0x3a9   :  { %2206 = vst [vmem:[%s6701_s15 + $0x18] sm:$0xff] %v2174_v61  ;;  %v2236_v38 = vpack.c.bf16 %v2174_v61, %v2173_v54  ;;  %3251 = vmatprep.subr.bf16.mxu1 %v5164_v30  ;;  %v5219_v30 = vld [vmem:[#allocation7 + $0x180] ss:$16 sps:$4 sm:$0xff]  }
 0x3aa   :  { %5287 = vtanh.f32 %v2030_v5  ;;  %v2033_v49 = vadd.f32 %v4526_v51, %v6153_v28  ;;  %3079 = vmatpush1.bf16.msra.mxu0 %v5219_v30 }
 0x3ab   :  { %2402 = vmatmul.mubr.bf16.gmra.mrb[132].mxu1 %v2236_v38  ;;  %v5225_v38 = vld [vmem:[#allocation7 + $0x1a0] ss:$16 sps:$4 sm:$0xff]   ;;  %3080 = vmatprep.subr.bf16.mxu0 %v5227_v37 }
 0x3ac   :  { %v5284_v19 = vpop.eup %5283  ;;  %5289 = vtanh.f32 %v2033_v49  ;;  %v4527_v63 = vpop.f32.mrb[80].mxu1  ;;  %2411 = vmatprep.mubr.bf16.mxu1 %v5466_v0  ;;  %3252 = vmatpush1.bf16.msra.mxu1 %v5162_v1 }
 0x3ad   :  { %v4528_v3 = vpop.f32.mrb[81].mxu1  ;;  %v2175_v8 = vadd.f32 %v5284_v19, %v6162_v21  ;;  %3253 = vmatprep.subr.bf16.mxu1 %v5170_v41 }
 0x3ae   :  { %v5286_v13 = vpop.eup %5285  ;;  %v4529_v56 = vadd.f32 %v4528_v3, %v4527_v63  ;;  %v4530_v16 = vpop.f32.mrb[82].mxu1  ;;  %v5198_v63 = vld [vmem:[#allocation7 + $0x108] ss:$16 sps:$4 sm:$0xff]   ;;  %v5206_v3 = vld [vmem:[#allocation7 + $0x12c] ss:$16 sps:$4 sm:$0xff]   ;;  %3081 = vmatpush1.bf16.msra.mxu0 %v5225_v38 }
 0x3af   :  { %v4531_v18 = vpop.f32.mrb[83].mxu1  ;;  %v2176_v57 = vadd.f32 %v5286_v13, %v6162_v21  ;;  %2207 = vst [vmem:[%s6701_s15 + $0x20] sm:$0xff] %v2175_v8  ;;  %3082 = vmatprep.subr.bf16.mxu0 %v5233_v59 }
 0x3b0   :  { %v2038_v23 = vadd.f32 %v4529_v56, %v6153_v28  ;;  %v4532_v24 = vadd.f32 %v4531_v18, %v4530_v16  ;;  %3254 = vmatpush1.bf16.msra.mxu1 %v5168_v2  ;;  %v5204_v16 = vld [vmem:[#allocation7 + $0x128] ss:$16 sps:$4 sm:$0xff]  }
 0x3b1   :  { %2208 = vst [vmem:[%s6701_s15 + $0x28] sm:$0xff] %v2176_v57  ;;  %v2237_v14 = vpack.c.bf16 %v2176_v57, %v2175_v8  ;;  %3255 = vmatprep.subr.bf16.mxu1 %v5176_v9  ;;  %v5231_v9 = vld [vmem:[#allocation7 + $0x1c0] ss:$16 sps:$4 sm:$0xff]   ;;  %v5212_v57 = vld [vmem:[#allocation7 + $0x14c] ss:$16 sps:$4 sm:$0xff]  }
 0x3b2   :  { %5291 = vtanh.f32 %v2038_v23  ;;  %v2041_v32 = vadd.f32 %v4532_v24, %v6153_v28  ;;  %3083 = vmatpush1.bf16.msra.mxu0 %v5231_v9 }
 0x3b3   :  { %2412 = vmatmul.mubr.bf16.gmra.mrb[136].mxu1 %v2237_v14 }
 0x3b4   :  { %v5288_v40 = vpop.eup %5287  ;;  %5293 = vtanh.f32 %v2041_v32  ;;  %v4533_v42 = vpop.f32.mrb[84].mxu1  ;;  %2421 = vmatprep.mubr.bf16.mxu1 %v5466_v0  ;;  %3256 = vmatpush1.bf16.msra.mxu1 %v5174_v26 }
 0x3b5   :  { %v4534_v44 = vpop.f32.mrb[85].mxu1  ;;  %v2177_v45 = vadd.f32 %v5288_v40, %v6162_v21  ;;  %3257 = vmatprep.subr.bf16.mxu1 %v5182_v31  ;;  %v5218_v40 = vld [vmem:[#allocation7 + $0x16c] ss:$16 sps:$4 sm:$0xff]  }
 0x3b6   :  { %v5290_v36 = vpop.eup %5289  ;;  %v4535_v39 = vadd.f32 %v4534_v44, %v4533_v42  ;;  %v4536_v33 = vpop.f32.mrb[86].mxu1 }
 0x3b7   :  { %v4537_v11 = vpop.f32.mrb[87].mxu1  ;;  %v2178_v46 = vadd.f32 %v5290_v36, %v6162_v21  ;;  %2209 = vst [vmem:[%s6701_s15 + $0x30] sm:$0xff] %v2177_v45 }
 0x3b8   :  { %v2046_v29 = vadd.f32 %v4535_v39, %v6153_v28  ;;  %v4538_v34 = vadd.f32 %v4537_v11, %v4536_v33  ;;  %3258 = vmatpush1.bf16.msra.mxu1 %v5180_v43  ;;  %v5224_v39 = vld [vmem:[#allocation7 + $0x18c] ss:$16 sps:$4 sm:$0xff]  }
 0x3b9   :  { %2210 = vst [vmem:[%s6701_s15 + $0x38] sm:$0xff] %v2178_v46  ;;  %v2238_v12 = vpack.c.bf16 %v2178_v46, %v2177_v45  ;;  %3259 = vmatprep.subr.bf16.mxu1 %v5188_v48  ;;  %v5216_v45 = vld [vmem:[#allocation7 + $0x168] ss:$16 sps:$4 sm:$0xff]  }
 0x3ba   :  { %5295 = vtanh.f32 %v2046_v29  ;;  %v2049_v54 = vadd.f32 %v4538_v34, %v6153_v28 }
 0x3bb   :  { %2422 = vmatmul.mubr.bf16.gmra.mrb[140].mxu1 %v2238_v12 }
 0x3bc   :  { %v5292_v15 = vpop.eup %5291  ;;  %5297 = vtanh.f32 %v2049_v54  ;;  %v4539_v22 = vpop.f32.mrb[88].mxu1  ;;  %2431 = vmatprep.mubr.bf16.mxu1 %v5466_v0  ;;  %3260 = vmatpush1.bf16.msra.mxu1 %v5186_v7  ;;  %v5222_v7 = vld [vmem:[#allocation7 + $0x188] ss:$16 sps:$4 sm:$0xff]  }
 0x3bd   :  { %v4540_v10 = vpop.f32.mrb[89].mxu1  ;;  %v2179_v61 = vadd.f32 %v5292_v15, %v6162_v21  ;;  %3261 = vmatprep.subr.bf16.mxu1 %v5194_v47  ;;  %v5230_v47 = vld [vmem:[#allocation7 + $0x1ac] ss:$16 sps:$4 sm:$0xff]   ;;  %v5228_v15 = vld [vmem:[#allocation7 + $0x1a8] ss:$16 sps:$4 sm:$0xff]  }
 0x3be   :  { %v5294_v5 = vpop.eup %5293  ;;  %v4541_v51 = vadd.f32 %v4540_v10, %v4539_v22  ;;  %v4542_v1 = vpop.f32.mrb[90].mxu1  ;;  %v5236_v10 = vld [vmem:[#allocation7 + $0x1cc] ss:$16 sps:$4 sm:$0xff]  }
 0x3bf   :  { %v4543_v41 = vpop.f32.mrb[91].mxu1  ;;  %v2180_v49 = vadd.f32 %v5294_v5, %v6162_v21  ;;  %2211 = vst [vmem:[%s6701_s15 + $0x40] sm:$0xff] %v2179_v61 }
 0x3c0   :  { %v2054_v62 = vadd.f32 %v4541_v51, %v6153_v28  ;;  %v4544_v19 = vadd.f32 %v4543_v41, %v4542_v1  ;;  %3262 = vmatpush1.bf16.msra.mxu1 %v5192_v4 }
 0x3c1   :  { %2212 = vst [vmem:[%s6701_s15 + $0x48] sm:$0xff] %v2180_v49  ;;  %v2239_v2 = vpack.c.bf16 %v2180_v49, %v2179_v61  ;;  %3263 = vmatprep.subr.bf16.mxu1 %v5200_v50  ;;  %v5234_v49 = vld [vmem:[#allocation7 + $0x1c8] ss:$16 sps:$4 sm:$0xff]  }
 0x3c2   :  { %5299 = vtanh.f32 %v2054_v62  ;;  %v2057_v8 = vadd.f32 %v4544_v19, %v6153_v28 }
 0x3c3   :  { %2432 = vmatmul.mubr.bf16.gmra.mrb[144].mxu1 %v2239_v2 }
 0x3c4   :  { %v5296_v13 = vpop.eup %5295  ;;  %5301 = vtanh.f32 %v2057_v8  ;;  %v4545_v56 = vpop.f32.mrb[92].mxu1  ;;  %2441 = vmatprep.mubr.bf16.mxu1 %v5466_v0  ;;  %3264 = vmatpush1.bf16.msra.mxu1 %v5198_v63 }
 0x3c5   :  { %v4546_v17 = vpop.f32.mrb[93].mxu1  ;;  %v2181_v18 = vadd.f32 %v5296_v13, %v6162_v21  ;;  %3265 = vmatprep.subr.bf16.mxu1 %v5206_v3 }
 0x3c6   :  { %v5298_v20 = vpop.eup %5297  ;;  %v4547_v23 = vadd.f32 %v4546_v17, %v4545_v56  ;;  %v4548_v24 = vpop.f32.mrb[94].mxu1 }
 0x3c7   :  { %v4549_v26 = vpop.f32.mrb[95].mxu1  ;;  %v2182_v14 = vadd.f32 %v5298_v20, %v6162_v21  ;;  %2213 = vst [vmem:[%s6701_s15 + $0x50] sm:$0xff] %v2181_v18 }
 0x3c8   :  { %v2062_v31 = vadd.f32 %v4547_v23, %v6153_v28  ;;  %v4550_v32 = vadd.f32 %v4549_v26, %v4548_v24  ;;  %3266 = vmatpush1.bf16.msra.mxu1 %v5204_v16 }
 0x3c9   :  { %2214 = vst [vmem:[%s6701_s15 + $0x58] sm:$0xff] %v2182_v14  ;;  %v2240_v35 = vpack.c.bf16 %v2182_v14, %v2181_v18  ;;  %3267 = vmatprep.subr.bf16.mxu1 %v5212_v57 }
 0x3ca   :  { %5303 = vtanh.f32 %v2062_v31  ;;  %v2065_v42 = vadd.f32 %v4550_v32, %v6153_v28 }
 0x3cb   :  { %2442 = vmatmul.mubr.bf16.gmra.mrb[148].mxu1 %v2240_v35 }
 0x3cc   :  { %v5300_v43 = vpop.eup %5299  ;;  %5305 = vtanh.f32 %v2065_v42  ;;  %v4551_v44 = vpop.f32.mrb[96].mxu1  ;;  %2451 = vmatprep.mubr.bf16.mxu1 %v5466_v0  ;;  %3268 = vmatpush1.bf16.msra.mxu1 %v5210_v60 }
 0x3cd   :  { %v4552_v48 = vpop.f32.mrb[97].mxu1  ;;  %v2183_v36 = vadd.f32 %v5300_v43, %v6162_v21  ;;  %3269 = vmatprep.subr.bf16.mxu1 %v5218_v40 }
 0x3ce   :  { %v5302_v33 = vpop.eup %5301  ;;  %v4553_v6 = vadd.f32 %v4552_v48, %v4551_v44  ;;  %v4554_v11 = vpop.f32.mrb[98].mxu1 }
 0x3cf   :  { %v4555_v46 = vpop.f32.mrb[99].mxu1  ;;  %v2184_v58 = vadd.f32 %v5302_v33, %v6162_v21  ;;  %2215 = vst [vmem:[%s6701_s15 + $0x60] sm:$0xff] %v2183_v36 }
 0x3d0   :  { %v2070_v29 = vadd.f32 %v4553_v6, %v6153_v28  ;;  %v4556_v34 = vadd.f32 %v4555_v46, %v4554_v11  ;;  %3270 = vmatpush1.bf16.msra.mxu1 %v5216_v45 }
 0x3d1   :  { %2216 = vst [vmem:[%s6701_s15 + $0x68] sm:$0xff] %v2184_v58  ;;  %v2241_v12 = vpack.c.bf16 %v2184_v58, %v2183_v36  ;;  %3271 = vmatprep.subr.bf16.mxu1 %v5224_v39 }
 0x3d2   :  { %5307 = vtanh.f32 %v2070_v29  ;;  %v2073_v54 = vadd.f32 %v4556_v34, %v6153_v28 }
 0x3d3   :  { %2452 = vmatmul.mubr.bf16.gmra.mrb[152].mxu1 %v2241_v12 }
 0x3d4   :  { %v5304_v30 = vpop.eup %5303  ;;  %5309 = vtanh.f32 %v2073_v54  ;;  %v4557_v37 = vpop.f32.mrb[100].mxu1  ;;  %2461 = vmatprep.mubr.bf16.mxu1 %v5466_v0  ;;  %3272 = vmatpush1.bf16.msra.mxu1 %v5222_v7 }
 0x3d5   :  { %v4558_v22 = vpop.f32.mrb[101].mxu1  ;;  %v2185_v4 = vadd.f32 %v5304_v30, %v6162_v21  ;;  %3273 = vmatprep.subr.bf16.mxu1 %v5230_v47 }
 0x3d6   :  { %v5306_v61 = vpop.eup %5305  ;;  %v4559_v50 = vadd.f32 %v4558_v22, %v4557_v37  ;;  %v4560_v5 = vpop.f32.mrb[102].mxu1 }
 0x3d7   :  { %v4561_v51 = vpop.f32.mrb[103].mxu1  ;;  %v2186_v1 = vadd.f32 %v5306_v61, %v6162_v21  ;;  %2217 = vst [vmem:[%s6701_s15 + $0x70] sm:$0xff] %v2185_v4 }
 0x3d8   :  { %v2078_v38 = vadd.f32 %v4559_v50, %v6153_v28  ;;  %v4562_v41 = vadd.f32 %v4561_v51, %v4560_v5  ;;  %3274 = vmatpush1.bf16.msra.mxu1 %v5228_v15 }
 0x3d9   :  { %2218 = vst [vmem:[%s6701_s15 + $0x78] sm:$0xff] %v2186_v1  ;;  %v2242_v59 = vpack.c.bf16 %v2186_v1, %v2185_v4  ;;  %3275 = vmatprep.subr.bf16.mxu1 %v5236_v10 }
 0x3da   :  { %5311 = vtanh.f32 %v2078_v38  ;;  %v2081_v62 = vadd.f32 %v4562_v41, %v6153_v28  ;;  %v5239_v41 = vld [vmem:[#allocation7 + $0x1e4] ss:$16 sps:$4 sm:$0xff]  }
 0x3db   :  { %2462 = vmatmul.mubr.bf16.gmra.mrb[156].mxu1 %v2242_v59  ;;  %3084 = vmatprep.subr.bf16.mxu0 %v5239_v41 }
 0x3dc   :  { %v5308_v19 = vpop.eup %5307  ;;  %5313 = vtanh.f32 %v2081_v62  ;;  %v4563_v63 = vpop.f32.mrb[104].mxu1  ;;  %2471 = vmatprep.mubr.bf16.mxu1 %v5466_v0  ;;  %3276 = vmatpush1.bf16.msra.mxu1 %v5234_v49  ;;  %v5242_v49 = vld [vmem:[#allocation7 + $0x1ec] ss:$16 sps:$4 sm:$0xff]  }
 0x3dd   :  { %v4564_v2 = vpop.f32.mrb[105].mxu1  ;;  %v2187_v3 = vadd.f32 %v5308_v19, %v6162_v21  ;;  %v5237_v19 = vld [vmem:[#allocation7 + $0x1e0] ss:$16 sps:$4 sm:$0xff]   ;;  %3277 = vmatprep.subr.bf16.mxu1 %v5242_v49 }
 0x3de   :  { %v5310_v8 = vpop.eup %5309  ;;  %v4565_v9 = vadd.f32 %v4564_v2, %v4563_v63  ;;  %v4566_v13 = vpop.f32.mrb[106].mxu1  ;;  %v5240_v63 = vld [vmem:[#allocation7 + $0x1e8] ss:$16 sps:$4 sm:$0xff]   ;;  %3085 = vmatpush1.bf16.msra.mxu0 %v5237_v19  ;;  %v5244_v49 = vld [vmem:[#allocation9] sm:$0xff]  }
 0x3df   :  { %v4567_v56 = vpop.f32.mrb[107].mxu1  ;;  %v2188_v16 = vadd.f32 %v5310_v8, %v6162_v21  ;;  %2219 = vst [vmem:[%s6701_s15 + $0x80] sm:$0xff] %v2187_v3 }
 0x3e0   :  { %v2086_v17 = vadd.f32 %v4565_v9, %v6153_v28  ;;  %v4568_v18 = vadd.f32 %v4567_v56, %v4566_v13  ;;  %3278 = vmatpush1.bf16.msra.mxu1 %v5240_v63  ;;  %v5247_v63 = vld [vmem:[#allocation9 + $0x48] sm:$0xff]  }
 0x3e1   :  { %2220 = vst [vmem:[%s6701_s15 + $0x88] sm:$0xff] %v2188_v16  ;;  %v2243_v57 = vpack.c.bf16 %v2188_v16, %v2187_v3 }
 0x3e2   :  { %5315 = vtanh.f32 %v2086_v17  ;;  %v2089_v20 = vadd.f32 %v4568_v18, %v6153_v28 }
 0x3e3   :  { %2472 = vmatmul.mubr.bf16.gmra.mrb[160].mxu1 %v2243_v57 }
 0x3e4   :  { %v5312_v23 = vpop.eup %5311  ;;  %5317 = vtanh.f32 %v2089_v20  ;;  %v4569_v24 = vpop.f32.mrb[108].mxu1  ;;  %2481 = vmatprep.mubr.bf16.mxu1 %v5466_v0 }
 0x3e5   :  { %v4570_v26 = vpop.f32.mrb[109].mxu1  ;;  %v2189_v14 = vadd.f32 %v5312_v23, %v6162_v21 }
 0x3e6   :  { %v5314_v31 = vpop.eup %5313  ;;  %v4571_v32 = vadd.f32 %v4570_v26, %v4569_v24  ;;  %v4572_v60 = vpop.f32.mrb[110].mxu1 }
 0x3e7   :  { %v4573_v35 = vpop.f32.mrb[111].mxu1  ;;  %v2190_v40 = vadd.f32 %v5314_v31, %v6162_v21  ;;  %2221 = vst [vmem:[%s6701_s15 + $0x90] sm:$0xff] %v2189_v14 }
 0x3e8   :  { %v2094_v42 = vadd.f32 %v4571_v32, %v6153_v28  ;;  %v4574_v43 = vadd.f32 %v4573_v35, %v4572_v60 }
 0x3e9   :  { %2222 = vst [vmem:[%s6701_s15 + $0x98] sm:$0xff] %v2190_v40  ;;  %v2244_v44 = vpack.c.bf16 %v2190_v40, %v2189_v14 }
 0x3ea   :  { %5319 = vtanh.f32 %v2094_v42  ;;  %v2097_v45 = vadd.f32 %v4574_v43, %v6153_v28 }
 0x3eb   :  { %2482 = vmatmul.mubr.bf16.gmra.mrb[164].mxu1 %v2244_v44 }
 0x3ec   :  { %v5316_v48 = vpop.eup %5315  ;;  %5321 = vtanh.f32 %v2097_v45  ;;  %v4575_v36 = vpop.f32.mrb[112].mxu1  ;;  %2491 = vmatprep.mubr.bf16.mxu1 %v5466_v0 }
 0x3ed   :  { %v4576_v39 = vpop.f32.mrb[113].mxu1  ;;  %v2191_v33 = vadd.f32 %v5316_v48, %v6162_v21 }
 0x3ee   :  { %v5318_v6 = vpop.eup %5317  ;;  %v4577_v11 = vadd.f32 %v4576_v39, %v4575_v36  ;;  %v4578_v46 = vpop.f32.mrb[114].mxu1 }
 0x3ef   :  { %v4579_v58 = vpop.f32.mrb[115].mxu1  ;;  %v2192_v29 = vadd.f32 %v5318_v6, %v6162_v21  ;;  %2223 = vst [vmem:[%s6701_s15 + $0xa0] sm:$0xff] %v2191_v33 }
 0x3f0   :  { %v2102_v34 = vadd.f32 %v4577_v11, %v6153_v28  ;;  %v4580_v7 = vadd.f32 %v4579_v58, %v4578_v46 }
 0x3f1   :  { %2224 = vst [vmem:[%s6701_s15 + $0xa8] sm:$0xff] %v2192_v29  ;;  %v2245_v12 = vpack.c.bf16 %v2192_v29, %v2191_v33 }
 0x3f2   :  { %5323 = vtanh.f32 %v2102_v34  ;;  %v2105_v47 = vadd.f32 %v4580_v7, %v6153_v28  ;;  %v5243_v34 = vld [vmem:[#allocation9 + $0x40] sm:$0xff]  }
 0x3f3   :  { %2492 = vmatmul.mubr.bf16.gmra.mrb[168].mxu1 %v2245_v12  ;;  %4599 = vmatprep.subr.bf16.mxu0 %v5243_v34  ;;  %v5245_v7 = vld [vmem:[#allocation9 + $0xc0] sm:$0xff]  }
 0x3f4   :  { %v5320_v54 = vpop.eup %5319  ;;  %5325 = vtanh.f32 %v2105_v47  ;;  %v4581_v30 = vpop.f32.mrb[116].mxu1  ;;  %2501 = vmatprep.mubr.bf16.mxu1 %v5466_v0  ;;  %4711 = vmatprep.subr.bf16.mxu1 %v5245_v7 }
 0x3f5   :  { %v4582_v37 = vpop.f32.mrb[117].mxu1  ;;  %v2193_v15 = vadd.f32 %v5320_v54, %v6162_v21 }
 0x3f6   :  { %v5322_v22 = vpop.eup %5321  ;;  %v4583_v4 = vadd.f32 %v4582_v37, %v4581_v30  ;;  %v4584_v10 = vpop.f32.mrb[118].mxu1 }
 0x3f7   :  { %v4585_v61 = vpop.f32.mrb[119].mxu1  ;;  %v2194_v50 = vadd.f32 %v5322_v22, %v6162_v21  ;;  %2225 = vst [vmem:[%s6701_s15 + $0xb0] sm:$0xff] %v2193_v15 }
 0x3f8   :  { %v2110_v5 = vadd.f32 %v4583_v4, %v6153_v28  ;;  %v4586_v51 = vadd.f32 %v4585_v61, %v4584_v10 }
 0x3f9   :  { %2226 = vst [vmem:[%s6701_s15 + $0xb8] sm:$0xff] %v2194_v50  ;;  %v2246_v1 = vpack.c.bf16 %v2194_v50, %v2193_v15 }
 0x3fa   :  { %5327 = vtanh.f32 %v2110_v5  ;;  %v2113_v38 = vadd.f32 %v4586_v51, %v6153_v28 }
 0x3fb   :  { %2502 = vmatmul.mubr.bf16.gmra.mrb[172].mxu1 %v2246_v1 }
 0x3fc   :  { %v5324_v59 = vpop.eup %5323  ;;  %5329 = vtanh.f32 %v2113_v38  ;;  %v4587_v62 = vpop.f32.mrb[120].mxu1  ;;  %2511 = vmatprep.mubr.bf16.mxu1 %v5466_v0 }
 0x3fd   :  { %v4588_v2 = vpop.f32.mrb[121].mxu1  ;;  %v2195_v3 = vadd.f32 %v5324_v59, %v6162_v21  ;;  %v5246_v59 = vld [vmem:[#allocation9 + $0x80] sm:$0xff]  }
 0x3fe   :  { %v5326_v8 = vpop.eup %5325  ;;  %v4589_v9 = vadd.f32 %v4588_v2, %v4587_v62  ;;  %v4590_v13 = vpop.f32.mrb[122].mxu1  ;;  %v5249_v2 = vld [vmem:[#allocation9 + $0xc8] sm:$0xff]  }
 0x3ff   :  { %v4591_v56 = vpop.f32.mrb[123].mxu1  ;;  %v2196_v16 = vadd.f32 %v5326_v8, %v6162_v21  ;;  %2227 = vst [vmem:[%s6701_s15 + $0xc0] sm:$0xff] %v2195_v3 }
 0x400   :  { %v2118_v17 = vadd.f32 %v4589_v9, %v6153_v28  ;;  %v4592_v18 = vadd.f32 %v4591_v56, %v4590_v13 }
 0x401   :  { %2228 = vst [vmem:[%s6701_s15 + $0xc8] sm:$0xff] %v2196_v16  ;;  %v2247_v57 = vpack.c.bf16 %v2196_v16, %v2195_v3  ;;  %v5248_v16 = vld [vmem:[#allocation9 + $0x8] sm:$0xff]  }
 0x402   :  { %5331 = vtanh.f32 %v2118_v17  ;;  %v2121_v20 = vadd.f32 %v4592_v18, %v6153_v28  ;;  %v5250_v17 = vld [vmem:[#allocation9 + $0x88] sm:$0xff]  }
 0x403   :  { %2512 = vmatmul.mubr.bf16.gmra.mrb[176].mxu1 %v2247_v57 }
 0x404   :  { %v5328_v23 = vpop.eup %5327  ;;  %5333 = vtanh.f32 %v2121_v20  ;;  %v4593_v24 = vpop.f32.mrb[124].mxu1  ;;  %2521 = vmatprep.mubr.bf16.mxu1 %v5466_v0  ;;  %v5251_v20 = vld [vmem:[#allocation9 + $0x50] sm:$0xff]  }
 0x405   :  { %v4594_v26 = vpop.f32.mrb[125].mxu1  ;;  %v2197_v14 = vadd.f32 %v5328_v23, %v6162_v21  ;;  %v5253_v23 = vld [vmem:[#allocation9 + $0xd0] sm:$0xff]  }
 0x406   :  { %v5330_v31 = vpop.eup %5329  ;;  %v4595_v32 = vadd.f32 %v4594_v26, %v4593_v24  ;;  %v4596_v60 = vpop.f32.mrb[126].mxu1 }
 0x407   :  { %v4597_v35 = vpop.f32.mrb[127].mxu1  ;;  %v2198_v40 = vadd.f32 %v5330_v31, %v6162_v21  ;;  %2229 = vst [vmem:[%s6701_s15 + $0xd0] sm:$0xff] %v2197_v14 }
 0x408   :  { %v2126_v42 = vadd.f32 %v4595_v32, %v6153_v28  ;;  %v4598_v43 = vadd.f32 %v4597_v35, %v4596_v60  ;;  %v5252_v60 = vld [vmem:[#allocation9 + $0x10] sm:$0xff]  }
 0x409   :  { %2230 = vst [vmem:[%s6701_s15 + $0xd8] sm:$0xff] %v2198_v40  ;;  %v2248_v44 = vpack.c.bf16 %v2198_v40, %v2197_v14  ;;  %v5254_v35 = vld [vmem:[#allocation9 + $0x90] sm:$0xff]  }
 0x40a   :  { %5335 = vtanh.f32 %v2126_v42  ;;  %v2129_v45 = vadd.f32 %v4598_v43, %v6153_v28  ;;  %v5255_v43 = vld [vmem:[#allocation9 + $0x58] sm:$0xff]  }
 0x40b   :  { %2522 = vmatmul.mubr.bf16.gmra.mrb[180].mxu1 %v2248_v44  ;;  %v5257_v44 = vld [vmem:[#allocation9 + $0xd8] sm:$0xff]  }
 0x40c   :  { %v5332_v48 = vpop.eup %5331  ;;  %5337 = vtanh.f32 %v2129_v45  ;;  %2531 = vmatprep.mubr.bf16.mxu1 %v5466_v0 }
 0x40d   :  { %v2199_v36 = vadd.f32 %v5332_v48, %v6162_v21 }
 0x40e   :  { %v5334_v39 = vpop.eup %5333 }
 0x40f   :  { %v2200_v33 = vadd.f32 %v5334_v39, %v6162_v21  ;;  %2231 = vst [vmem:[%s6701_s15 + $0xe0] sm:$0xff] %v2199_v36 }
 0x411   :  { %2232 = vst [vmem:[%s6701_s15 + $0xe8] sm:$0xff] %v2200_v33  ;;  %v2249_v6 = vpack.c.bf16 %v2200_v33, %v2199_v36 }
 0x413   :  { %2532 = vmatmul.mubr.bf16.gmra.mrb[184].mxu1 %v2249_v6  ;;  %v5256_v6 = vld [vmem:[#allocation9 + $0x18] sm:$0xff]  }
 0x414   :  { %v5336_v28 = vpop.eup %5335  ;;  %2541 = vmatprep.mubr.bf16.mxu1 %v5466_v0  ;;  %v2267_v0 = vld [vmem:[%s6694_s8] sm:$0x3] }
 0x415   :  { %v2201_v11 = vadd.f32 %v5336_v28, %v6162_v21  ;;  %v6342_v12 = vrot.slane %v2267_v0, %v5846_v55  ;;  %v5258_v28 = vld [vmem:[#allocation9 + $0x98] sm:$0xff]  }
 0x416   :  { %v5338_v46 = vpop.eup %5337 }
 0x417   :  { %v2202_v58 = vadd.f32 %v5338_v46, %v6162_v21  ;;  %2233 = vst [vmem:[%s6701_s15 + $0xf0] sm:$0xff] %v2201_v11  ;;  %v6339_v21 = vrot.slane %v2267_v0, %v5840_v53 }
 0x419   :  { %2234 = vst [vmem:[%s6701_s15 + $0xf8] sm:$0xff] %v2202_v58  ;;  %v2250_v29 = vpack.c.bf16 %v2202_v58, %v2201_v11  ;;  %v5259_v58 = vld [vmem:[#allocation9 + $0x60] sm:$0xff]  }
 0x41b   :  { %2542 = vmatmul.mubr.bf16.gmra.mrb[188].mxu1 %v2250_v29  ;;  %v5261_v29 = vld [vmem:[#allocation9 + $0xe0] sm:$0xff]  }
 0x476   :  { %v2393_v47 = vpop.f32.mrb[128].mxu1 }
 0x477   :  { %v2394_v54 = vadd.f32 %v2393_v47, %v6339_v21  ;;  %v2395_v30 = vpop.f32.mrb[129].mxu1 }
 0x478   :  { %v2396_v37 = vadd.f32 %v2395_v30, %v6342_v12  ;;  %v2397_v15 = vpop.f32.mrb[130].mxu1  ;;  %v5260_v30 = vld [vmem:[#allocation9 + $0x20] sm:$0xff]  }
 0x479   :  { %v2398_v22 = vadd.f32 %v2397_v15, %v6339_v21  ;;  %v2399_v4 = vpop.f32.mrb[131].mxu1  ;;  %v2552_v61 = vmax.f32 %v2394_v54, 0.0 }
 0x47a   :  { %v2400_v10 = vadd.f32 %v2399_v4, %v6342_v12  ;;  %v2553_v5 = vmax.f32 %v2396_v37, 0.0  ;;  %v5262_v37 = vld [vmem:[#allocation9 + $0xa0] sm:$0xff]   ;;  %v5263_v4 = vld [vmem:[#allocation9 + $0x68] sm:$0xff]  }
 0x47b   :  { %v2554_v50 = vmax.f32 %v2398_v22, 0.0 }
 0x47c   :  { %v2555_v51 = vmax.f32 %v2400_v10, 0.0  ;;  %v5265_v10 = vld [vmem:[#allocation9 + $0xe8] sm:$0xff]  }
 0x47d   :  { %v2616_v1 = vpack.c.bf16 %v2554_v50, %v2552_v61 }
 0x47e   :  { %v2617_v38 = vpack.c.bf16 %v2555_v51, %v2553_v5  ;;  %v2403_v41 = vpop.f32.mrb[132].mxu1 }
 0x47f   :  { %v2404_v62 = vadd.f32 %v2403_v41, %v6339_v21  ;;  %v2405_v19 = vpop.f32.mrb[133].mxu1  ;;  %v5266_v41 = vld [vmem:[#allocation9 + $0xa8] sm:$0xff]  }
 0x480   :  { %v2406_v3 = vadd.f32 %v2405_v19, %v6342_v12  ;;  %v2407_v8 = vpop.f32.mrb[134].mxu1  ;;  %3086 = vmatprep.mubr.bf16.mxu0 %v2617_v38  ;;  %3279 = vmatprep.mubr.bf16.mxu1 %v2617_v38  ;;  %v5264_v38 = vld [vmem:[#allocation9 + $0x28] sm:$0xff]   ;;  %v5269_v19 = vld [vmem:[#allocation9 + $0xf0] sm:$0xff]  }
 0x481   :  { %v2408_v9 = vadd.f32 %v2407_v8, %v6339_v21  ;;  %v2409_v13 = vpop.f32.mrb[135].mxu1  ;;  %3087 = vmatmul.mubr.bf16.vlgmr.msra.gmra.mrb[128].mxu0 %v2616_v1  ;;  %3280 = vmatmul.mubr.bf16.vlgmr.msra.gmra.mrb[192].mxu1 %v2616_v1  ;;  %v2556_v18 = vmax.f32 %v2404_v62, 0.0  ;;  %v5267_v62 = vld [vmem:[#allocation9 + $0x70] sm:$0xff]  }
 0x482   :  { %v2410_v56 = vadd.f32 %v2409_v13, %v6342_v12  ;;  %4600 = vmatpush3.bf16.msra.mxu0 %v5244_v49  ;;  %4712 = vmatpush3.bf16.msra.mxu1 %v5246_v59  ;;  %v2557_v24 = vmax.f32 %v2406_v3, 0.0  ;;  %v5268_v13 = vld [vmem:[#allocation9 + $0x30] sm:$0xff]  }
 0x483   :  { %v2558_v57 = vmax.f32 %v2408_v9, 0.0  ;;  %4601 = vmatprep.subr.bf16.mxu0 %v5247_v63  ;;  %4713 = vmatprep.subr.bf16.mxu1 %v5249_v2 }
 0x484   :  { %v2559_v26 = vmax.f32 %v2410_v56, 0.0  ;;  %v5270_v56 = vld [vmem:[#allocation9 + $0xb0] sm:$0xff]  }
 0x485   :  { %v2618_v14 = vpack.c.bf16 %v2558_v57, %v2556_v18  ;;  %v5271_v18 = vld [vmem:[#allocation9 + $0x78] sm:$0xff]  }
 0x486   :  { %v2619_v31 = vpack.c.bf16 %v2559_v26, %v2557_v24  ;;  %v2413_v32 = vpop.f32.mrb[136].mxu1  ;;  %4602 = vmatpush3.bf16.msra.mxu0 %v5248_v16  ;;  %4714 = vmatpush3.bf16.msra.mxu1 %v5250_v17  ;;  %v5273_v57 = vld [vmem:[#allocation9 + $0xf8] sm:$0xff]  }
 0x487   :  { %v2414_v40 = vadd.f32 %v2413_v32, %v6339_v21  ;;  %v2415_v42 = vpop.f32.mrb[137].mxu1  ;;  %4603 = vmatprep.subr.bf16.mxu0 %v5251_v20  ;;  %4715 = vmatprep.subr.bf16.mxu1 %v5253_v23  ;;  %v5274_v32 = vld [vmem:[#allocation9 + $0xb8] sm:$0xff]  }
 0x488   :  { %v2416_v45 = vadd.f32 %v2415_v42, %v6342_v12  ;;  %v2417_v48 = vpop.f32.mrb[138].mxu1  ;;  %3096 = vmatprep.mubr.bf16.mxu0 %v2619_v31  ;;  %3289 = vmatprep.mubr.bf16.mxu1 %v2619_v31  ;;  %v5272_v31 = vld [vmem:[#allocation9 + $0x38] sm:$0xff]  }
 0x489   :  { %v2418_v36 = vadd.f32 %v2417_v48, %v6339_v21  ;;  %v2419_v39 = vpop.f32.mrb[139].mxu1  ;;  %3097 = vmatmul.mubr.bf16.gmra.mrb[132].mxu0 %v2618_v14  ;;  %3290 = vmatmul.mubr.bf16.gmra.mrb[196].mxu1 %v2618_v14  ;;  %v2560_v11 = vmax.f32 %v2414_v40, 0.0 }
 0x48a   :  { %v2420_v33 = vadd.f32 %v2419_v39, %v6342_v12  ;;  %4604 = vmatpush3.bf16.msra.mxu0 %v5252_v60  ;;  %4716 = vmatpush3.bf16.msra.mxu1 %v5254_v35  ;;  %v2561_v34 = vmax.f32 %v2416_v45, 0.0 }
 0x48b   :  { %v2562_v46 = vmax.f32 %v2418_v36, 0.0  ;;  %4605 = vmatprep.subr.bf16.mxu0 %v5255_v43  ;;  %4717 = vmatprep.subr.bf16.mxu1 %v5257_v44 }
 0x48c   :  { %v2563_v7 = vmax.f32 %v2420_v33, 0.0 }
 0x48d   :  { %v2620_v0 = vpack.c.bf16 %v2562_v46, %v2560_v11 }
 0x48e   :  { %v2621_v47 = vpack.c.bf16 %v2563_v7, %v2561_v34  ;;  %v2423_v54 = vpop.f32.mrb[140].mxu1  ;;  %4606 = vmatpush3.bf16.msra.mxu0 %v5256_v6  ;;  %4718 = vmatpush3.bf16.msra.mxu1 %v5258_v28 }
 0x48f   :  { %v2424_v15 = vadd.f32 %v2423_v54, %v6339_v21  ;;  %v2425_v22 = vpop.f32.mrb[141].mxu1  ;;  %4607 = vmatprep.subr.bf16.mxu0 %v5259_v58  ;;  %4719 = vmatprep.subr.bf16.mxu1 %v5261_v29 }
 0x490   :  { %v2426_v61 = vadd.f32 %v2425_v22, %v6342_v12  ;;  %v2427_v50 = vpop.f32.mrb[142].mxu1  ;;  %3106 = vmatprep.mubr.bf16.mxu0 %v2621_v47  ;;  %3299 = vmatprep.mubr.bf16.mxu1 %v2621_v47 }
 0x491   :  { %v2428_v5 = vadd.f32 %v2427_v50, %v6339_v21  ;;  %v2429_v51 = vpop.f32.mrb[143].mxu1  ;;  %3107 = vmatmul.mubr.bf16.gmra.mrb[136].mxu0 %v2620_v0  ;;  %3300 = vmatmul.mubr.bf16.gmra.mrb[200].mxu1 %v2620_v0  ;;  %v2564_v49 = vmax.f32 %v2424_v15, 0.0 }
 0x492   :  { %v2430_v1 = vadd.f32 %v2429_v51, %v6342_v12  ;;  %4608 = vmatpush3.bf16.msra.mxu0 %v5260_v30  ;;  %4720 = vmatpush3.bf16.msra.mxu1 %v5262_v37  ;;  %v2565_v63 = vmax.f32 %v2426_v61, 0.0 }
 0x493   :  { %v2566_v59 = vmax.f32 %v2428_v5, 0.0  ;;  %4609 = vmatprep.subr.bf16.mxu0 %v5263_v4  ;;  %4721 = vmatprep.subr.bf16.mxu1 %v5265_v10 }
 0x494   :  { %v2567_v2 = vmax.f32 %v2430_v1, 0.0 }
 0x495   :  { %v2622_v3 = vpack.c.bf16 %v2566_v59, %v2564_v49 }
 0x496   :  { %v2623_v8 = vpack.c.bf16 %v2567_v2, %v2565_v63  ;;  %v2433_v9 = vpop.f32.mrb[144].mxu1  ;;  %4610 = vmatpush3.bf16.msra.mxu0 %v5264_v38  ;;  %4722 = vmatpush3.bf16.msra.mxu1 %v5266_v41 }
 0x497   :  { %v2434_v16 = vadd.f32 %v2433_v9, %v6339_v21  ;;  %v2435_v17 = vpop.f32.mrb[145].mxu1  ;;  %4611 = vmatprep.subr.bf16.mxu0 %v5267_v62  ;;  %4723 = vmatprep.subr.bf16.mxu1 %v5269_v19 }
 0x498   :  { %v2436_v20 = vadd.f32 %v2435_v17, %v6342_v12  ;;  %v2437_v23 = vpop.f32.mrb[146].mxu1  ;;  %3116 = vmatprep.mubr.bf16.mxu0 %v2623_v8  ;;  %3309 = vmatprep.mubr.bf16.mxu1 %v2623_v8 }
 0x499   :  { %v2438_v24 = vadd.f32 %v2437_v23, %v6339_v21  ;;  %v2439_v26 = vpop.f32.mrb[147].mxu1  ;;  %3117 = vmatmul.mubr.bf16.gmra.mrb[140].mxu0 %v2622_v3  ;;  %3310 = vmatmul.mubr.bf16.gmra.mrb[204].mxu1 %v2622_v3  ;;  %v2568_v60 = vmax.f32 %v2434_v16, 0.0 }
 0x49a   :  { %v2440_v14 = vadd.f32 %v2439_v26, %v6342_v12  ;;  %4612 = vmatpush3.bf16.msra.mxu0 %v5268_v13  ;;  %4724 = vmatpush3.bf16.msra.mxu1 %v5270_v56  ;;  %v2569_v40 = vmax.f32 %v2436_v20, 0.0 }
 0x49b   :  { %v2570_v35 = vmax.f32 %v2438_v24, 0.0  ;;  %4613 = vmatprep.subr.bf16.mxu0 %v5271_v18  ;;  %4725 = vmatprep.subr.bf16.mxu1 %v5273_v57 }
 0x49c   :  { %v2571_v42 = vmax.f32 %v2440_v14, 0.0 }
 0x49d   :  { %v2624_v43 = vpack.c.bf16 %v2570_v35, %v2568_v60 }
 0x49e   :  { %v2625_v44 = vpack.c.bf16 %v2571_v42, %v2569_v40  ;;  %v2443_v45 = vpop.f32.mrb[148].mxu1  ;;  %4614 = vmatpush3.bf16.msra.mxu0 %v5272_v31  ;;  %4726 = vmatpush3.bf16.msra.mxu1 %v5274_v32 }
 0x49f   :  { %v2444_v48 = vadd.f32 %v2443_v45, %v6339_v21  ;;  %v2445_v36 = vpop.f32.mrb[149].mxu1 }
 0x4a0   :  { %v2446_v39 = vadd.f32 %v2445_v36, %v6342_v12  ;;  %v2447_v33 = vpop.f32.mrb[150].mxu1  ;;  %3126 = vmatprep.mubr.bf16.mxu0 %v2625_v44  ;;  %3319 = vmatprep.mubr.bf16.mxu1 %v2625_v44 }
 0x4a1   :  { %v2448_v6 = vadd.f32 %v2447_v33, %v6339_v21  ;;  %v2449_v28 = vpop.f32.mrb[151].mxu1  ;;  %3127 = vmatmul.mubr.bf16.gmra.mrb[144].mxu0 %v2624_v43  ;;  %3320 = vmatmul.mubr.bf16.gmra.mrb[208].mxu1 %v2624_v43  ;;  %v2572_v46 = vmax.f32 %v2444_v48, 0.0 }
 0x4a2   :  { %v2450_v11 = vadd.f32 %v2449_v28, %v6342_v12  ;;  %v2573_v29 = vmax.f32 %v2446_v39, 0.0 }
 0x4a3   :  { %v2574_v58 = vmax.f32 %v2448_v6, 0.0 }
 0x4a4   :  { %v2575_v34 = vmax.f32 %v2450_v11, 0.0 }
 0x4a5   :  { %v2626_v7 = vpack.c.bf16 %v2574_v58, %v2572_v46 }
 0x4a6   :  { %v2627_v0 = vpack.c.bf16 %v2575_v34, %v2573_v29  ;;  %v2453_v47 = vpop.f32.mrb[152].mxu1 }
 0x4a7   :  { %v2454_v54 = vadd.f32 %v2453_v47, %v6339_v21  ;;  %v2455_v30 = vpop.f32.mrb[153].mxu1 }
 0x4a8   :  { %v2456_v37 = vadd.f32 %v2455_v30, %v6342_v12  ;;  %v2457_v15 = vpop.f32.mrb[154].mxu1  ;;  %3136 = vmatprep.mubr.bf16.mxu0 %v2627_v0  ;;  %3329 = vmatprep.mubr.bf16.mxu1 %v2627_v0 }
 0x4a9   :  { %v2458_v22 = vadd.f32 %v2457_v15, %v6339_v21  ;;  %v2459_v4 = vpop.f32.mrb[155].mxu1  ;;  %3137 = vmatmul.mubr.bf16.gmra.mrb[148].mxu0 %v2626_v7  ;;  %3330 = vmatmul.mubr.bf16.gmra.mrb[212].mxu1 %v2626_v7  ;;  %v2576_v61 = vmax.f32 %v2454_v54, 0.0 }
 0x4aa   :  { %v2460_v10 = vadd.f32 %v2459_v4, %v6342_v12  ;;  %v2577_v5 = vmax.f32 %v2456_v37, 0.0 }
 0x4ab   :  { %v2578_v50 = vmax.f32 %v2458_v22, 0.0 }
 0x4ac   :  { %v2579_v51 = vmax.f32 %v2460_v10, 0.0 }
 0x4ad   :  { %v2628_v1 = vpack.c.bf16 %v2578_v50, %v2576_v61 }
 0x4ae   :  { %v2629_v38 = vpack.c.bf16 %v2579_v51, %v2577_v5  ;;  %v2463_v41 = vpop.f32.mrb[156].mxu1 }
 0x4af   :  { %v2464_v49 = vadd.f32 %v2463_v41, %v6339_v21  ;;  %v2465_v59 = vpop.f32.mrb[157].mxu1 }
 0x4b0   :  { %v2466_v62 = vadd.f32 %v2465_v59, %v6342_v12  ;;  %v2467_v19 = vpop.f32.mrb[158].mxu1  ;;  %3146 = vmatprep.mubr.bf16.mxu0 %v2629_v38  ;;  %3339 = vmatprep.mubr.bf16.mxu1 %v2629_v38 }
 0x4b1   :  { %v2468_v63 = vadd.f32 %v2467_v19, %v6339_v21  ;;  %v2469_v2 = vpop.f32.mrb[159].mxu1  ;;  %3147 = vmatmul.mubr.bf16.gmra.mrb[152].mxu0 %v2628_v1  ;;  %3340 = vmatmul.mubr.bf16.gmra.mrb[216].mxu1 %v2628_v1  ;;  %v2580_v8 = vmax.f32 %v2464_v49, 0.0 }
 0x4b2   :  { %v2470_v3 = vadd.f32 %v2469_v2, %v6342_v12  ;;  %v2581_v13 = vmax.f32 %v2466_v62, 0.0 }
 0x4b3   :  { %v2582_v9 = vmax.f32 %v2468_v63, 0.0 }
 0x4b4   :  { %v2583_v56 = vmax.f32 %v2470_v3, 0.0 }
 0x4b5   :  { %v2630_v16 = vpack.c.bf16 %v2582_v9, %v2580_v8 }
 0x4b6   :  { %v2631_v17 = vpack.c.bf16 %v2583_v56, %v2581_v13  ;;  %v2473_v18 = vpop.f32.mrb[160].mxu1 }
 0x4b7   :  { %v2474_v57 = vadd.f32 %v2473_v18, %v6339_v21  ;;  %v2475_v20 = vpop.f32.mrb[161].mxu1 }
 0x4b8   :  { %v2476_v23 = vadd.f32 %v2475_v20, %v6342_v12  ;;  %v2477_v24 = vpop.f32.mrb[162].mxu1  ;;  %3156 = vmatprep.mubr.bf16.mxu0 %v2631_v17  ;;  %3349 = vmatprep.mubr.bf16.mxu1 %v2631_v17 }
 0x4b9   :  { %v2478_v26 = vadd.f32 %v2477_v24, %v6339_v21  ;;  %v2479_v14 = vpop.f32.mrb[163].mxu1  ;;  %3157 = vmatmul.mubr.bf16.gmra.mrb[156].mxu0 %v2630_v16  ;;  %3350 = vmatmul.mubr.bf16.gmra.mrb[220].mxu1 %v2630_v16  ;;  %v2584_v32 = vmax.f32 %v2474_v57, 0.0 }
 0x4ba   :  { %v2480_v31 = vadd.f32 %v2479_v14, %v6342_v12  ;;  %v2585_v35 = vmax.f32 %v2476_v23, 0.0 }
 0x4bb   :  { %v2586_v60 = vmax.f32 %v2478_v26, 0.0 }
 0x4bc   :  { %v2587_v40 = vmax.f32 %v2480_v31, 0.0 }
 0x4bd   :  { %v2632_v42 = vpack.c.bf16 %v2586_v60, %v2584_v32 }
 0x4be   :  { %v2633_v43 = vpack.c.bf16 %v2587_v40, %v2585_v35  ;;  %v2483_v44 = vpop.f32.mrb[164].mxu1 }
 0x4bf   :  { %v2484_v45 = vadd.f32 %v2483_v44, %v6339_v21  ;;  %v2485_v48 = vpop.f32.mrb[165].mxu1 }
 0x4c0   :  { %v2486_v36 = vadd.f32 %v2485_v48, %v6342_v12  ;;  %v2487_v39 = vpop.f32.mrb[166].mxu1  ;;  %3166 = vmatprep.mubr.bf16.mxu0 %v2633_v43  ;;  %3359 = vmatprep.mubr.bf16.mxu1 %v2633_v43 }
 0x4c1   :  { %v2488_v33 = vadd.f32 %v2487_v39, %v6339_v21  ;;  %v2489_v6 = vpop.f32.mrb[167].mxu1  ;;  %3167 = vmatmul.mubr.bf16.gmra.mrb[160].mxu0 %v2632_v42  ;;  %3360 = vmatmul.mubr.bf16.gmra.mrb[224].mxu1 %v2632_v42  ;;  %v2588_v11 = vmax.f32 %v2484_v45, 0.0 }
 0x4c2   :  { %v2490_v28 = vadd.f32 %v2489_v6, %v6342_v12  ;;  %v2589_v58 = vmax.f32 %v2486_v36, 0.0 }
 0x4c3   :  { %v2590_v46 = vmax.f32 %v2488_v33, 0.0 }
 0x4c4   :  { %v2591_v29 = vmax.f32 %v2490_v28, 0.0 }
 0x4c5   :  { %v2634_v34 = vpack.c.bf16 %v2590_v46, %v2588_v11 }
 0x4c6   :  { %v2635_v7 = vpack.c.bf16 %v2591_v29, %v2589_v58  ;;  %v2493_v0 = vpop.f32.mrb[168].mxu1 }
 0x4c7   :  { %v2494_v47 = vadd.f32 %v2493_v0, %v6339_v21  ;;  %v2495_v54 = vpop.f32.mrb[169].mxu1 }
 0x4c8   :  { %v2496_v30 = vadd.f32 %v2495_v54, %v6342_v12  ;;  %v2497_v37 = vpop.f32.mrb[170].mxu1  ;;  %3176 = vmatprep.mubr.bf16.mxu0 %v2635_v7  ;;  %3369 = vmatprep.mubr.bf16.mxu1 %v2635_v7 }
 0x4c9   :  { %v2498_v15 = vadd.f32 %v2497_v37, %v6339_v21  ;;  %v2499_v22 = vpop.f32.mrb[171].mxu1  ;;  %3177 = vmatmul.mubr.bf16.gmra.mrb[164].mxu0 %v2634_v34  ;;  %3370 = vmatmul.mubr.bf16.gmra.mrb[228].mxu1 %v2634_v34  ;;  %v2592_v10 = vmax.f32 %v2494_v47, 0.0 }
 0x4ca   :  { %v2500_v4 = vadd.f32 %v2499_v22, %v6342_v12  ;;  %v2593_v50 = vmax.f32 %v2496_v30, 0.0 }
 0x4cb   :  { %v2594_v61 = vmax.f32 %v2498_v15, 0.0 }
 0x4cc   :  { %v2595_v5 = vmax.f32 %v2500_v4, 0.0 }
 0x4cd   :  { %v2636_v51 = vpack.c.bf16 %v2594_v61, %v2592_v10 }
 0x4ce   :  { %v2637_v1 = vpack.c.bf16 %v2595_v5, %v2593_v50  ;;  %v2503_v38 = vpop.f32.mrb[172].mxu1 }
 0x4cf   :  { %v2504_v41 = vadd.f32 %v2503_v38, %v6339_v21  ;;  %v2505_v49 = vpop.f32.mrb[173].mxu1 }
 0x4d0   :  { %v2506_v59 = vadd.f32 %v2505_v49, %v6342_v12  ;;  %v2507_v62 = vpop.f32.mrb[174].mxu1  ;;  %3186 = vmatprep.mubr.bf16.mxu0 %v2637_v1  ;;  %3379 = vmatprep.mubr.bf16.mxu1 %v2637_v1 }
 0x4d1   :  { %v2508_v19 = vadd.f32 %v2507_v62, %v6339_v21  ;;  %v2509_v63 = vpop.f32.mrb[175].mxu1  ;;  %3187 = vmatmul.mubr.bf16.gmra.mrb[168].mxu0 %v2636_v51  ;;  %3380 = vmatmul.mubr.bf16.gmra.mrb[232].mxu1 %v2636_v51  ;;  %v2596_v3 = vmax.f32 %v2504_v41, 0.0 }
 0x4d2   :  { %v2510_v2 = vadd.f32 %v2509_v63, %v6342_v12  ;;  %v2597_v9 = vmax.f32 %v2506_v59, 0.0 }
 0x4d3   :  { %v2598_v8 = vmax.f32 %v2508_v19, 0.0 }
 0x4d4   :  { %v2599_v13 = vmax.f32 %v2510_v2, 0.0 }
 0x4d5   :  { %v2638_v56 = vpack.c.bf16 %v2598_v8, %v2596_v3 }
 0x4d6   :  { %v2639_v16 = vpack.c.bf16 %v2599_v13, %v2597_v9  ;;  %v2513_v17 = vpop.f32.mrb[176].mxu1 }
 0x4d7   :  { %v2514_v18 = vadd.f32 %v2513_v17, %v6339_v21  ;;  %v2515_v57 = vpop.f32.mrb[177].mxu1 }
 0x4d8   :  { %v2516_v20 = vadd.f32 %v2515_v57, %v6342_v12  ;;  %v2517_v23 = vpop.f32.mrb[178].mxu1  ;;  %3196 = vmatprep.mubr.bf16.mxu0 %v2639_v16  ;;  %3389 = vmatprep.mubr.bf16.mxu1 %v2639_v16  ;;  %v2712_v16 = vld [vmem:[%s6696_s10] sm:$0xf] }
 0x4d9   :  { %v2518_v24 = vadd.f32 %v2517_v23, %v6339_v21  ;;  %v2519_v26 = vpop.f32.mrb[179].mxu1  ;;  %3197 = vmatmul.mubr.bf16.gmra.mrb[172].mxu0 %v2638_v56  ;;  %3390 = vmatmul.mubr.bf16.gmra.mrb[236].mxu1 %v2638_v56  ;;  %v2600_v31 = vmax.f32 %v2514_v18, 0.0  ;;  %v6419_v17 = vrot.slane %v2712_v16, %v5846_v55  ;;  %v6423_v18 = vrot.slane %v2712_v16, %v214_v27 }
 0x4da   :  { %v2520_v14 = vadd.f32 %v2519_v26, %v6342_v12  ;;  %v2601_v60 = vmax.f32 %v2516_v20, 0.0 }
 0x4db   :  { %v2602_v32 = vmax.f32 %v2518_v24, 0.0 }
 0x4dc   :  { %v2603_v35 = vmax.f32 %v2520_v14, 0.0 }
 0x4dd   :  { %v2640_v40 = vpack.c.bf16 %v2602_v32, %v2600_v31 }
 0x4de   :  { %v2641_v42 = vpack.c.bf16 %v2603_v35, %v2601_v60  ;;  %v2523_v43 = vpop.f32.mrb[180].mxu1 }
 0x4df   :  { %v2524_v44 = vadd.f32 %v2523_v43, %v6339_v21  ;;  %v2525_v45 = vpop.f32.mrb[181].mxu1 }
 0x4e0   :  { %v2526_v48 = vadd.f32 %v2525_v45, %v6342_v12  ;;  %v2527_v36 = vpop.f32.mrb[182].mxu1  ;;  %3206 = vmatprep.mubr.bf16.mxu0 %v2641_v42  ;;  %3399 = vmatprep.mubr.bf16.mxu1 %v2641_v42 }
 0x4e1   :  { %v2528_v39 = vadd.f32 %v2527_v36, %v6339_v21  ;;  %v2529_v33 = vpop.f32.mrb[183].mxu1  ;;  %3207 = vmatmul.mubr.bf16.gmra.mrb[176].mxu0 %v2640_v40  ;;  %3400 = vmatmul.mubr.bf16.gmra.mrb[240].mxu1 %v2640_v40  ;;  %v2604_v28 = vmax.f32 %v2524_v44, 0.0 }
 0x4e2   :  { %v2530_v6 = vadd.f32 %v2529_v33, %v6342_v12  ;;  %v2605_v46 = vmax.f32 %v2526_v48, 0.0 }
 0x4e3   :  { %v2606_v11 = vmax.f32 %v2528_v39, 0.0 }
 0x4e4   :  { %v2607_v58 = vmax.f32 %v2530_v6, 0.0 }
 0x4e5   :  { %v2642_v29 = vpack.c.bf16 %v2606_v11, %v2604_v28 }
 0x4e6   :  { %v2643_v34 = vpack.c.bf16 %v2607_v58, %v2605_v46  ;;  %v2533_v7 = vpop.f32.mrb[184].mxu1 }
 0x4e7   :  { %v2534_v0 = vadd.f32 %v2533_v7, %v6339_v21  ;;  %v2535_v47 = vpop.f32.mrb[185].mxu1 }
 0x4e8   :  { %v2536_v54 = vadd.f32 %v2535_v47, %v6342_v12  ;;  %v2537_v30 = vpop.f32.mrb[186].mxu1  ;;  %3216 = vmatprep.mubr.bf16.mxu0 %v2643_v34  ;;  %3409 = vmatprep.mubr.bf16.mxu1 %v2643_v34 }
 0x4e9   :  { %v2538_v37 = vadd.f32 %v2537_v30, %v6339_v21  ;;  %v2539_v15 = vpop.f32.mrb[187].mxu1  ;;  %3217 = vmatmul.mubr.bf16.gmra.mrb[180].mxu0 %v2642_v29  ;;  %3410 = vmatmul.mubr.bf16.gmra.mrb[244].mxu1 %v2642_v29  ;;  %v2608_v4 = vmax.f32 %v2534_v0, 0.0 }
 0x4ea   :  { %v2540_v22 = vadd.f32 %v2539_v15, %v6342_v12  ;;  %v2609_v61 = vmax.f32 %v2536_v54, 0.0 }
 0x4eb   :  { %v2610_v10 = vmax.f32 %v2538_v37, 0.0 }
 0x4ec   :  { %v2611_v50 = vmax.f32 %v2540_v22, 0.0 }
 0x4ed   :  { %v2644_v5 = vpack.c.bf16 %v2610_v10, %v2608_v4 }
 0x4ee   :  { %v2645_v51 = vpack.c.bf16 %v2611_v50, %v2609_v61  ;;  %v2543_v1 = vpop.f32.mrb[188].mxu1 }
 0x4ef   :  { %v2544_v38 = vadd.f32 %v2543_v1, %v6339_v21  ;;  %v2545_v41 = vpop.f32.mrb[189].mxu1 }
 0x4f0   :  { %v2546_v49 = vadd.f32 %v2545_v41, %v6342_v12  ;;  %v2547_v59 = vpop.f32.mrb[190].mxu1  ;;  %3226 = vmatprep.mubr.bf16.mxu0 %v2645_v51  ;;  %3419 = vmatprep.mubr.bf16.mxu1 %v2645_v51 }
 0x4f1   :  { %v2548_v62 = vadd.f32 %v2547_v59, %v6339_v21  ;;  %v2549_v19 = vpop.f32.mrb[191].mxu1  ;;  %3227 = vmatmul.mubr.bf16.gmra.mrb[184].mxu0 %v2644_v5  ;;  %3420 = vmatmul.mubr.bf16.gmra.mrb[248].mxu1 %v2644_v5  ;;  %v2612_v2 = vmax.f32 %v2544_v38, 0.0  ;;  %v6412_v21 = vrot.slane %v2712_v16, %v5840_v53 }
 0x4f2   :  { %v2550_v63 = vadd.f32 %v2549_v19, %v6342_v12  ;;  %v2613_v8 = vmax.f32 %v2546_v49, 0.0  ;;  %v6416_v12 = vrot.slane %v2712_v16, %v210_v25 }
 0x4f3   :  { %v2614_v3 = vmax.f32 %v2548_v62, 0.0 }
 0x4f4   :  { %v2615_v9 = vmax.f32 %v2550_v63, 0.0 }
 0x4f5   :  { %v2646_v13 = vpack.c.bf16 %v2614_v3, %v2612_v2 }
 0x4f6   :  { %v2647_v56 = vpack.c.bf16 %v2615_v9, %v2613_v8 }
 0x4f8   :  { %3236 = vmatprep.mubr.bf16.mxu0 %v2647_v56  ;;  %3429 = vmatprep.mubr.bf16.mxu1 %v2647_v56 }
 0x4f9   :  { %3237 = vmatmul.mubr.bf16.gmra.mrb[188].mxu0 %v2646_v13  ;;  %3430 = vmatmul.mubr.bf16.gmra.mrb[252].mxu1 %v2646_v13 }
 0x554   :  { %v3088_v57 = vpop.f32.mrb[128].mxu0  ;;  %v3281_v20 = vpop.f32.mrb[192].mxu1 }
 0x555   :  { %v3089_v23 = vadd.f32 %v3088_v57, %v6412_v21  ;;  %v3282_v24 = vadd.f32 %v3281_v20, %v6416_v12  ;;  %v3090_v26 = vpop.f32.mrb[129].mxu0  ;;  %v3283_v53 = vpop.f32.mrb[193].mxu1 }
 0x556   :  { %v3091_v14 = vadd.f32 %v3090_v26, %v6419_v17  ;;  %v3284_v25 = vadd.f32 %v3283_v53, %v6423_v18  ;;  %v3092_v31 = vpop.f32.mrb[130].mxu0  ;;  %v3285_v32 = vpop.f32.mrb[194].mxu1 }
 0x557   :  { %v3093_v55 = vadd.f32 %v3092_v31, %v6412_v21  ;;  %v3286_v52 = vadd.f32 %v3285_v32, %v6416_v12  ;;  %v3094_v27 = vpop.f32.mrb[131].mxu0  ;;  %v3287_v60 = vpop.f32.mrb[195].mxu1  ;;  %v3440_v42 = vmax.f32 %v3089_v23, 0.0  ;;  %v3442_v43 = vmax.f32 %v3282_v24, 0.0 }
 0x558   :  { %v3095_v35 = vadd.f32 %v3094_v27, %v6419_v17  ;;  %v3288_v40 = vadd.f32 %v3287_v60, %v6423_v18  ;;  %v3441_v48 = vmax.f32 %v3091_v14, 0.0  ;;  %v3443_v36 = vmax.f32 %v3284_v25, 0.0 }
 0x559   :  { %v3444_v44 = vmax.f32 %v3093_v55, 0.0  ;;  %v3446_v45 = vmax.f32 %v3286_v52, 0.0 }
 0x55a   :  { %v3445_v39 = vmax.f32 %v3095_v35, 0.0  ;;  %v3447_v33 = vmax.f32 %v3288_v40, 0.0 }
 0x55b   :  { %v3568_v6 = vpack.c.bf16 %v3444_v44, %v3440_v42  ;;  %v3570_v28 = vpack.c.bf16 %v3446_v45, %v3442_v43 }
 0x55c   :  { %v3569_v11 = vpack.c.bf16 %v3445_v39, %v3441_v48  ;;  %v3571_v46 = vpack.c.bf16 %v3447_v33, %v3443_v36  ;;  %v3098_v58 = vpop.f32.mrb[132].mxu0  ;;  %v3291_v29 = vpop.f32.mrb[196].mxu1 }
 0x55d   :  { %v3099_v34 = vadd.f32 %v3098_v58, %v6412_v21  ;;  %v3292_v7 = vadd.f32 %v3291_v29, %v6416_v12  ;;  %v3100_v0 = vpop.f32.mrb[133].mxu0  ;;  %v3293_v47 = vpop.f32.mrb[197].mxu1 }
 0x55e   :  { %v3101_v54 = vadd.f32 %v3100_v0, %v6419_v17  ;;  %v3294_v30 = vadd.f32 %v3293_v47, %v6423_v18  ;;  %v3102_v37 = vpop.f32.mrb[134].mxu0  ;;  %v3295_v15 = vpop.f32.mrb[198].mxu1  ;;  %3927 = vmatprep.mubr.bf16.mxu0 %v3569_v11  ;;  %4088 = vmatprep.mubr.bf16.mxu1 %v3571_v46 }
 0x55f   :  { %v3103_v22 = vadd.f32 %v3102_v37, %v6412_v21  ;;  %v3296_v4 = vadd.f32 %v3295_v15, %v6416_v12  ;;  %v3104_v10 = vpop.f32.mrb[135].mxu0  ;;  %v3297_v61 = vpop.f32.mrb[199].mxu1  ;;  %3928 = vmatmul.mubr.bf16.vlgmr.msra.gmra.mrb[192].mxu0 %v3568_v6  ;;  %4089 = vmatmul.mubr.bf16.vlgmr.msra.gmra.mrb[0].mxu1 %v3570_v28  ;;  %v3448_v51 = vmax.f32 %v3099_v34, 0.0  ;;  %v3450_v1 = vmax.f32 %v3292_v7, 0.0 }
 0x560   :  { %v3105_v50 = vadd.f32 %v3104_v10, %v6419_v17  ;;  %v3298_v5 = vadd.f32 %v3297_v61, %v6423_v18  ;;  %v3449_v49 = vmax.f32 %v3101_v54, 0.0  ;;  %v3451_v59 = vmax.f32 %v3294_v30, 0.0 }
 0x561   :  { %v3452_v38 = vmax.f32 %v3103_v22, 0.0  ;;  %v3454_v41 = vmax.f32 %v3296_v4, 0.0 }
 0x562   :  { %v3453_v62 = vmax.f32 %v3105_v50, 0.0  ;;  %v3455_v19 = vmax.f32 %v3298_v5, 0.0 }
 0x563   :  { %v3572_v63 = vpack.c.bf16 %v3452_v38, %v3448_v51  ;;  %v3574_v2 = vpack.c.bf16 %v3454_v41, %v3450_v1 }
 0x564   :  { %v3573_v3 = vpack.c.bf16 %v3453_v62, %v3449_v49  ;;  %v3575_v8 = vpack.c.bf16 %v3455_v19, %v3451_v59  ;;  %v3108_v9 = vpop.f32.mrb[136].mxu0  ;;  %v3301_v13 = vpop.f32.mrb[200].mxu1 }
 0x565   :  { %v3109_v56 = vadd.f32 %v3108_v9, %v6412_v21  ;;  %v3302_v16 = vadd.f32 %v3301_v13, %v6416_v12  ;;  %v3110_v57 = vpop.f32.mrb[137].mxu0  ;;  %v3303_v20 = vpop.f32.mrb[201].mxu1 }
 0x566   :  { %v3111_v23 = vadd.f32 %v3110_v57, %v6419_v17  ;;  %v3304_v24 = vadd.f32 %v3303_v20, %v6423_v18  ;;  %v3112_v26 = vpop.f32.mrb[138].mxu0  ;;  %v3305_v53 = vpop.f32.mrb[202].mxu1  ;;  %3935 = vmatprep.mubr.bf16.mxu0 %v3573_v3  ;;  %4096 = vmatprep.mubr.bf16.mxu1 %v3575_v8 }
 0x567   :  { %v3113_v14 = vadd.f32 %v3112_v26, %v6412_v21  ;;  %v3306_v25 = vadd.f32 %v3305_v53, %v6416_v12  ;;  %v3114_v31 = vpop.f32.mrb[139].mxu0  ;;  %v3307_v32 = vpop.f32.mrb[203].mxu1  ;;  %3936 = vmatmul.mubr.bf16.gmra.mrb[196].mxu0 %v3572_v63  ;;  %4097 = vmatmul.mubr.bf16.gmra.mrb[4].mxu1 %v3574_v2  ;;  %v3456_v27 = vmax.f32 %v3109_v56, 0.0  ;;  %v3458_v60 = vmax.f32 %v3302_v16, 0.0 }
 0x568   :  { %v3115_v55 = vadd.f32 %v3114_v31, %v6419_v17  ;;  %v3308_v52 = vadd.f32 %v3307_v32, %v6423_v18  ;;  %v3457_v42 = vmax.f32 %v3111_v23, 0.0  ;;  %v3459_v43 = vmax.f32 %v3304_v24, 0.0 }
 0x569   :  { %v3460_v35 = vmax.f32 %v3113_v14, 0.0  ;;  %v3462_v40 = vmax.f32 %v3306_v25, 0.0 }
 0x56a   :  { %v3461_v44 = vmax.f32 %v3115_v55, 0.0  ;;  %v3463_v45 = vmax.f32 %v3308_v52, 0.0 }
 0x56b   :  { %v3576_v48 = vpack.c.bf16 %v3460_v35, %v3456_v27  ;;  %v3578_v36 = vpack.c.bf16 %v3462_v40, %v3458_v60 }
 0x56c   :  { %v3577_v39 = vpack.c.bf16 %v3461_v44, %v3457_v42  ;;  %v3579_v33 = vpack.c.bf16 %v3463_v45, %v3459_v43  ;;  %v3118_v6 = vpop.f32.mrb[140].mxu0  ;;  %v3311_v28 = vpop.f32.mrb[204].mxu1 }
 0x56d   :  { %v3119_v11 = vadd.f32 %v3118_v6, %v6412_v21  ;;  %v3312_v46 = vadd.f32 %v3311_v28, %v6416_v12  ;;  %v3120_v58 = vpop.f32.mrb[141].mxu0  ;;  %v3313_v29 = vpop.f32.mrb[205].mxu1 }
 0x56e   :  { %v3121_v34 = vadd.f32 %v3120_v58, %v6419_v17  ;;  %v3314_v7 = vadd.f32 %v3313_v29, %v6423_v18  ;;  %v3122_v0 = vpop.f32.mrb[142].mxu0  ;;  %v3315_v47 = vpop.f32.mrb[206].mxu1  ;;  %3943 = vmatprep.mubr.bf16.mxu0 %v3577_v39  ;;  %4104 = vmatprep.mubr.bf16.mxu1 %v3579_v33 }
 0x56f   :  { %v3123_v54 = vadd.f32 %v3122_v0, %v6412_v21  ;;  %v3316_v30 = vadd.f32 %v3315_v47, %v6416_v12  ;;  %v3124_v37 = vpop.f32.mrb[143].mxu0  ;;  %v3317_v15 = vpop.f32.mrb[207].mxu1  ;;  %3944 = vmatmul.mubr.bf16.gmra.mrb[200].mxu0 %v3576_v48  ;;  %4105 = vmatmul.mubr.bf16.gmra.mrb[8].mxu1 %v3578_v36  ;;  %v3464_v10 = vmax.f32 %v3119_v11, 0.0  ;;  %v3466_v61 = vmax.f32 %v3312_v46, 0.0 }
 0x570   :  { %v3125_v22 = vadd.f32 %v3124_v37, %v6419_v17  ;;  %v3318_v4 = vadd.f32 %v3317_v15, %v6423_v18  ;;  %v3465_v51 = vmax.f32 %v3121_v34, 0.0  ;;  %v3467_v1 = vmax.f32 %v3314_v7, 0.0 }
 0x571   :  { %v3468_v50 = vmax.f32 %v3123_v54, 0.0  ;;  %v3470_v5 = vmax.f32 %v3316_v30, 0.0 }
 0x572   :  { %v3469_v38 = vmax.f32 %v3125_v22, 0.0  ;;  %v3471_v41 = vmax.f32 %v3318_v4, 0.0 }
 0x573   :  { %v3580_v49 = vpack.c.bf16 %v3468_v50, %v3464_v10  ;;  %v3582_v59 = vpack.c.bf16 %v3470_v5, %v3466_v61 }
 0x574   :  { %v3581_v62 = vpack.c.bf16 %v3469_v38, %v3465_v51  ;;  %v3583_v19 = vpack.c.bf16 %v3471_v41, %v3467_v1  ;;  %v3128_v63 = vpop.f32.mrb[144].mxu0  ;;  %v3321_v2 = vpop.f32.mrb[208].mxu1 }
 0x575   :  { %v3129_v3 = vadd.f32 %v3128_v63, %v6412_v21  ;;  %v3322_v8 = vadd.f32 %v3321_v2, %v6416_v12  ;;  %v3130_v9 = vpop.f32.mrb[145].mxu0  ;;  %v3323_v13 = vpop.f32.mrb[209].mxu1 }
 0x576   :  { %v3131_v56 = vadd.f32 %v3130_v9, %v6419_v17  ;;  %v3324_v16 = vadd.f32 %v3323_v13, %v6423_v18  ;;  %v3132_v57 = vpop.f32.mrb[146].mxu0  ;;  %v3325_v20 = vpop.f32.mrb[210].mxu1  ;;  %3951 = vmatprep.mubr.bf16.mxu0 %v3581_v62  ;;  %4112 = vmatprep.mubr.bf16.mxu1 %v3583_v19 }
 0x577   :  { %v3133_v23 = vadd.f32 %v3132_v57, %v6412_v21  ;;  %v3326_v24 = vadd.f32 %v3325_v20, %v6416_v12  ;;  %v3134_v26 = vpop.f32.mrb[147].mxu0  ;;  %v3327_v53 = vpop.f32.mrb[211].mxu1  ;;  %3952 = vmatmul.mubr.bf16.gmra.mrb[204].mxu0 %v3580_v49  ;;  %4113 = vmatmul.mubr.bf16.gmra.mrb[12].mxu1 %v3582_v59  ;;  %v3472_v31 = vmax.f32 %v3129_v3, 0.0  ;;  %v3474_v32 = vmax.f32 %v3322_v8, 0.0 }
 0x578   :  { %v3135_v14 = vadd.f32 %v3134_v26, %v6419_v17  ;;  %v3328_v25 = vadd.f32 %v3327_v53, %v6423_v18  ;;  %v3473_v27 = vmax.f32 %v3131_v56, 0.0  ;;  %v3475_v60 = vmax.f32 %v3324_v16, 0.0 }
 0x579   :  { %v3476_v55 = vmax.f32 %v3133_v23, 0.0  ;;  %v3478_v52 = vmax.f32 %v3326_v24, 0.0 }
 0x57a   :  { %v3477_v35 = vmax.f32 %v3135_v14, 0.0  ;;  %v3479_v40 = vmax.f32 %v3328_v25, 0.0 }
 0x57b   :  { %v3584_v42 = vpack.c.bf16 %v3476_v55, %v3472_v31  ;;  %v3586_v43 = vpack.c.bf16 %v3478_v52, %v3474_v32 }
 0x57c   :  { %v3585_v44 = vpack.c.bf16 %v3477_v35, %v3473_v27  ;;  %v3587_v45 = vpack.c.bf16 %v3479_v40, %v3475_v60  ;;  %v3138_v48 = vpop.f32.mrb[148].mxu0  ;;  %v3331_v36 = vpop.f32.mrb[212].mxu1 }
 0x57d   :  { %v3139_v39 = vadd.f32 %v3138_v48, %v6412_v21  ;;  %v3332_v33 = vadd.f32 %v3331_v36, %v6416_v12  ;;  %v3140_v6 = vpop.f32.mrb[149].mxu0  ;;  %v3333_v28 = vpop.f32.mrb[213].mxu1 }
 0x57e   :  { %v3141_v11 = vadd.f32 %v3140_v6, %v6419_v17  ;;  %v3334_v46 = vadd.f32 %v3333_v28, %v6423_v18  ;;  %v3142_v58 = vpop.f32.mrb[150].mxu0  ;;  %v3335_v29 = vpop.f32.mrb[214].mxu1  ;;  %3959 = vmatprep.mubr.bf16.mxu0 %v3585_v44  ;;  %4120 = vmatprep.mubr.bf16.mxu1 %v3587_v45 }
 0x57f   :  { %v3143_v34 = vadd.f32 %v3142_v58, %v6412_v21  ;;  %v3336_v7 = vadd.f32 %v3335_v29, %v6416_v12  ;;  %v3144_v0 = vpop.f32.mrb[151].mxu0  ;;  %v3337_v47 = vpop.f32.mrb[215].mxu1  ;;  %3960 = vmatmul.mubr.bf16.gmra.mrb[208].mxu0 %v3584_v42  ;;  %4121 = vmatmul.mubr.bf16.gmra.mrb[16].mxu1 %v3586_v43  ;;  %v3480_v37 = vmax.f32 %v3139_v39, 0.0  ;;  %v3482_v15 = vmax.f32 %v3332_v33, 0.0 }
 0x580   :  { %v3145_v54 = vadd.f32 %v3144_v0, %v6419_v17  ;;  %v3338_v30 = vadd.f32 %v3337_v47, %v6423_v18  ;;  %v3481_v10 = vmax.f32 %v3141_v11, 0.0  ;;  %v3483_v61 = vmax.f32 %v3334_v46, 0.0 }
 0x581   :  { %v3484_v22 = vmax.f32 %v3143_v34, 0.0  ;;  %v3486_v4 = vmax.f32 %v3336_v7, 0.0 }
 0x582   :  { %v3485_v50 = vmax.f32 %v3145_v54, 0.0  ;;  %v3487_v5 = vmax.f32 %v3338_v30, 0.0 }
 0x583   :  { %v3588_v51 = vpack.c.bf16 %v3484_v22, %v3480_v37  ;;  %v3590_v1 = vpack.c.bf16 %v3486_v4, %v3482_v15 }
 0x584   :  { %v3589_v38 = vpack.c.bf16 %v3485_v50, %v3481_v10  ;;  %v3591_v41 = vpack.c.bf16 %v3487_v5, %v3483_v61  ;;  %v3148_v49 = vpop.f32.mrb[152].mxu0  ;;  %v3341_v59 = vpop.f32.mrb[216].mxu1 }
 0x585   :  { %v3149_v62 = vadd.f32 %v3148_v49, %v6412_v21  ;;  %v3342_v19 = vadd.f32 %v3341_v59, %v6416_v12  ;;  %v3150_v63 = vpop.f32.mrb[153].mxu0  ;;  %v3343_v2 = vpop.f32.mrb[217].mxu1 }
 0x586   :  { %v3151_v3 = vadd.f32 %v3150_v63, %v6419_v17  ;;  %v3344_v8 = vadd.f32 %v3343_v2, %v6423_v18  ;;  %v3152_v9 = vpop.f32.mrb[154].mxu0  ;;  %v3345_v13 = vpop.f32.mrb[218].mxu1  ;;  %3967 = vmatprep.mubr.bf16.mxu0 %v3589_v38  ;;  %4128 = vmatprep.mubr.bf16.mxu1 %v3591_v41 }
 0x587   :  { %v3153_v56 = vadd.f32 %v3152_v9, %v6412_v21  ;;  %v3346_v16 = vadd.f32 %v3345_v13, %v6416_v12  ;;  %v3154_v57 = vpop.f32.mrb[155].mxu0  ;;  %v3347_v20 = vpop.f32.mrb[219].mxu1  ;;  %3968 = vmatmul.mubr.bf16.gmra.mrb[212].mxu0 %v3588_v51  ;;  %4129 = vmatmul.mubr.bf16.gmra.mrb[20].mxu1 %v3590_v1  ;;  %v3488_v26 = vmax.f32 %v3149_v62, 0.0  ;;  %v3490_v53 = vmax.f32 %v3342_v19, 0.0 }
 0x588   :  { %v3155_v23 = vadd.f32 %v3154_v57, %v6419_v17  ;;  %v3348_v24 = vadd.f32 %v3347_v20, %v6423_v18  ;;  %v3489_v31 = vmax.f32 %v3151_v3, 0.0  ;;  %v3491_v32 = vmax.f32 %v3344_v8, 0.0 }
 0x589   :  { %v3492_v14 = vmax.f32 %v3153_v56, 0.0  ;;  %v3494_v25 = vmax.f32 %v3346_v16, 0.0 }
 0x58a   :  { %v3493_v55 = vmax.f32 %v3155_v23, 0.0  ;;  %v3495_v52 = vmax.f32 %v3348_v24, 0.0 }
 0x58b   :  { %v3592_v27 = vpack.c.bf16 %v3492_v14, %v3488_v26  ;;  %v3594_v60 = vpack.c.bf16 %v3494_v25, %v3490_v53 }
 0x58c   :  { %v3593_v35 = vpack.c.bf16 %v3493_v55, %v3489_v31  ;;  %v3595_v40 = vpack.c.bf16 %v3495_v52, %v3491_v32  ;;  %v3158_v42 = vpop.f32.mrb[156].mxu0  ;;  %v3351_v43 = vpop.f32.mrb[220].mxu1 }
 0x58d   :  { %v3159_v44 = vadd.f32 %v3158_v42, %v6412_v21  ;;  %v3352_v45 = vadd.f32 %v3351_v43, %v6416_v12  ;;  %v3160_v48 = vpop.f32.mrb[157].mxu0  ;;  %v3353_v36 = vpop.f32.mrb[221].mxu1 }
 0x58e   :  { %v3161_v39 = vadd.f32 %v3160_v48, %v6419_v17  ;;  %v3354_v33 = vadd.f32 %v3353_v36, %v6423_v18  ;;  %v3162_v6 = vpop.f32.mrb[158].mxu0  ;;  %v3355_v28 = vpop.f32.mrb[222].mxu1  ;;  %3975 = vmatprep.mubr.bf16.mxu0 %v3593_v35  ;;  %4136 = vmatprep.mubr.bf16.mxu1 %v3595_v40 }
 0x58f   :  { %v3163_v11 = vadd.f32 %v3162_v6, %v6412_v21  ;;  %v3356_v46 = vadd.f32 %v3355_v28, %v6416_v12  ;;  %v3164_v58 = vpop.f32.mrb[159].mxu0  ;;  %v3357_v29 = vpop.f32.mrb[223].mxu1  ;;  %3976 = vmatmul.mubr.bf16.gmra.mrb[216].mxu0 %v3592_v27  ;;  %4137 = vmatmul.mubr.bf16.gmra.mrb[24].mxu1 %v3594_v60  ;;  %v3496_v0 = vmax.f32 %v3159_v44, 0.0  ;;  %v3498_v47 = vmax.f32 %v3352_v45, 0.0 }
 0x590   :  { %v3165_v34 = vadd.f32 %v3164_v58, %v6419_v17  ;;  %v3358_v7 = vadd.f32 %v3357_v29, %v6423_v18  ;;  %v3497_v37 = vmax.f32 %v3161_v39, 0.0  ;;  %v3499_v15 = vmax.f32 %v3354_v33, 0.0 }
 0x591   :  { %v3500_v54 = vmax.f32 %v3163_v11, 0.0  ;;  %v3502_v30 = vmax.f32 %v3356_v46, 0.0 }
 0x592   :  { %v3501_v22 = vmax.f32 %v3165_v34, 0.0  ;;  %v3503_v4 = vmax.f32 %v3358_v7, 0.0 }
 0x593   :  { %v3596_v10 = vpack.c.bf16 %v3500_v54, %v3496_v0  ;;  %v3598_v61 = vpack.c.bf16 %v3502_v30, %v3498_v47 }
 0x594   :  { %v3597_v50 = vpack.c.bf16 %v3501_v22, %v3497_v37  ;;  %v3599_v5 = vpack.c.bf16 %v3503_v4, %v3499_v15  ;;  %v3168_v51 = vpop.f32.mrb[160].mxu0  ;;  %v3361_v1 = vpop.f32.mrb[224].mxu1 }
 0x595   :  { %v3169_v38 = vadd.f32 %v3168_v51, %v6412_v21  ;;  %v3362_v41 = vadd.f32 %v3361_v1, %v6416_v12  ;;  %v3170_v49 = vpop.f32.mrb[161].mxu0  ;;  %v3363_v59 = vpop.f32.mrb[225].mxu1 }
 0x596   :  { %v3171_v62 = vadd.f32 %v3170_v49, %v6419_v17  ;;  %v3364_v19 = vadd.f32 %v3363_v59, %v6423_v18  ;;  %v3172_v63 = vpop.f32.mrb[162].mxu0  ;;  %v3365_v2 = vpop.f32.mrb[226].mxu1  ;;  %3983 = vmatprep.mubr.bf16.mxu0 %v3597_v50  ;;  %4144 = vmatprep.mubr.bf16.mxu1 %v3599_v5 }
 0x597   :  { %v3173_v3 = vadd.f32 %v3172_v63, %v6412_v21  ;;  %v3366_v8 = vadd.f32 %v3365_v2, %v6416_v12  ;;  %v3174_v9 = vpop.f32.mrb[163].mxu0  ;;  %v3367_v13 = vpop.f32.mrb[227].mxu1  ;;  %3984 = vmatmul.mubr.bf16.gmra.mrb[220].mxu0 %v3596_v10  ;;  %4145 = vmatmul.mubr.bf16.gmra.mrb[28].mxu1 %v3598_v61  ;;  %v3504_v57 = vmax.f32 %v3169_v38, 0.0  ;;  %v3506_v20 = vmax.f32 %v3362_v41, 0.0 }
 0x598   :  { %v3175_v56 = vadd.f32 %v3174_v9, %v6419_v17  ;;  %v3368_v16 = vadd.f32 %v3367_v13, %v6423_v18  ;;  %v3505_v26 = vmax.f32 %v3171_v62, 0.0  ;;  %v3507_v53 = vmax.f32 %v3364_v19, 0.0 }
 0x599   :  { %v3508_v23 = vmax.f32 %v3173_v3, 0.0  ;;  %v3510_v24 = vmax.f32 %v3366_v8, 0.0 }
 0x59a   :  { %v3509_v14 = vmax.f32 %v3175_v56, 0.0  ;;  %v3511_v25 = vmax.f32 %v3368_v16, 0.0 }
 0x59b   :  { %v3600_v31 = vpack.c.bf16 %v3508_v23, %v3504_v57  ;;  %v3602_v32 = vpack.c.bf16 %v3510_v24, %v3506_v20 }
 0x59c   :  { %v3601_v55 = vpack.c.bf16 %v3509_v14, %v3505_v26  ;;  %v3603_v52 = vpack.c.bf16 %v3511_v25, %v3507_v53  ;;  %v3178_v27 = vpop.f32.mrb[164].mxu0  ;;  %v3371_v60 = vpop.f32.mrb[228].mxu1 }
 0x59d   :  { %v3179_v35 = vadd.f32 %v3178_v27, %v6412_v21  ;;  %v3372_v40 = vadd.f32 %v3371_v60, %v6416_v12  ;;  %v3180_v42 = vpop.f32.mrb[165].mxu0  ;;  %v3373_v43 = vpop.f32.mrb[229].mxu1 }
 0x59e   :  { %v3181_v44 = vadd.f32 %v3180_v42, %v6419_v17  ;;  %v3374_v45 = vadd.f32 %v3373_v43, %v6423_v18  ;;  %v3182_v48 = vpop.f32.mrb[166].mxu0  ;;  %v3375_v36 = vpop.f32.mrb[230].mxu1  ;;  %3991 = vmatprep.mubr.bf16.mxu0 %v3601_v55  ;;  %4152 = vmatprep.mubr.bf16.mxu1 %v3603_v52 }
 0x59f   :  { %v3183_v39 = vadd.f32 %v3182_v48, %v6412_v21  ;;  %v3376_v33 = vadd.f32 %v3375_v36, %v6416_v12  ;;  %v3184_v6 = vpop.f32.mrb[167].mxu0  ;;  %v3377_v28 = vpop.f32.mrb[231].mxu1  ;;  %3992 = vmatmul.mubr.bf16.gmra.mrb[224].mxu0 %v3600_v31  ;;  %4153 = vmatmul.mubr.bf16.gmra.mrb[32].mxu1 %v3602_v32  ;;  %v3512_v58 = vmax.f32 %v3179_v35, 0.0  ;;  %v3514_v29 = vmax.f32 %v3372_v40, 0.0 }
 0x5a0   :  { %v3185_v11 = vadd.f32 %v3184_v6, %v6419_v17  ;;  %v3378_v46 = vadd.f32 %v3377_v28, %v6423_v18  ;;  %v3513_v0 = vmax.f32 %v3181_v44, 0.0  ;;  %v3515_v47 = vmax.f32 %v3374_v45, 0.0 }
 0x5a1   :  { %v3516_v34 = vmax.f32 %v3183_v39, 0.0  ;;  %v3518_v7 = vmax.f32 %v3376_v33, 0.0 }
 0x5a2   :  { %v3517_v54 = vmax.f32 %v3185_v11, 0.0  ;;  %v3519_v30 = vmax.f32 %v3378_v46, 0.0 }
 0x5a3   :  { %v3604_v37 = vpack.c.bf16 %v3516_v34, %v3512_v58  ;;  %v3606_v15 = vpack.c.bf16 %v3518_v7, %v3514_v29 }
 0x5a4   :  { %v3605_v22 = vpack.c.bf16 %v3517_v54, %v3513_v0  ;;  %v3607_v4 = vpack.c.bf16 %v3519_v30, %v3515_v47  ;;  %v3188_v10 = vpop.f32.mrb[168].mxu0  ;;  %v3381_v61 = vpop.f32.mrb[232].mxu1 }
 0x5a5   :  { %v3189_v50 = vadd.f32 %v3188_v10, %v6412_v21  ;;  %v3382_v5 = vadd.f32 %v3381_v61, %v6416_v12  ;;  %v3190_v51 = vpop.f32.mrb[169].mxu0  ;;  %v3383_v1 = vpop.f32.mrb[233].mxu1 }
 0x5a6   :  { %v3191_v38 = vadd.f32 %v3190_v51, %v6419_v17  ;;  %v3384_v41 = vadd.f32 %v3383_v1, %v6423_v18  ;;  %v3192_v49 = vpop.f32.mrb[170].mxu0  ;;  %v3385_v59 = vpop.f32.mrb[234].mxu1  ;;  %3999 = vmatprep.mubr.bf16.mxu0 %v3605_v22  ;;  %4160 = vmatprep.mubr.bf16.mxu1 %v3607_v4 }
 0x5a7   :  { %v3193_v62 = vadd.f32 %v3192_v49, %v6412_v21  ;;  %v3386_v19 = vadd.f32 %v3385_v59, %v6416_v12  ;;  %v3194_v63 = vpop.f32.mrb[171].mxu0  ;;  %v3387_v2 = vpop.f32.mrb[235].mxu1  ;;  %4000 = vmatmul.mubr.bf16.gmra.mrb[228].mxu0 %v3604_v37  ;;  %4161 = vmatmul.mubr.bf16.gmra.mrb[36].mxu1 %v3606_v15  ;;  %v3520_v9 = vmax.f32 %v3189_v50, 0.0  ;;  %v3522_v13 = vmax.f32 %v3382_v5, 0.0 }
 0x5a8   :  { %v3195_v3 = vadd.f32 %v3194_v63, %v6419_v17  ;;  %v3388_v8 = vadd.f32 %v3387_v2, %v6423_v18  ;;  %v3521_v57 = vmax.f32 %v3191_v38, 0.0  ;;  %v3523_v20 = vmax.f32 %v3384_v41, 0.0 }
 0x5a9   :  { %v3524_v56 = vmax.f32 %v3193_v62, 0.0  ;;  %v3526_v16 = vmax.f32 %v3386_v19, 0.0 }
 0x5aa   :  { %v3525_v23 = vmax.f32 %v3195_v3, 0.0  ;;  %v3527_v24 = vmax.f32 %v3388_v8, 0.0 }
 0x5ab   :  { %v3608_v26 = vpack.c.bf16 %v3524_v56, %v3520_v9  ;;  %v3610_v53 = vpack.c.bf16 %v3526_v16, %v3522_v13 }
 0x5ac   :  { %v3609_v14 = vpack.c.bf16 %v3525_v23, %v3521_v57  ;;  %v3611_v25 = vpack.c.bf16 %v3527_v24, %v3523_v20  ;;  %v3198_v31 = vpop.f32.mrb[172].mxu0  ;;  %v3391_v32 = vpop.f32.mrb[236].mxu1 }
 0x5ad   :  { %v3199_v55 = vadd.f32 %v3198_v31, %v6412_v21  ;;  %v3392_v52 = vadd.f32 %v3391_v32, %v6416_v12  ;;  %v3200_v27 = vpop.f32.mrb[173].mxu0  ;;  %v3393_v60 = vpop.f32.mrb[237].mxu1 }
 0x5ae   :  { %v3201_v35 = vadd.f32 %v3200_v27, %v6419_v17  ;;  %v3394_v40 = vadd.f32 %v3393_v60, %v6423_v18  ;;  %v3202_v42 = vpop.f32.mrb[174].mxu0  ;;  %v3395_v43 = vpop.f32.mrb[238].mxu1  ;;  %4007 = vmatprep.mubr.bf16.mxu0 %v3609_v14  ;;  %4168 = vmatprep.mubr.bf16.mxu1 %v3611_v25 }
 0x5af   :  { %v3203_v44 = vadd.f32 %v3202_v42, %v6412_v21  ;;  %v3396_v45 = vadd.f32 %v3395_v43, %v6416_v12  ;;  %v3204_v48 = vpop.f32.mrb[175].mxu0  ;;  %v3397_v36 = vpop.f32.mrb[239].mxu1  ;;  %4008 = vmatmul.mubr.bf16.gmra.mrb[232].mxu0 %v3608_v26  ;;  %4169 = vmatmul.mubr.bf16.gmra.mrb[40].mxu1 %v3610_v53  ;;  %v3528_v6 = vmax.f32 %v3199_v55, 0.0  ;;  %v3530_v28 = vmax.f32 %v3392_v52, 0.0 }
 0x5b0   :  { %v3205_v39 = vadd.f32 %v3204_v48, %v6419_v17  ;;  %v3398_v33 = vadd.f32 %v3397_v36, %v6423_v18  ;;  %v3529_v58 = vmax.f32 %v3201_v35, 0.0  ;;  %v3531_v29 = vmax.f32 %v3394_v40, 0.0 }
 0x5b1   :  { %v3532_v11 = vmax.f32 %v3203_v44, 0.0  ;;  %v3534_v46 = vmax.f32 %v3396_v45, 0.0 }
 0x5b2   :  { %v3533_v34 = vmax.f32 %v3205_v39, 0.0  ;;  %v3535_v7 = vmax.f32 %v3398_v33, 0.0 }
 0x5b3   :  { %v3612_v0 = vpack.c.bf16 %v3532_v11, %v3528_v6  ;;  %v3614_v47 = vpack.c.bf16 %v3534_v46, %v3530_v28 }
 0x5b4   :  { %v3613_v54 = vpack.c.bf16 %v3533_v34, %v3529_v58  ;;  %v3615_v30 = vpack.c.bf16 %v3535_v7, %v3531_v29  ;;  %v3208_v37 = vpop.f32.mrb[176].mxu0  ;;  %v3401_v15 = vpop.f32.mrb[240].mxu1 }
 0x5b5   :  { %v3209_v22 = vadd.f32 %v3208_v37, %v6412_v21  ;;  %v3402_v4 = vadd.f32 %v3401_v15, %v6416_v12  ;;  %v3210_v10 = vpop.f32.mrb[177].mxu0  ;;  %v3403_v61 = vpop.f32.mrb[241].mxu1 }
 0x5b6   :  { %v3211_v50 = vadd.f32 %v3210_v10, %v6419_v17  ;;  %v3404_v5 = vadd.f32 %v3403_v61, %v6423_v18  ;;  %v3212_v51 = vpop.f32.mrb[178].mxu0  ;;  %v3405_v1 = vpop.f32.mrb[242].mxu1  ;;  %4015 = vmatprep.mubr.bf16.mxu0 %v3613_v54  ;;  %4176 = vmatprep.mubr.bf16.mxu1 %v3615_v30 }
 0x5b7   :  { %v3213_v38 = vadd.f32 %v3212_v51, %v6412_v21  ;;  %v3406_v41 = vadd.f32 %v3405_v1, %v6416_v12  ;;  %v3214_v49 = vpop.f32.mrb[179].mxu0  ;;  %v3407_v59 = vpop.f32.mrb[243].mxu1  ;;  %4016 = vmatmul.mubr.bf16.gmra.mrb[236].mxu0 %v3612_v0  ;;  %4177 = vmatmul.mubr.bf16.gmra.mrb[44].mxu1 %v3614_v47  ;;  %v3536_v63 = vmax.f32 %v3209_v22, 0.0  ;;  %v3538_v2 = vmax.f32 %v3402_v4, 0.0 }
 0x5b8   :  { %v3215_v62 = vadd.f32 %v3214_v49, %v6419_v17  ;;  %v3408_v19 = vadd.f32 %v3407_v59, %v6423_v18  ;;  %v3537_v9 = vmax.f32 %v3211_v50, 0.0  ;;  %v3539_v13 = vmax.f32 %v3404_v5, 0.0 }
 0x5b9   :  { %v3540_v3 = vmax.f32 %v3213_v38, 0.0  ;;  %v3542_v8 = vmax.f32 %v3406_v41, 0.0 }
 0x5ba   :  { %v3541_v56 = vmax.f32 %v3215_v62, 0.0  ;;  %v3543_v16 = vmax.f32 %v3408_v19, 0.0 }
 0x5bb   :  { %v3616_v57 = vpack.c.bf16 %v3540_v3, %v3536_v63  ;;  %v3618_v20 = vpack.c.bf16 %v3542_v8, %v3538_v2 }
 0x5bc   :  { %v3617_v23 = vpack.c.bf16 %v3541_v56, %v3537_v9  ;;  %v3619_v24 = vpack.c.bf16 %v3543_v16, %v3539_v13  ;;  %v3218_v26 = vpop.f32.mrb[180].mxu0  ;;  %v3411_v53 = vpop.f32.mrb[244].mxu1 }
 0x5bd   :  { %v3219_v14 = vadd.f32 %v3218_v26, %v6412_v21  ;;  %v3412_v25 = vadd.f32 %v3411_v53, %v6416_v12  ;;  %v3220_v31 = vpop.f32.mrb[181].mxu0  ;;  %v3413_v32 = vpop.f32.mrb[245].mxu1 }
 0x5be   :  { %v3221_v55 = vadd.f32 %v3220_v31, %v6419_v17  ;;  %v3414_v52 = vadd.f32 %v3413_v32, %v6423_v18  ;;  %v3222_v27 = vpop.f32.mrb[182].mxu0  ;;  %v3415_v60 = vpop.f32.mrb[246].mxu1  ;;  %4023 = vmatprep.mubr.bf16.mxu0 %v3617_v23  ;;  %4184 = vmatprep.mubr.bf16.mxu1 %v3619_v24 }
 0x5bf   :  { %v3223_v35 = vadd.f32 %v3222_v27, %v6412_v21  ;;  %v3416_v40 = vadd.f32 %v3415_v60, %v6416_v12  ;;  %v3224_v42 = vpop.f32.mrb[183].mxu0  ;;  %v3417_v43 = vpop.f32.mrb[247].mxu1  ;;  %4024 = vmatmul.mubr.bf16.gmra.mrb[240].mxu0 %v3616_v57  ;;  %4185 = vmatmul.mubr.bf16.gmra.mrb[48].mxu1 %v3618_v20  ;;  %v3544_v48 = vmax.f32 %v3219_v14, 0.0  ;;  %v3546_v36 = vmax.f32 %v3412_v25, 0.0 }
 0x5c0   :  { %v3225_v44 = vadd.f32 %v3224_v42, %v6419_v17  ;;  %v3418_v45 = vadd.f32 %v3417_v43, %v6423_v18  ;;  %v3545_v6 = vmax.f32 %v3221_v55, 0.0  ;;  %v3547_v28 = vmax.f32 %v3414_v52, 0.0 }
 0x5c1   :  { %v3548_v39 = vmax.f32 %v3223_v35, 0.0  ;;  %v3550_v33 = vmax.f32 %v3416_v40, 0.0 }
 0x5c2   :  { %v3549_v11 = vmax.f32 %v3225_v44, 0.0  ;;  %v3551_v46 = vmax.f32 %v3418_v45, 0.0 }
 0x5c3   :  { %v3620_v58 = vpack.c.bf16 %v3548_v39, %v3544_v48  ;;  %v3622_v29 = vpack.c.bf16 %v3550_v33, %v3546_v36 }
 0x5c4   :  { %v3621_v34 = vpack.c.bf16 %v3549_v11, %v3545_v6  ;;  %v3623_v7 = vpack.c.bf16 %v3551_v46, %v3547_v28  ;;  %v3228_v0 = vpop.f32.mrb[184].mxu0  ;;  %v3421_v47 = vpop.f32.mrb[248].mxu1 }
 0x5c5   :  { %v3229_v54 = vadd.f32 %v3228_v0, %v6412_v21  ;;  %v3422_v30 = vadd.f32 %v3421_v47, %v6416_v12  ;;  %v3230_v37 = vpop.f32.mrb[185].mxu0  ;;  %v3423_v15 = vpop.f32.mrb[249].mxu1 }
 0x5c6   :  { %v3231_v22 = vadd.f32 %v3230_v37, %v6419_v17  ;;  %v3424_v4 = vadd.f32 %v3423_v15, %v6423_v18  ;;  %v3232_v10 = vpop.f32.mrb[186].mxu0  ;;  %v3425_v61 = vpop.f32.mrb[250].mxu1  ;;  %4031 = vmatprep.mubr.bf16.mxu0 %v3621_v34  ;;  %4192 = vmatprep.mubr.bf16.mxu1 %v3623_v7 }
 0x5c7   :  { %v3233_v50 = vadd.f32 %v3232_v10, %v6412_v21  ;;  %v3426_v5 = vadd.f32 %v3425_v61, %v6416_v12  ;;  %v3234_v51 = vpop.f32.mrb[187].mxu0  ;;  %v3427_v1 = vpop.f32.mrb[251].mxu1  ;;  %4032 = vmatmul.mubr.bf16.gmra.mrb[244].mxu0 %v3620_v58  ;;  %4193 = vmatmul.mubr.bf16.gmra.mrb[52].mxu1 %v3622_v29  ;;  %v3552_v49 = vmax.f32 %v3229_v54, 0.0  ;;  %v3554_v59 = vmax.f32 %v3422_v30, 0.0 }
 0x5c8   :  { %v3235_v38 = vadd.f32 %v3234_v51, %v6419_v17  ;;  %v3428_v41 = vadd.f32 %v3427_v1, %v6423_v18  ;;  %v3553_v63 = vmax.f32 %v3231_v22, 0.0  ;;  %v3555_v2 = vmax.f32 %v3424_v4, 0.0 }
 0x5c9   :  { %v3556_v62 = vmax.f32 %v3233_v50, 0.0  ;;  %v3558_v19 = vmax.f32 %v3426_v5, 0.0 }
 0x5ca   :  { %v3557_v3 = vmax.f32 %v3235_v38, 0.0  ;;  %v3559_v8 = vmax.f32 %v3428_v41, 0.0 }
 0x5cb   :  { %v3624_v9 = vpack.c.bf16 %v3556_v62, %v3552_v49  ;;  %v3626_v13 = vpack.c.bf16 %v3558_v19, %v3554_v59 }
 0x5cc   :  { %v3625_v56 = vpack.c.bf16 %v3557_v3, %v3553_v63  ;;  %v3627_v16 = vpack.c.bf16 %v3559_v8, %v3555_v2  ;;  %v3238_v57 = vpop.f32.mrb[188].mxu0  ;;  %v3431_v20 = vpop.f32.mrb[252].mxu1 }
 0x5cd   :  { %v3239_v23 = vadd.f32 %v3238_v57, %v6412_v21  ;;  %v3432_v24 = vadd.f32 %v3431_v20, %v6416_v12  ;;  %v3240_v26 = vpop.f32.mrb[189].mxu0  ;;  %v3433_v53 = vpop.f32.mrb[253].mxu1 }
 0x5ce   :  { %v3241_v14 = vadd.f32 %v3240_v26, %v6419_v17  ;;  %v3434_v25 = vadd.f32 %v3433_v53, %v6423_v18  ;;  %v3242_v31 = vpop.f32.mrb[190].mxu0  ;;  %v3435_v32 = vpop.f32.mrb[254].mxu1  ;;  %4039 = vmatprep.mubr.bf16.mxu0 %v3625_v56  ;;  %4200 = vmatprep.mubr.bf16.mxu1 %v3627_v16 }
 0x5cf   :  { %v3243_v55 = vadd.f32 %v3242_v31, %v6412_v21  ;;  %v3436_v52 = vadd.f32 %v3435_v32, %v6416_v12  ;;  %v3244_v27 = vpop.f32.mrb[191].mxu0  ;;  %v3437_v60 = vpop.f32.mrb[255].mxu1  ;;  %4040 = vmatmul.mubr.bf16.gmra.mrb[248].mxu0 %v3624_v9  ;;  %4201 = vmatmul.mubr.bf16.gmra.mrb[56].mxu1 %v3626_v13  ;;  %v3560_v42 = vmax.f32 %v3239_v23, 0.0  ;;  %v3562_v43 = vmax.f32 %v3432_v24, 0.0 }
 0x5d0   :  { %v3245_v35 = vadd.f32 %v3244_v27, %v6419_v17  ;;  %v3438_v40 = vadd.f32 %v3437_v60, %v6423_v18  ;;  %v3561_v48 = vmax.f32 %v3241_v14, 0.0  ;;  %v3563_v36 = vmax.f32 %v3434_v25, 0.0  ;;  %v6556_v18 = vld [vmem:[%s6698_s12] ss:$0 sm:$0xff] }
 0x5d1   :  { %v3564_v44 = vmax.f32 %v3243_v55, 0.0  ;;  %v3566_v45 = vmax.f32 %v3436_v52, 0.0 }
 0x5d2   :  { %v3565_v39 = vmax.f32 %v3245_v35, 0.0  ;;  %v3567_v33 = vmax.f32 %v3438_v40, 0.0 }
 0x5d3   :  { %v3628_v6 = vpack.c.bf16 %v3564_v44, %v3560_v42  ;;  %v3630_v21 = vpack.c.bf16 %v3566_v45, %v3562_v43 }
 0x5d4   :  { %v3629_v28 = vpack.c.bf16 %v3565_v39, %v3561_v48  ;;  %v3631_v12 = vpack.c.bf16 %v3567_v33, %v3563_v36 }
 0x5d6   :  { %4047 = vmatprep.mubr.bf16.mxu0 %v3629_v28  ;;  %4208 = vmatprep.mubr.bf16.mxu1 %v3631_v12 }
 0x5d7   :  { %4048 = vmatmul.mubr.bf16.gmra.mrb[252].mxu0 %v3628_v6  ;;  %4209 = vmatmul.mubr.bf16.gmra.mrb[60].mxu1 %v3630_v21 }
 0x632   :  { %v4615_v11 = vpop.f32.mrb[192].mxu0  ;;  %v4727_v17 = vpop.f32.mrb[0].mxu1 }
 0x633   :  { %v4616_v46 = vpop.f32.mrb[193].mxu0  ;;  %v4728_v58 = vpop.f32.mrb[1].mxu1 }
 0x634   :  { %v4617_v29 = vadd.f32 %v4616_v46, %v4615_v11  ;;  %v4729_v34 = vadd.f32 %v4728_v58, %v4727_v17  ;;  %v4618_v7 = vpop.f32.mrb[194].mxu0  ;;  %v4730_v0 = vpop.f32.mrb[2].mxu1 }
 0x635   :  { %v4619_v47 = vpop.f32.mrb[195].mxu0  ;;  %v4731_v54 = vpop.f32.mrb[3].mxu1 }
 0x636   :  { %v3930_v30 = vadd.f32 %v4617_v29, %v6556_v18  ;;  %v4620_v37 = vadd.f32 %v4619_v47, %v4618_v7  ;;  %v4732_v15 = vadd.f32 %v4731_v54, %v4730_v0 }
 0x638   :  { %v4091_v22 = vadd.f32 %v4729_v34, %v3930_v30  ;;  %v3933_v4 = vadd.f32 %v4620_v37, %v6556_v18 }
 0x63a   :  { %4217 = vst [vmem:[%s6700_s14] sm:$0xff] %v4091_v22  ;;  %v4094_v10 = vadd.f32 %v4732_v15, %v3933_v4  ;;  %v4621_v61 = vpop.f32.mrb[196].mxu0  ;;  %v4733_v50 = vpop.f32.mrb[4].mxu1 }
 0x63b   :  { %v4622_v5 = vpop.f32.mrb[197].mxu0  ;;  %v4734_v51 = vpop.f32.mrb[5].mxu1 }
 0x63c   :  { %4218 = vst [vmem:[%s6700_s14 + $0x8] sm:$0xff] %v4094_v10  ;;  %v4623_v1 = vadd.f32 %v4622_v5, %v4621_v61  ;;  %v4735_v38 = vadd.f32 %v4734_v51, %v4733_v50  ;;  %v4624_v41 = vpop.f32.mrb[198].mxu0  ;;  %v4736_v49 = vpop.f32.mrb[6].mxu1 }
 0x63d   :  { %v4625_v59 = vpop.f32.mrb[199].mxu0  ;;  %v4737_v62 = vpop.f32.mrb[7].mxu1 }
 0x63e   :  { %v3938_v19 = vadd.f32 %v4623_v1, %v6556_v18  ;;  %v4626_v63 = vadd.f32 %v4625_v59, %v4624_v41  ;;  %v4738_v2 = vadd.f32 %v4737_v62, %v4736_v49 }
 0x640   :  { %v4099_v3 = vadd.f32 %v4735_v38, %v3938_v19  ;;  %v3941_v8 = vadd.f32 %v4626_v63, %v6556_v18 }
 0x642   :  { %4219 = vst [vmem:[%s6700_s14 + $0x10] sm:$0xff] %v4099_v3  ;;  %v4102_v9 = vadd.f32 %v4738_v2, %v3941_v8  ;;  %v4627_v13 = vpop.f32.mrb[200].mxu0  ;;  %v4739_v56 = vpop.f32.mrb[8].mxu1 }
 0x643   :  { %v4628_v16 = vpop.f32.mrb[201].mxu0  ;;  %v4740_v57 = vpop.f32.mrb[9].mxu1 }
 0x644   :  { %4220 = vst [vmem:[%s6700_s14 + $0x18] sm:$0xff] %v4102_v9  ;;  %v4629_v20 = vadd.f32 %v4628_v16, %v4627_v13  ;;  %v4741_v23 = vadd.f32 %v4740_v57, %v4739_v56  ;;  %v4630_v24 = vpop.f32.mrb[202].mxu0  ;;  %v4742_v26 = vpop.f32.mrb[10].mxu1 }
 0x645   :  { %v4631_v53 = vpop.f32.mrb[203].mxu0  ;;  %v4743_v14 = vpop.f32.mrb[11].mxu1 }
 0x646   :  { %v3946_v25 = vadd.f32 %v4629_v20, %v6556_v18  ;;  %v4632_v31 = vadd.f32 %v4631_v53, %v4630_v24  ;;  %v4744_v32 = vadd.f32 %v4743_v14, %v4742_v26 }
 0x648   :  { %v4107_v55 = vadd.f32 %v4741_v23, %v3946_v25  ;;  %v3949_v52 = vadd.f32 %v4632_v31, %v6556_v18 }
 0x64a   :  { %4221 = vst [vmem:[%s6700_s14 + $0x20] sm:$0xff] %v4107_v55  ;;  %v4110_v27 = vadd.f32 %v4744_v32, %v3949_v52  ;;  %v4633_v60 = vpop.f32.mrb[204].mxu0  ;;  %v4745_v35 = vpop.f32.mrb[12].mxu1 }
 0x64b   :  { %v4634_v40 = vpop.f32.mrb[205].mxu0  ;;  %v4746_v42 = vpop.f32.mrb[13].mxu1 }
 0x64c   :  { %4222 = vst [vmem:[%s6700_s14 + $0x28] sm:$0xff] %v4110_v27  ;;  %v4635_v43 = vadd.f32 %v4634_v40, %v4633_v60  ;;  %v4747_v44 = vadd.f32 %v4746_v42, %v4745_v35  ;;  %v4636_v45 = vpop.f32.mrb[206].mxu0  ;;  %v4748_v48 = vpop.f32.mrb[14].mxu1 }
 0x64d   :  { %v4637_v36 = vpop.f32.mrb[207].mxu0  ;;  %v4749_v39 = vpop.f32.mrb[15].mxu1 }
 0x64e   :  { %v3954_v33 = vadd.f32 %v4635_v43, %v6556_v18  ;;  %v4638_v6 = vadd.f32 %v4637_v36, %v4636_v45  ;;  %v4750_v21 = vadd.f32 %v4749_v39, %v4748_v48 }
 0x650   :  { %v4115_v28 = vadd.f32 %v4747_v44, %v3954_v33  ;;  %v3957_v12 = vadd.f32 %v4638_v6, %v6556_v18 }
 0x652   :  { %4223 = vst [vmem:[%s6700_s14 + $0x30] sm:$0xff] %v4115_v28  ;;  %v4118_v11 = vadd.f32 %v4750_v21, %v3957_v12  ;;  %v4639_v17 = vpop.f32.mrb[208].mxu0  ;;  %v4751_v46 = vpop.f32.mrb[16].mxu1 }
 0x653   :  { %v4640_v58 = vpop.f32.mrb[209].mxu0  ;;  %v4752_v29 = vpop.f32.mrb[17].mxu1 }
 0x654   :  { %4224 = vst [vmem:[%s6700_s14 + $0x38] sm:$0xff] %v4118_v11  ;;  %v4641_v34 = vadd.f32 %v4640_v58, %v4639_v17  ;;  %v4753_v7 = vadd.f32 %v4752_v29, %v4751_v46  ;;  %v4642_v0 = vpop.f32.mrb[210].mxu0  ;;  %v4754_v47 = vpop.f32.mrb[18].mxu1 }
 0x655   :  { %v4643_v54 = vpop.f32.mrb[211].mxu0  ;;  %v4755_v30 = vpop.f32.mrb[19].mxu1 }
 0x656   :  { %v3962_v37 = vadd.f32 %v4641_v34, %v6556_v18  ;;  %v4644_v15 = vadd.f32 %v4643_v54, %v4642_v0  ;;  %v4756_v22 = vadd.f32 %v4755_v30, %v4754_v47 }
 0x658   :  { %v4123_v4 = vadd.f32 %v4753_v7, %v3962_v37  ;;  %v3965_v10 = vadd.f32 %v4644_v15, %v6556_v18 }
 0x65a   :  { %4225 = vst [vmem:[%s6700_s14 + $0x40] sm:$0xff] %v4123_v4  ;;  %v4126_v61 = vadd.f32 %v4756_v22, %v3965_v10  ;;  %v4645_v50 = vpop.f32.mrb[212].mxu0  ;;  %v4757_v5 = vpop.f32.mrb[20].mxu1 }
 0x65b   :  { %v4646_v51 = vpop.f32.mrb[213].mxu0  ;;  %v4758_v1 = vpop.f32.mrb[21].mxu1 }
 0x65c   :  { %4226 = vst [vmem:[%s6700_s14 + $0x48] sm:$0xff] %v4126_v61  ;;  %v4647_v38 = vadd.f32 %v4646_v51, %v4645_v50  ;;  %v4759_v41 = vadd.f32 %v4758_v1, %v4757_v5  ;;  %v4648_v49 = vpop.f32.mrb[214].mxu0  ;;  %v4760_v59 = vpop.f32.mrb[22].mxu1 }
 0x65d   :  { %v4649_v62 = vpop.f32.mrb[215].mxu0  ;;  %v4761_v19 = vpop.f32.mrb[23].mxu1 }
 0x65e   :  { %v3970_v63 = vadd.f32 %v4647_v38, %v6556_v18  ;;  %v4650_v2 = vadd.f32 %v4649_v62, %v4648_v49  ;;  %v4762_v3 = vadd.f32 %v4761_v19, %v4760_v59 }
 0x660   :  { %v4131_v8 = vadd.f32 %v4759_v41, %v3970_v63  ;;  %v3973_v9 = vadd.f32 %v4650_v2, %v6556_v18 }
 0x662   :  { %4227 = vst [vmem:[%s6700_s14 + $0x50] sm:$0xff] %v4131_v8  ;;  %v4134_v13 = vadd.f32 %v4762_v3, %v3973_v9  ;;  %v4651_v56 = vpop.f32.mrb[216].mxu0  ;;  %v4763_v16 = vpop.f32.mrb[24].mxu1 }
 0x663   :  { %v4652_v57 = vpop.f32.mrb[217].mxu0  ;;  %v4764_v20 = vpop.f32.mrb[25].mxu1 }
 0x664   :  { %4228 = vst [vmem:[%s6700_s14 + $0x58] sm:$0xff] %v4134_v13  ;;  %v4653_v23 = vadd.f32 %v4652_v57, %v4651_v56  ;;  %v4765_v24 = vadd.f32 %v4764_v20, %v4763_v16  ;;  %v4654_v26 = vpop.f32.mrb[218].mxu0  ;;  %v4766_v53 = vpop.f32.mrb[26].mxu1 }
 0x665   :  { %v4655_v14 = vpop.f32.mrb[219].mxu0  ;;  %v4767_v25 = vpop.f32.mrb[27].mxu1 }
 0x666   :  { %v3978_v31 = vadd.f32 %v4653_v23, %v6556_v18  ;;  %v4656_v32 = vadd.f32 %v4655_v14, %v4654_v26  ;;  %v4768_v55 = vadd.f32 %v4767_v25, %v4766_v53 }
 0x668   :  { %v4139_v52 = vadd.f32 %v4765_v24, %v3978_v31  ;;  %v3981_v27 = vadd.f32 %v4656_v32, %v6556_v18 }
 0x66a   :  { %4229 = vst [vmem:[%s6700_s14 + $0x60] sm:$0xff] %v4139_v52  ;;  %v4142_v60 = vadd.f32 %v4768_v55, %v3981_v27  ;;  %v4657_v35 = vpop.f32.mrb[220].mxu0  ;;  %v4769_v40 = vpop.f32.mrb[28].mxu1 }
 0x66b   :  { %v4658_v42 = vpop.f32.mrb[221].mxu0  ;;  %v4770_v43 = vpop.f32.mrb[29].mxu1 }
 0x66c   :  { %4230 = vst [vmem:[%s6700_s14 + $0x68] sm:$0xff] %v4142_v60  ;;  %v4659_v44 = vadd.f32 %v4658_v42, %v4657_v35  ;;  %v4771_v45 = vadd.f32 %v4770_v43, %v4769_v40  ;;  %v4660_v48 = vpop.f32.mrb[222].mxu0  ;;  %v4772_v36 = vpop.f32.mrb[30].mxu1 }
 0x66d   :  { %v4661_v39 = vpop.f32.mrb[223].mxu0  ;;  %v4773_v33 = vpop.f32.mrb[31].mxu1 }
 0x66e   :  { %v3986_v6 = vadd.f32 %v4659_v44, %v6556_v18  ;;  %v4662_v21 = vadd.f32 %v4661_v39, %v4660_v48  ;;  %v4774_v28 = vadd.f32 %v4773_v33, %v4772_v36 }
 0x670   :  { %v4147_v12 = vadd.f32 %v4771_v45, %v3986_v6  ;;  %v3989_v11 = vadd.f32 %v4662_v21, %v6556_v18 }
 0x672   :  { %4231 = vst [vmem:[%s6700_s14 + $0x70] sm:$0xff] %v4147_v12  ;;  %v4150_v17 = vadd.f32 %v4774_v28, %v3989_v11  ;;  %v4663_v46 = vpop.f32.mrb[224].mxu0  ;;  %v4775_v58 = vpop.f32.mrb[32].mxu1 }
 0x673   :  { %v4664_v29 = vpop.f32.mrb[225].mxu0  ;;  %v4776_v34 = vpop.f32.mrb[33].mxu1 }
 0x674   :  { %4232 = vst [vmem:[%s6700_s14 + $0x78] sm:$0xff] %v4150_v17  ;;  %v4665_v7 = vadd.f32 %v4664_v29, %v4663_v46  ;;  %v4777_v0 = vadd.f32 %v4776_v34, %v4775_v58  ;;  %v4666_v47 = vpop.f32.mrb[226].mxu0  ;;  %v4778_v54 = vpop.f32.mrb[34].mxu1 }
 0x675   :  { %v4667_v30 = vpop.f32.mrb[227].mxu0  ;;  %v4779_v37 = vpop.f32.mrb[35].mxu1 }
 0x676   :  { %v3994_v15 = vadd.f32 %v4665_v7, %v6556_v18  ;;  %v4668_v22 = vadd.f32 %v4667_v30, %v4666_v47  ;;  %v4780_v4 = vadd.f32 %v4779_v37, %v4778_v54 }
 0x678   :  { %v4155_v10 = vadd.f32 %v4777_v0, %v3994_v15  ;;  %v3997_v61 = vadd.f32 %v4668_v22, %v6556_v18 }
 0x67a   :  { %4233 = vst [vmem:[%s6700_s14 + $0x80] sm:$0xff] %v4155_v10  ;;  %v4158_v50 = vadd.f32 %v4780_v4, %v3997_v61  ;;  %v4669_v5 = vpop.f32.mrb[228].mxu0  ;;  %v4781_v51 = vpop.f32.mrb[36].mxu1 }
 0x67b   :  { %v4670_v1 = vpop.f32.mrb[229].mxu0  ;;  %v4782_v38 = vpop.f32.mrb[37].mxu1 }
 0x67c   :  { %4234 = vst [vmem:[%s6700_s14 + $0x88] sm:$0xff] %v4158_v50  ;;  %v4671_v41 = vadd.f32 %v4670_v1, %v4669_v5  ;;  %v4783_v49 = vadd.f32 %v4782_v38, %v4781_v51  ;;  %v4672_v59 = vpop.f32.mrb[230].mxu0  ;;  %v4784_v62 = vpop.f32.mrb[38].mxu1 }
 0x67d   :  { %v4673_v19 = vpop.f32.mrb[231].mxu0  ;;  %v4785_v63 = vpop.f32.mrb[39].mxu1 }
 0x67e   :  { %v4002_v2 = vadd.f32 %v4671_v41, %v6556_v18  ;;  %v4674_v3 = vadd.f32 %v4673_v19, %v4672_v59  ;;  %v4786_v8 = vadd.f32 %v4785_v63, %v4784_v62 }
 0x680   :  { %v4163_v9 = vadd.f32 %v4783_v49, %v4002_v2  ;;  %v4005_v13 = vadd.f32 %v4674_v3, %v6556_v18 }
 0x682   :  { %4235 = vst [vmem:[%s6700_s14 + $0x90] sm:$0xff] %v4163_v9  ;;  %v4166_v56 = vadd.f32 %v4786_v8, %v4005_v13  ;;  %v4675_v16 = vpop.f32.mrb[232].mxu0  ;;  %v4787_v57 = vpop.f32.mrb[40].mxu1 }
 0x683   :  { %v4676_v20 = vpop.f32.mrb[233].mxu0  ;;  %v4788_v23 = vpop.f32.mrb[41].mxu1 }
 0x684   :  { %4236 = vst [vmem:[%s6700_s14 + $0x98] sm:$0xff] %v4166_v56  ;;  %v4677_v24 = vadd.f32 %v4676_v20, %v4675_v16  ;;  %v4789_v26 = vadd.f32 %v4788_v23, %v4787_v57  ;;  %v4678_v53 = vpop.f32.mrb[234].mxu0  ;;  %v4790_v14 = vpop.f32.mrb[42].mxu1 }
 0x685   :  { %v4679_v25 = vpop.f32.mrb[235].mxu0  ;;  %v4791_v31 = vpop.f32.mrb[43].mxu1 }
 0x686   :  { %v4010_v32 = vadd.f32 %v4677_v24, %v6556_v18  ;;  %v4680_v55 = vadd.f32 %v4679_v25, %v4678_v53  ;;  %v4792_v52 = vadd.f32 %v4791_v31, %v4790_v14 }
 0x688   :  { %v4171_v27 = vadd.f32 %v4789_v26, %v4010_v32  ;;  %v4013_v60 = vadd.f32 %v4680_v55, %v6556_v18 }
 0x68a   :  { %4237 = vst [vmem:[%s6700_s14 + $0xa0] sm:$0xff] %v4171_v27  ;;  %v4174_v35 = vadd.f32 %v4792_v52, %v4013_v60  ;;  %v4681_v40 = vpop.f32.mrb[236].mxu0  ;;  %v4793_v42 = vpop.f32.mrb[44].mxu1 }
 0x68b   :  { %v4682_v43 = vpop.f32.mrb[237].mxu0  ;;  %v4794_v44 = vpop.f32.mrb[45].mxu1 }
 0x68c   :  { %4238 = vst [vmem:[%s6700_s14 + $0xa8] sm:$0xff] %v4174_v35  ;;  %v4683_v45 = vadd.f32 %v4682_v43, %v4681_v40  ;;  %v4795_v48 = vadd.f32 %v4794_v44, %v4793_v42  ;;  %v4684_v36 = vpop.f32.mrb[238].mxu0  ;;  %v4796_v39 = vpop.f32.mrb[46].mxu1 }
 0x68d   :  { %v4685_v33 = vpop.f32.mrb[239].mxu0  ;;  %v4797_v6 = vpop.f32.mrb[47].mxu1 }
 0x68e   :  { %v4018_v21 = vadd.f32 %v4683_v45, %v6556_v18  ;;  %v4686_v28 = vadd.f32 %v4685_v33, %v4684_v36  ;;  %v4798_v12 = vadd.f32 %v4797_v6, %v4796_v39 }
 0x690   :  { %v4179_v11 = vadd.f32 %v4795_v48, %v4018_v21  ;;  %v4021_v17 = vadd.f32 %v4686_v28, %v6556_v18 }
 0x692   :  { %4239 = vst [vmem:[%s6700_s14 + $0xb0] sm:$0xff] %v4179_v11  ;;  %v4182_v46 = vadd.f32 %v4798_v12, %v4021_v17  ;;  %v4687_v58 = vpop.f32.mrb[240].mxu0  ;;  %v4799_v29 = vpop.f32.mrb[48].mxu1 }
 0x693   :  { %v4688_v34 = vpop.f32.mrb[241].mxu0  ;;  %v4800_v7 = vpop.f32.mrb[49].mxu1 }
 0x694   :  { %4240 = vst [vmem:[%s6700_s14 + $0xb8] sm:$0xff] %v4182_v46  ;;  %v4689_v0 = vadd.f32 %v4688_v34, %v4687_v58  ;;  %v4801_v47 = vadd.f32 %v4800_v7, %v4799_v29  ;;  %v4690_v54 = vpop.f32.mrb[242].mxu0  ;;  %v4802_v30 = vpop.f32.mrb[50].mxu1 }
 0x695   :  { %v4691_v37 = vpop.f32.mrb[243].mxu0  ;;  %v4803_v15 = vpop.f32.mrb[51].mxu1 }
 0x696   :  { %v4026_v22 = vadd.f32 %v4689_v0, %v6556_v18  ;;  %v4692_v4 = vadd.f32 %v4691_v37, %v4690_v54  ;;  %v4804_v10 = vadd.f32 %v4803_v15, %v4802_v30 }
 0x698   :  { %v4187_v61 = vadd.f32 %v4801_v47, %v4026_v22  ;;  %v4029_v50 = vadd.f32 %v4692_v4, %v6556_v18 }
 0x69a   :  { %4241 = vst [vmem:[%s6700_s14 + $0xc0] sm:$0xff] %v4187_v61  ;;  %v4190_v5 = vadd.f32 %v4804_v10, %v4029_v50  ;;  %v4693_v51 = vpop.f32.mrb[244].mxu0  ;;  %v4805_v1 = vpop.f32.mrb[52].mxu1 }
 0x69b   :  { %v4694_v38 = vpop.f32.mrb[245].mxu0  ;;  %v4806_v41 = vpop.f32.mrb[53].mxu1 }
 0x69c   :  { %4242 = vst [vmem:[%s6700_s14 + $0xc8] sm:$0xff] %v4190_v5  ;;  %v4695_v49 = vadd.f32 %v4694_v38, %v4693_v51  ;;  %v4807_v59 = vadd.f32 %v4806_v41, %v4805_v1  ;;  %v4696_v62 = vpop.f32.mrb[246].mxu0  ;;  %v4808_v19 = vpop.f32.mrb[54].mxu1 }
 0x69d   :  { %v4697_v63 = vpop.f32.mrb[247].mxu0  ;;  %v4809_v2 = vpop.f32.mrb[55].mxu1 }
 0x69e   :  { %v4034_v3 = vadd.f32 %v4695_v49, %v6556_v18  ;;  %v4698_v8 = vadd.f32 %v4697_v63, %v4696_v62  ;;  %v4810_v9 = vadd.f32 %v4809_v2, %v4808_v19 }
 0x6a0   :  { %v4195_v13 = vadd.f32 %v4807_v59, %v4034_v3  ;;  %v4037_v56 = vadd.f32 %v4698_v8, %v6556_v18 }
 0x6a2   :  { %4243 = vst [vmem:[%s6700_s14 + $0xd0] sm:$0xff] %v4195_v13  ;;  %v4198_v16 = vadd.f32 %v4810_v9, %v4037_v56  ;;  %v4699_v57 = vpop.f32.mrb[248].mxu0  ;;  %v4811_v20 = vpop.f32.mrb[56].mxu1 }
 0x6a3   :  { %v4700_v23 = vpop.f32.mrb[249].mxu0  ;;  %v4812_v24 = vpop.f32.mrb[57].mxu1 }
 0x6a4   :  { %4244 = vst [vmem:[%s6700_s14 + $0xd8] sm:$0xff] %v4198_v16  ;;  %v4701_v26 = vadd.f32 %v4700_v23, %v4699_v57  ;;  %v4813_v53 = vadd.f32 %v4812_v24, %v4811_v20  ;;  %v4702_v14 = vpop.f32.mrb[250].mxu0  ;;  %v4814_v25 = vpop.f32.mrb[58].mxu1 }
 0x6a5   :  { %v4703_v31 = vpop.f32.mrb[251].mxu0  ;;  %v4815_v32 = vpop.f32.mrb[59].mxu1 }
 0x6a6   :  { %v4042_v55 = vadd.f32 %v4701_v26, %v6556_v18  ;;  %v4704_v52 = vadd.f32 %v4703_v31, %v4702_v14  ;;  %v4816_v27 = vadd.f32 %v4815_v32, %v4814_v25 }
 0x6a8   :  { %v4203_v60 = vadd.f32 %v4813_v53, %v4042_v55  ;;  %v4045_v35 = vadd.f32 %v4704_v52, %v6556_v18 }
 0x6aa   :  { %4245 = vst [vmem:[%s6700_s14 + $0xe0] sm:$0xff] %v4203_v60  ;;  %v4206_v40 = vadd.f32 %v4816_v27, %v4045_v35  ;;  %v4705_v42 = vpop.f32.mrb[252].mxu0  ;;  %v4817_v43 = vpop.f32.mrb[60].mxu1 }
 0x6ab   :  { %v4706_v44 = vpop.f32.mrb[253].mxu0  ;;  %v4818_v45 = vpop.f32.mrb[61].mxu1 }
 0x6ac   :  { %4246 = vst [vmem:[%s6700_s14 + $0xe8] sm:$0xff] %v4206_v40  ;;  %v4707_v48 = vadd.f32 %v4706_v44, %v4705_v42  ;;  %v4819_v36 = vadd.f32 %v4818_v45, %v4817_v43  ;;  %v4708_v39 = vpop.f32.mrb[254].mxu0  ;;  %v4820_v33 = vpop.f32.mrb[62].mxu1 }
 0x6ad   :  { %v4709_v6 = vpop.f32.mrb[255].mxu0  ;;  %v4821_v21 = vpop.f32.mrb[63].mxu1 }
 0x6ae   :  { %v4050_v28 = vadd.f32 %v4707_v48, %v6556_v18  ;;  %v4710_v12 = vadd.f32 %v4709_v6, %v4708_v39  ;;  %v4822_v11 = vadd.f32 %v4821_v21, %v4820_v33 }
 0x6b0   :  { %v4211_v17 = vadd.f32 %v4819_v36, %v4050_v28  ;;  %v4053_v46 = vadd.f32 %v4710_v12, %v6556_v18 }
 0x6b2   :  { %4247 = vst [vmem:[%s6700_s14 + $0xf0] sm:$0xff] %v4211_v17  ;;  %v4214_v58 = vadd.f32 %v4822_v11, %v4053_v46 }
 0x6b4   :  { %4248 = vst [vmem:[%s6700_s14 + $0xf8] sm:$0xff] %v4214_v58 }
 0x6b5   :  { %4257 = vsyncpa [#allocation3], 1 }
 0x6b6   :  { %4258 = vsyncpa [#allocation5], 1 }
 0x6b7   :  { %4259 = vsyncpa [#allocation8], 1 }

</bundles_post_ra>
